<compile_context>
chip_gen: v7x
topology: tpu7x:2x2x1
jax: 0.10.0
libtpu: 0.0.40
codegen_flags: <defaults>
</compile_context>

<pallas_src>
import functools

import jax
import jax.numpy as jnp
from jax import lax
from jax.experimental import pallas as pl
from jax.experimental.pallas import tpu as pltpu

EPS = 1e-5  # PyTorch nn.LayerNorm default eps


# ---------------------------------------------------------------------------
# Kernel
# ---------------------------------------------------------------------------
def decoder_kernel(
    xs_ref,      # [TN, 3D] f32 : [st | motion | mfg]
    xm_ref,      # [TN, 2D] f32 : [alg | cig]
    wsh_ref,     # [2, 3D, D] bf16 : folded shared first-layer weights (pi, aggr)
    wmp_ref,     # [F, 2D, D] bf16 : folded per-mode first-layer weights (pi)
    wma_ref,     # [F, 2D, D] bf16 : folded per-mode first-layer weights (aggr)
    sqw_ref,     # [5, D, D]  bf16 : w_p2, w_p3, w_a2, w_l1, w_s1
    headw_ref,   # [2, D, T2] bf16 : w_l2, w_s2
    bmp_ref,     # [F, D] f32 : folded first-layer bias (pi, per mode)
    bma_ref,     # [F, D] f32 : folded first-layer bias (aggr, per mode)
    vec_ref,     # [19, D] f32 : LN gammas/betas + mid-layer biases (see prepare_params)
    headb_ref,   # [2, T2] f32 : b_l2, b_s2
    wp4_ref,     # [1, D]  f32 : pi final-layer weight (elementwise, VPU)
    bp4_ref,     # [1, 1]  f32 : pi final-layer bias (SMEM scalar)
    out_ref,     # [F, TN, OUT_W] f32 : loc | scale | pi | zero pad (lane-dense)
    *, dim, num_modes, t2, out_w, min_scale):
    D = dim
    F = num_modes
    f32 = jnp.float32
    bf16 = jnp.bfloat16
    relu = lambda x: jnp.maximum(x, 0.0)

    def vrow(i):                       # lazy [1, D] bias / gamma / beta load
        return vec_ref[i:i + 1, :]

    def ln(x, gi, bi):                 # LayerNorm, f32 statistics
        mu = jnp.mean(x, axis=-1, keepdims=True)
        xc = x - mu
        var = jnp.mean(xc * xc, axis=-1, keepdims=True)
        return xc * lax.rsqrt(var + EPS) * vrow(gi) + vrow(bi)

    def dot(x, w):                     # bf16 MXU operands, f32 accumulate
        return jnp.dot(x.astype(bf16), w, preferred_element_type=f32)

    xs_b = xs_ref[...].astype(bf16)    # [TN, 3D]
    xm_b = xm_ref[...].astype(bf16)    # [TN, 2D]
    tn = xs_b.shape[0]

    # Shared part of both first layers: computed once, reused by every mode.
    s_pi = jnp.dot(xs_b, wsh_ref[0], preferred_element_type=f32)   # [TN, D]
    s_ag = jnp.dot(xs_b, wsh_ref[1], preferred_element_type=f32)   # [TN, D]

    wp4 = wp4_ref[...]                 # [1, D] f32 (VPU elementwise)
    bp4 = bp4_ref[0, 0]                # scalar from SMEM
    pad_w = out_w - 2 * t2 - 1
    pad = jnp.zeros((tn, pad_w), f32) if pad_w > 0 else None

    for f in range(F):                 # static unroll over modes
        # ---- folded first layers (mode-dependent part) ----
        zp = s_pi + jnp.dot(xm_b, wmp_ref[f], preferred_element_type=f32) \
             + bmp_ref[f:f + 1, :]
        za = s_ag + jnp.dot(xm_b, wma_ref[f], preferred_element_type=f32) \
             + bma_ref[f:f + 1, :]

        # ---- pi branch: (LN -> ReLU) then 2 x (Linear -> LN -> ReLU) -> Linear(D,1) ----
        h = relu(ln(zp, 0, 1))
        h = relu(ln(dot(h, sqw_ref[0]) + vrow(2), 3, 4))
        h = relu(ln(dot(h, sqw_ref[1]) + vrow(5), 6, 7))
        pi_f = jnp.sum(h * wp4, axis=-1, keepdims=True) + bp4          # [TN, 1]

        # ---- aggr branch: (LN -> ReLU) -> Linear -> LN -> ReLU ----
        ha = relu(ln(za, 8, 9))
        agg = relu(ln(dot(ha, sqw_ref[2]) + vrow(10), 11, 12))

        # ---- loc head ----
        hl = relu(ln(dot(agg, sqw_ref[3]) + vrow(13), 14, 15))
        loc = dot(hl, headw_ref[0]) + headb_ref[0:1, :]                 # [TN, T2]

        # ---- scale head: ELU(alpha=1) + 1 + min_scale ----
        hs = relu(ln(dot(agg, sqw_ref[4]) + vrow(16), 17, 18))
        s = dot(hs, headw_ref[1]) + headb_ref[1:2, :]
        s = jnp.where(s > 0, s, jnp.exp(jnp.minimum(s, 0.0)) - 1.0)
        scale = s + 1.0 + min_scale                                     # [TN, T2]

        parts = [loc, scale, pi_f]
        if pad is not None:
            parts.append(pad)
        out_ref[f] = jnp.concatenate(parts, axis=-1)   # one unmasked lane-dense store


# ---------------------------------------------------------------------------
# Host-side parameter packing / algebraic folding (one-time, off the hot path)
# ---------------------------------------------------------------------------
def prepare_params(p, D, F, T):
    T2 = 2 * T
    f32, bf16 = jnp.float32, jnp.bfloat16
    w_p1, w_a1 = p["w_p1"], p["w_a1"]
    P = lambda i: w_p1[i * D:(i + 1) * D]          # pi   first-layer block i  [D,D]
    A = lambda i: w_a1[i * D:(i + 1) * D]          # aggr first-layer block i  [D,D]

    # pi concat order:   [st, mo, mfg, alg, cig]  -> blocks P0..P4
    # aggr concat order: [cig, alg, mfg, mo, st]  -> blocks A0..A4
    wsh_pi = jnp.concatenate([p["w_st"] @ P(0), p["w_mo"] @ P(1), p["w_mfg"] @ P(2)], axis=0)
    wsh_ag = jnp.concatenate([p["w_st"] @ A(4), p["w_mo"] @ A(3), p["w_mfg"] @ A(2)], axis=0)
    wsh = jnp.stack([wsh_pi, wsh_ag]).astype(bf16)                       # [2, 3D, D]

    bsh_pi = p["b_st"] @ P(0) + p["b_mo"] @ P(1) + p["b_mfg"] @ P(2) + p["b_p1"]
    bsh_ag = p["b_st"] @ A(4) + p["b_mo"] @ A(3) + p["b_mfg"] @ A(2) + p["b_a1"]

    b_alg = p["b_alg"].reshape(1, F * D)
    b_cig = p["b_cig"].reshape(1, F * D)
    wmp, wma, bmp, bma = [], [], [], []
    for f in range(F):
        wa = p["w_alg"][:, f * D:(f + 1) * D]      # [D, D]
        wc = p["w_cig"][:, f * D:(f + 1) * D]
        ba = b_alg[:, f * D:(f + 1) * D]           # [1, D]
        bc = b_cig[:, f * D:(f + 1) * D]
        wmp.append(jnp.concatenate([wa @ P(3), wc @ P(4)], axis=0))      # [2D, D]
        wma.append(jnp.concatenate([wa @ A(1), wc @ A(0)], axis=0))      # [2D, D]
        bmp.append(bsh_pi + ba @ P(3) + bc @ P(4))                       # [1, D]
        bma.append(bsh_ag + ba @ A(1) + bc @ A(0))                       # [1, D]
    wmp = jnp.stack(wmp).astype(bf16)                                    # [F, 2D, D]
    wma = jnp.stack(wma).astype(bf16)                                    # [F, 2D, D]
    bmp = jnp.concatenate(bmp, axis=0).astype(f32)                       # [F, D]
    bma = jnp.concatenate(bma, axis=0).astype(f32)                       # [F, D]

    sqw = jnp.stack([p["w_p2"], p["w_p3"], p["w_a2"], p["w_l1"], p["w_s1"]]).astype(bf16)
    headw = jnp.stack([p["w_l2"], p["w_s2"]]).astype(bf16)               # [2, D, T2]
    vec = jnp.concatenate([
        p["g_p1"], p["be_p1"],
        p["b_p2"], p["g_p2"], p["be_p2"],
        p["b_p3"], p["g_p3"], p["be_p3"],
        p["g_a1"], p["be_a1"],
        p["b_a2"], p["g_a2"], p["be_a2"],
        p["b_l1"], p["g_l1"], p["be_l1"],
        p["b_s1"], p["g_s1"], p["be_s1"],
    ], axis=0).astype(f32)                                               # [19, D]
    headb = jnp.concatenate([p["b_l2"], p["b_s2"]], axis=0).astype(f32)  # [2, T2]
    assert headb.shape == (2, T2)
    return dict(wsh=wsh, wmp=wmp, wma=wma, sqw=sqw, headw=headw,
                bmp=bmp, bma=bma, vec=vec, headb=headb,
                wp4=p["w_p4"].astype(f32), bp4=p["b_p4"].astype(f32))


# ---------------------------------------------------------------------------
# Wrapper
# ---------------------------------------------------------------------------
def decoder_forward(prep, st, mo, mfg, alg, cig, *, num_modes, future_steps,
                    min_scale=1e-3, tile_n=128):
    N, D = st.shape
    F, T = num_modes, future_steps
    T2 = 2 * T
    out_w = 128 * pl.cdiv(2 * T2 + 1, 128)     # lane-dense output slab width

    # Cheap XLA-side concats: shared vs mode-dependent kernel inputs.
    xs = jnp.concatenate([st, mo, mfg], axis=-1)    # [N, 3D]
    xm = jnp.concatenate([alg, cig], axis=-1)       # [N, 2D]

    # Row tile over nodes (multiple of 8).  Toy N runs as a single grid step.
    tn = N if N <= tile_n else tile_n
    if N % tn != 0:
        tn = N                                      # fallback: single tile
    grid = (N // tn,)

    vmem = pltpu.MemorySpace.VMEM
    smem = pltpu.MemorySpace.SMEM
    c3 = lambda i: (0, 0, 0)
    c2 = lambda i: (0, 0)

    in_specs = [
        pl.BlockSpec((tn, 3 * D), lambda i: (i, 0), memory_space=vmem),   # xs
        pl.BlockSpec((tn, 2 * D), lambda i: (i, 0), memory_space=vmem),   # xm
        pl.BlockSpec((2, 3 * D, D), c3, memory_space=vmem),               # wsh
        pl.BlockSpec((F, 2 * D, D), c3, memory_space=vmem),               # wmp
        pl.BlockSpec((F, 2 * D, D), c3, memory_space=vmem),               # wma
        pl.BlockSpec((5, D, D), c3, memory_space=vmem),                   # sqw
        pl.BlockSpec((2, D, T2), c3, memory_space=vmem),                  # headw
        pl.BlockSpec((F, D), c2, memory_space=vmem),                      # bmp
        pl.BlockSpec((F, D), c2, memory_space=vmem),                      # bma
        pl.BlockSpec((19, D), c2, memory_space=vmem),                     # vec
        pl.BlockSpec((2, T2), c2, memory_space=vmem),                     # headb
        pl.BlockSpec((1, D), c2, memory_space=vmem),                      # wp4
        pl.BlockSpec(memory_space=smem),                                  # bp4 scalar
    ]
    out_specs = pl.BlockSpec((F, tn, out_w), lambda i: (0, i, 0), memory_space=vmem)

    out = pl.pallas_call(
        functools.partial(decoder_kernel, dim=D, num_modes=F, t2=T2,
                          out_w=out_w, min_scale=min_scale),
        grid=grid,
        in_specs=in_specs,
        out_specs=out_specs,
        out_shape=jax.ShapeDtypeStruct((F, N, out_w), jnp.float32),
        compiler_params=pltpu.CompilerParams(
            dimension_semantics=("parallel",),
            vmem_limit_bytes=32 * 1024 * 1024),
    )(xs, xm, prep["wsh"], prep["wmp"], prep["wma"], prep["sqw"], prep["headw"],
      prep["bmp"], prep["bma"], prep["vec"], prep["headb"], prep["wp4"], prep["bp4"])

    loc = out[:, :, :T2].reshape(F, N, T, 2)
    scale = out[:, :, T2:2 * T2].reshape(F, N, T, 2)
    pi = out[:, :, 2 * T2].T                          # [N, F]
    y = jnp.concatenate([loc, scale], axis=-1)        # [F, N, T, 4]
    return y, pi


# ---------------------------------------------------------------------------
# Plain-JAX reference mirroring the PyTorch forward exactly (all f32)
# ---------------------------------------------------------------------------
def decoder_reference(p, st, mo, mfg, alg, cig, *, num_modes, future_steps,
                      min_scale=1e-3):
    N, D = st.shape
    F, T = num_modes, future_steps
    relu = lambda x: jnp.maximum(x, 0.0)

    def ln(x, g, b):
        mu = x.mean(-1, keepdims=True)
        xc = x - mu
        var = (xc * xc).mean(-1, keepdims=True)
        return xc / jnp.sqrt(var + EPS) * g + b

    st_p = st @ p["w_st"] + p["b_st"]
    mo_p = mo @ p["w_mo"] + p["b_mo"]
    mfg_p = mfg @ p["w_mfg"] + p["b_mfg"]
    alg_p = (alg @ p["w_alg"] + p["b_alg"]).reshape(N, F, D).transpose(1, 0, 2)
    cig_p = (cig @ p["w_cig"] + p["b_cig"]).reshape(N, F, D).transpose(1, 0, 2)
    st_b = jnp.broadcast_to(st_p[None], (F, N, D))
    mo_b = jnp.broadcast_to(mo_p[None], (F, N, D))
    mfg_b = jnp.broadcast_to(mfg_p[None], (F, N, D))

    x_pi = jnp.concatenate([st_b, mo_b, mfg_b, alg_p, cig_p], -1)
    h = relu(ln(x_pi @ p["w_p1"] + p["b_p1"], p["g_p1"], p["be_p1"]))
    h = relu(ln(h @ p["w_p2"] + p["b_p2"], p["g_p2"], p["be_p2"]))
    h = relu(ln(h @ p["w_p3"] + p["b_p3"], p["g_p3"], p["be_p3"]))
    pi = ((h * p["w_p4"]).sum(-1) + p["b_p4"][0, 0]).T   # [N, F]

    x_ag = jnp.concatenate([cig_p, alg_p, mfg_b, mo_b, st_b], -1)
    h = relu(ln(x_ag @ p["w_a1"] + p["b_a1"], p["g_a1"], p["be_a1"]))
    out = relu(ln(h @ p["w_a2"] + p["b_a2"], p["g_a2"], p["be_a2"]))

    hl = relu(ln(out @ p["w_l1"] + p["b_l1"], p["g_l1"], p["be_l1"]))
    loc = (hl @ p["w_l2"] + p["b_l2"]).reshape(F, N, T, 2)

    hs = relu(ln(out @ p["w_s1"] + p["b_s1"], p["g_s1"], p["be_s1"]))
    s = hs @ p["w_s2"] + p["b_s2"]
    s = jnp.where(s > 0, s, jnp.exp(jnp.minimum(s, 0.0)) - 1.0)
    scale = s.reshape(F, N, T, 2) + 1.0 + min_scale

    return jnp.concatenate([loc, scale], -1), pi


# ---------------------------------------------------------------------------
# Synthetic parameter init (shapes from the module __init__)
# ---------------------------------------------------------------------------
def init_params(key, D, F, T):
    T2 = 2 * T
    keys = iter(jax.random.split(key, 64))

    def lin_p(din, dout):
        w = jax.random.normal(next(keys), (din, dout), jnp.float32) * 0.02
        b = jax.random.normal(next(keys), (1, dout), jnp.float32) * 0.02
        return w, b

    def ln_p(d):
        return jnp.ones((1, d), jnp.float32), jnp.zeros((1, d), jnp.float32)

    p = {}
    p["w_st"], p["b_st"] = lin_p(D, D)
    p["w_mo"], p["b_mo"] = lin_p(D, D)
    p["w_mfg"], p["b_mfg"] = lin_p(D, D)
    w, b = lin_p(D, F * D); p["w_alg"], p["b_alg"] = w, b[0]
    w, b = lin_p(D, F * D); p["w_cig"], p["b_cig"] = w, b[0]
    p["w_a1"], p["b_a1"] = lin_p(5 * D, D); p["g_a1"], p["be_a1"] = ln_p(D)
    p["w_a2"], p["b_a2"] = lin_p(D, D);     p["g_a2"], p["be_a2"] = ln_p(D)
    p["w_l1"], p["b_l1"] = lin_p(D, D);     p["g_l1"], p["be_l1"] = ln_p(D)
    p["w_l2"], p["b_l2"] = lin_p(D, T2)
    p["w_s1"], p["b_s1"] = lin_p(D, D);     p["g_s1"], p["be_s1"] = ln_p(D)
    p["w_s2"], p["b_s2"] = lin_p(D, T2)
    p["w_p1"], p["b_p1"] = lin_p(5 * D, D); p["g_p1"], p["be_p1"] = ln_p(D)
    p["w_p2"], p["b_p2"] = lin_p(D, D);     p["g_p2"], p["be_p2"] = ln_p(D)
    p["w_p3"], p["b_p3"] = lin_p(D, D);     p["g_p3"], p["be_p3"] = ln_p(D)
    wp4, bp4 = lin_p(D, 1)
    p["w_p4"] = wp4.T          # stored [1, D]
    p["b_p4"] = bp4            # [1, 1]
    # TODO(synk): padding_token parameter is unused in forward(), not instantiated here.
    return p


if __name__ == "__main__":
    embed_dim = 32
    future_steps = 6
    num_modes = 4

    root = jax.random.PRNGKey(0)
    kp, k_small, k_large = jax.random.split(root, 3)
    params = init_params(kp, embed_dim, num_modes, future_steps)
    prep = prepare_params(params, embed_dim, num_modes, future_steps)

    def run_case(n_nodes, key):
        ks = jax.random.split(key, 5)
        embeds = [jax.random.normal(k, (n_nodes, embed_dim), jnp.float32) for k in ks]
        y, pi = decoder_forward(prep, *embeds, num_modes=num_modes,
                                future_steps=future_steps, min_scale=1e-3)
        jax.block_until_ready((y, pi))
        y_ref, pi_ref = decoder_reference(params, *embeds, num_modes=num_modes,
                                          future_steps=future_steps, min_scale=1e-3)
        assert y.shape == (num_modes, n_nodes, future_steps, 4), y.shape
        assert pi.shape == (n_nodes, num_modes), pi.shape
        # bf16 MXU operands vs. the all-f32 reference -> slightly relaxed tolerance.
        assert jnp.allclose(y, y_ref, atol=5e-3, rtol=5e-3), "loc/scale mismatch"
        assert jnp.allclose(pi, pi_ref, atol=5e-3, rtol=5e-3), "pi mismatch"

    run_case(8, k_small)      # toy size: single grid step
    run_case(256, k_large)    # multi-tile: grid=(2,), exercises the row tiling path
    print("KERNEL_OK")
</pallas_src>

<mosaic_0001>
module attributes {stable_mosaic.version = 11 : i64} {
  func.func @decoder_kernel(%arg0: i32, %arg1: memref<8x96xf32, #tpu.memory_space<vmem>>, %arg2: memref<8x64xf32, #tpu.memory_space<vmem>>, %arg3: memref<2x96x32xbf16, #tpu.memory_space<vmem>>, %arg4: memref<4x64x32xbf16, #tpu.memory_space<vmem>>, %arg5: memref<4x64x32xbf16, #tpu.memory_space<vmem>>, %arg6: memref<5x32x32xbf16, #tpu.memory_space<vmem>>, %arg7: memref<2x32x12xbf16, #tpu.memory_space<vmem>>, %arg8: memref<4x32xf32, #tpu.memory_space<vmem>>, %arg9: memref<4x32xf32, #tpu.memory_space<vmem>>, %arg10: memref<19x32xf32, #tpu.memory_space<vmem>>, %arg11: memref<2x12xf32, #tpu.memory_space<vmem>>, %arg12: memref<1x32xf32, #tpu.memory_space<vmem>>, %arg13: memref<1x1xf32, #tpu.memory_space<smem>>, %arg14: memref<4x8x128xf32, #tpu.memory_space<vmem>>) attributes {dimension_semantics = [#tpu.dimension_semantics<parallel>], iteration_bounds = array<i64: 1>, scalar_prefetch = 0 : i64, scratch_operands = 0 : i64, tpu.core_type = #tpu.core_type<tc>, window_params = [{transform_indices = @transform_0, window_bounds = array<i64: 8, 96>}, {transform_indices = @transform_1, window_bounds = array<i64: 8, 64>}, {pipeline_mode = #tpu.pipeline_mode<synchronous>, transform_indices = @transform_2, window_bounds = array<i64: 2, 96, 32>}, {pipeline_mode = #tpu.pipeline_mode<synchronous>, transform_indices = @transform_3, window_bounds = array<i64: 4, 64, 32>}, {pipeline_mode = #tpu.pipeline_mode<synchronous>, transform_indices = @transform_4, window_bounds = array<i64: 4, 64, 32>}, {pipeline_mode = #tpu.pipeline_mode<synchronous>, transform_indices = @transform_5, window_bounds = array<i64: 5, 32, 32>}, {pipeline_mode = #tpu.pipeline_mode<synchronous>, transform_indices = @transform_6, window_bounds = array<i64: 2, 32, 12>}, {pipeline_mode = #tpu.pipeline_mode<synchronous>, transform_indices = @transform_7, window_bounds = array<i64: 4, 32>}, {pipeline_mode = #tpu.pipeline_mode<synchronous>, transform_indices = @transform_8, window_bounds = array<i64: 4, 32>}, {pipeline_mode = #tpu.pipeline_mode<synchronous>, transform_indices = @transform_9, window_bounds = array<i64: 19, 32>}, {pipeline_mode = #tpu.pipeline_mode<synchronous>, transform_indices = @transform_10, window_bounds = array<i64: 2, 12>}, {pipeline_mode = #tpu.pipeline_mode<synchronous>, transform_indices = @transform_11, window_bounds = array<i64: 1, 32>}, {transform_indices = @transform_12, window_bounds = array<i64: 1, 1>}, {transform_indices = @transform_13, window_bounds = array<i64: 4, 8, 128>}]} {
    %c0 = arith.constant 0 : index
    %c0_0 = arith.constant 0 : index
    %0 = vector.load %arg1[%c0, %c0_0] : memref<8x96xf32, #tpu.memory_space<vmem>>, vector<8x96xf32>
    %1 = arith.truncf %0 : vector<8x96xf32> to vector<8x96xbf16>
    %c0_1 = arith.constant 0 : index
    %c0_2 = arith.constant 0 : index
    %2 = vector.load %arg2[%c0_1, %c0_2] : memref<8x64xf32, #tpu.memory_space<vmem>>, vector<8x64xf32>
    %3 = arith.truncf %2 : vector<8x64xf32> to vector<8x64xbf16>
    %c0_3 = arith.constant 0 : index
    %c0_4 = arith.constant 0 : index
    %c0_5 = arith.constant 0 : index
    %4 = vector.load %arg3[%c0_3, %c0_4, %c0_5] : memref<2x96x32xbf16, #tpu.memory_space<vmem>>, vector<1x96x32xbf16>
    %5 = vector.shape_cast %4 : vector<1x96x32xbf16> to vector<96x32xbf16>
    %cst = arith.constant dense<0.000000e+00> : vector<8x32xf32>
    %6 = tpu.matmul %1, %5, %cst {dimension_numbers = #tpu.dot_dimension_numbers<[1], [0], [0], [1], [0, 0, 1, 1], [], []>} : vector<8x96xbf16>, vector<96x32xbf16>, vector<8x32xf32> -> vector<8x32xf32>
    %c1 = arith.constant 1 : index
    %c0_6 = arith.constant 0 : index
    %c0_7 = arith.constant 0 : index
    %7 = vector.load %arg3[%c1, %c0_6, %c0_7] : memref<2x96x32xbf16, #tpu.memory_space<vmem>>, vector<1x96x32xbf16>
    %8 = vector.shape_cast %7 : vector<1x96x32xbf16> to vector<96x32xbf16>
    %cst_8 = arith.constant dense<0.000000e+00> : vector<8x32xf32>
    %9 = tpu.matmul %1, %8, %cst_8 {dimension_numbers = #tpu.dot_dimension_numbers<[1], [0], [0], [1], [0, 0, 1, 1], [], []>} : vector<8x96xbf16>, vector<96x32xbf16>, vector<8x32xf32> -> vector<8x32xf32>
    %c0_9 = arith.constant 0 : index
    %c0_10 = arith.constant 0 : index
    %10 = vector.load %arg12[%c0_9, %c0_10] : memref<1x32xf32, #tpu.memory_space<vmem>>, vector<1x32xf32>
    %c0_11 = arith.constant 0 : index
    %c0_12 = arith.constant 0 : index
    %11 = memref.load %arg13[%c0_11, %c0_12] : memref<1x1xf32, #tpu.memory_space<smem>>
    %cst_13 = arith.constant 0.000000e+00 : f32
    %12 = vector.broadcast %cst_13 : f32 to vector<8x103xf32>
    %c0_14 = arith.constant 0 : index
    %c0_15 = arith.constant 0 : index
    %c0_16 = arith.constant 0 : index
    %13 = vector.load %arg4[%c0_14, %c0_15, %c0_16] : memref<4x64x32xbf16, #tpu.memory_space<vmem>>, vector<1x64x32xbf16>
    %14 = vector.shape_cast %13 : vector<1x64x32xbf16> to vector<64x32xbf16>
    %cst_17 = arith.constant dense<0.000000e+00> : vector<8x32xf32>
    %15 = tpu.matmul %3, %14, %cst_17 {dimension_numbers = #tpu.dot_dimension_numbers<[1], [0], [0], [1], [0, 0, 1, 1], [], []>} : vector<8x64xbf16>, vector<64x32xbf16>, vector<8x32xf32> -> vector<8x32xf32>
    %16 = arith.addf %6, %15 : vector<8x32xf32>
    %c0_18 = arith.constant 0 : index
    %c0_19 = arith.constant 0 : index
    %17 = vector.load %arg8[%c0_18, %c0_19] : memref<4x32xf32, #tpu.memory_space<vmem>>, vector<1x32xf32>
    %18 = vector.broadcast %17 : vector<1x32xf32> to vector<8x32xf32>
    %19 = arith.addf %16, %18 : vector<8x32xf32>
    %c0_20 = arith.constant 0 : index
    %c0_21 = arith.constant 0 : index
    %c0_22 = arith.constant 0 : index
    %20 = vector.load %arg5[%c0_20, %c0_21, %c0_22] : memref<4x64x32xbf16, #tpu.memory_space<vmem>>, vector<1x64x32xbf16>
    %21 = vector.shape_cast %20 : vector<1x64x32xbf16> to vector<64x32xbf16>
    %cst_23 = arith.constant dense<0.000000e+00> : vector<8x32xf32>
    %22 = tpu.matmul %3, %21, %cst_23 {dimension_numbers = #tpu.dot_dimension_numbers<[1], [0], [0], [1], [0, 0, 1, 1], [], []>} : vector<8x64xbf16>, vector<64x32xbf16>, vector<8x32xf32> -> vector<8x32xf32>
    %23 = arith.addf %9, %22 : vector<8x32xf32>
    %c0_24 = arith.constant 0 : index
    %c0_25 = arith.constant 0 : index
    %24 = vector.load %arg9[%c0_24, %c0_25] : memref<4x32xf32, #tpu.memory_space<vmem>>, vector<1x32xf32>
    %25 = vector.broadcast %24 : vector<1x32xf32> to vector<8x32xf32>
    %26 = arith.addf %23, %25 : vector<8x32xf32>
    %cst_26 = arith.constant dense<0.000000e+00> : vector<8xf32>
    %27 = vector.multi_reduction <add>, %19, %cst_26 [1] : vector<8x32xf32> to vector<8xf32>
    %28 = vector.shape_cast %27 : vector<8xf32> to vector<8x1xf32>
    %cst_27 = arith.constant 3.200000e+01 : f32
    %29 = vector.broadcast %cst_27 : f32 to vector<8x1xf32>
    %30 = arith.divf %28, %29 : vector<8x1xf32>
    %31 = vector.broadcast %30 : vector<8x1xf32> to vector<8x32xf32>
    %32 = arith.subf %19, %31 : vector<8x32xf32>
    %33 = arith.mulf %32, %32 : vector<8x32xf32>
    %cst_28 = arith.constant dense<0.000000e+00> : vector<8xf32>
    %34 = vector.multi_reduction <add>, %33, %cst_28 [1] : vector<8x32xf32> to vector<8xf32>
    %35 = vector.shape_cast %34 : vector<8xf32> to vector<8x1xf32>
    %cst_29 = arith.constant 3.200000e+01 : f32
    %36 = vector.broadcast %cst_29 : f32 to vector<8x1xf32>
    %37 = arith.divf %35, %36 : vector<8x1xf32>
    %cst_30 = arith.constant 9.99999974E-6 : f32
    %38 = vector.broadcast %cst_30 : f32 to vector<8x1xf32>
    %39 = arith.addf %37, %38 : vector<8x1xf32>
    %40 = math.rsqrt %39 : vector<8x1xf32>
    %41 = vector.broadcast %40 : vector<8x1xf32> to vector<8x32xf32>
    %42 = arith.mulf %32, %41 : vector<8x32xf32>
    %c0_31 = arith.constant 0 : index
    %c0_32 = arith.constant 0 : index
    %43 = vector.load %arg10[%c0_31, %c0_32] : memref<19x32xf32, #tpu.memory_space<vmem>>, vector<1x32xf32>
    %44 = vector.broadcast %43 : vector<1x32xf32> to vector<8x32xf32>
    %45 = arith.mulf %42, %44 : vector<8x32xf32>
    %c1_33 = arith.constant 1 : index
    %c0_34 = arith.constant 0 : index
    %46 = vector.load %arg10[%c1_33, %c0_34] : memref<19x32xf32, #tpu.memory_space<vmem>>, vector<1x32xf32>
    %47 = vector.broadcast %46 : vector<1x32xf32> to vector<8x32xf32>
    %48 = arith.addf %45, %47 : vector<8x32xf32>
    %cst_35 = arith.constant 0.000000e+00 : f32
    %49 = vector.broadcast %cst_35 : f32 to vector<8x32xf32>
    %50 = arith.maximumf %48, %49 : vector<8x32xf32>
    %c0_36 = arith.constant 0 : index
    %c0_37 = arith.constant 0 : index
    %c0_38 = arith.constant 0 : index
    %51 = vector.load %arg6[%c0_36, %c0_37, %c0_38] : memref<5x32x32xbf16, #tpu.memory_space<vmem>>, vector<1x32x32xbf16>
    %52 = vector.shape_cast %51 : vector<1x32x32xbf16> to vector<32x32xbf16>
    %53 = arith.truncf %50 : vector<8x32xf32> to vector<8x32xbf16>
    %cst_39 = arith.constant dense<0.000000e+00> : vector<8x32xf32>
    %54 = tpu.matmul %53, %52, %cst_39 {dimension_numbers = #tpu.dot_dimension_numbers<[1], [0], [0], [1], [0, 0, 1, 1], [], []>} : vector<8x32xbf16>, vector<32x32xbf16>, vector<8x32xf32> -> vector<8x32xf32>
    %c2 = arith.constant 2 : index
    %c0_40 = arith.constant 0 : index
    %55 = vector.load %arg10[%c2, %c0_40] : memref<19x32xf32, #tpu.memory_space<vmem>>, vector<1x32xf32>
    %56 = vector.broadcast %55 : vector<1x32xf32> to vector<8x32xf32>
    %57 = arith.addf %54, %56 : vector<8x32xf32>
    %cst_41 = arith.constant dense<0.000000e+00> : vector<8xf32>
    %58 = vector.multi_reduction <add>, %57, %cst_41 [1] : vector<8x32xf32> to vector<8xf32>
    %59 = vector.shape_cast %58 : vector<8xf32> to vector<8x1xf32>
    %cst_42 = arith.constant 3.200000e+01 : f32
    %60 = vector.broadcast %cst_42 : f32 to vector<8x1xf32>
    %61 = arith.divf %59, %60 : vector<8x1xf32>
    %62 = vector.broadcast %61 : vector<8x1xf32> to vector<8x32xf32>
    %63 = arith.subf %57, %62 : vector<8x32xf32>
    %64 = arith.mulf %63, %63 : vector<8x32xf32>
    %cst_43 = arith.constant dense<0.000000e+00> : vector<8xf32>
    %65 = vector.multi_reduction <add>, %64, %cst_43 [1] : vector<8x32xf32> to vector<8xf32>
    %66 = vector.shape_cast %65 : vector<8xf32> to vector<8x1xf32>
    %cst_44 = arith.constant 3.200000e+01 : f32
    %67 = vector.broadcast %cst_44 : f32 to vector<8x1xf32>
    %68 = arith.divf %66, %67 : vector<8x1xf32>
    %cst_45 = arith.constant 9.99999974E-6 : f32
    %69 = vector.broadcast %cst_45 : f32 to vector<8x1xf32>
    %70 = arith.addf %68, %69 : vector<8x1xf32>
    %71 = math.rsqrt %70 : vector<8x1xf32>
    %72 = vector.broadcast %71 : vector<8x1xf32> to vector<8x32xf32>
    %73 = arith.mulf %63, %72 : vector<8x32xf32>
    %c3 = arith.constant 3 : index
    %c0_46 = arith.constant 0 : index
    %74 = vector.load %arg10[%c3, %c0_46] : memref<19x32xf32, #tpu.memory_space<vmem>>, vector<1x32xf32>
    %75 = vector.broadcast %74 : vector<1x32xf32> to vector<8x32xf32>
    %76 = arith.mulf %73, %75 : vector<8x32xf32>
    %c4 = arith.constant 4 : index
    %c0_47 = arith.constant 0 : index
    %77 = vector.load %arg10[%c4, %c0_47] : memref<19x32xf32, #tpu.memory_space<vmem>>, vector<1x32xf32>
    %78 = vector.broadcast %77 : vector<1x32xf32> to vector<8x32xf32>
    %79 = arith.addf %76, %78 : vector<8x32xf32>
    %cst_48 = arith.constant 0.000000e+00 : f32
    %80 = vector.broadcast %cst_48 : f32 to vector<8x32xf32>
    %81 = arith.maximumf %79, %80 : vector<8x32xf32>
    %c1_49 = arith.constant 1 : index
    %c0_50 = arith.constant 0 : index
    %c0_51 = arith.constant 0 : index
    %82 = vector.load %arg6[%c1_49, %c0_50, %c0_51] : memref<5x32x32xbf16, #tpu.memory_space<vmem>>, vector<1x32x32xbf16>
    %83 = vector.shape_cast %82 : vector<1x32x32xbf16> to vector<32x32xbf16>
    %84 = arith.truncf %81 : vector<8x32xf32> to vector<8x32xbf16>
    %cst_52 = arith.constant dense<0.000000e+00> : vector<8x32xf32>
    %85 = tpu.matmul %84, %83, %cst_52 {dimension_numbers = #tpu.dot_dimension_numbers<[1], [0], [0], [1], [0, 0, 1, 1], [], []>} : vector<8x32xbf16>, vector<32x32xbf16>, vector<8x32xf32> -> vector<8x32xf32>
    %c5 = arith.constant 5 : index
    %c0_53 = arith.constant 0 : index
    %86 = vector.load %arg10[%c5, %c0_53] : memref<19x32xf32, #tpu.memory_space<vmem>>, vector<1x32xf32>
    %87 = vector.broadcast %86 : vector<1x32xf32> to vector<8x32xf32>
    %88 = arith.addf %85, %87 : vector<8x32xf32>
    %cst_54 = arith.constant dense<0.000000e+00> : vector<8xf32>
    %89 = vector.multi_reduction <add>, %88, %cst_54 [1] : vector<8x32xf32> to vector<8xf32>
    %90 = vector.shape_cast %89 : vector<8xf32> to vector<8x1xf32>
    %cst_55 = arith.constant 3.200000e+01 : f32
    %91 = vector.broadcast %cst_55 : f32 to vector<8x1xf32>
    %92 = arith.divf %90, %91 : vector<8x1xf32>
    %93 = vector.broadcast %92 : vector<8x1xf32> to vector<8x32xf32>
    %94 = arith.subf %88, %93 : vector<8x32xf32>
    %95 = arith.mulf %94, %94 : vector<8x32xf32>
    %cst_56 = arith.constant dense<0.000000e+00> : vector<8xf32>
    %96 = vector.multi_reduction <add>, %95, %cst_56 [1] : vector<8x32xf32> to vector<8xf32>
    %97 = vector.shape_cast %96 : vector<8xf32> to vector<8x1xf32>
    %cst_57 = arith.constant 3.200000e+01 : f32
    %98 = vector.broadcast %cst_57 : f32 to vector<8x1xf32>
    %99 = arith.divf %97, %98 : vector<8x1xf32>
    %cst_58 = arith.constant 9.99999974E-6 : f32
    %100 = vector.broadcast %cst_58 : f32 to vector<8x1xf32>
    %101 = arith.addf %99, %100 : vector<8x1xf32>
    %102 = math.rsqrt %101 : vector<8x1xf32>
    %103 = vector.broadcast %102 : vector<8x1xf32> to vector<8x32xf32>
    %104 = arith.mulf %94, %103 : vector<8x32xf32>
    %c6 = arith.constant 6 : index
    %c0_59 = arith.constant 0 : index
    %105 = vector.load %arg10[%c6, %c0_59] : memref<19x32xf32, #tpu.memory_space<vmem>>, vector<1x32xf32>
    %106 = vector.broadcast %105 : vector<1x32xf32> to vector<8x32xf32>
    %107 = arith.mulf %104, %106 : vector<8x32xf32>
    %c7 = arith.constant 7 : index
    %c0_60 = arith.constant 0 : index
    %108 = vector.load %arg10[%c7, %c0_60] : memref<19x32xf32, #tpu.memory_space<vmem>>, vector<1x32xf32>
    %109 = vector.broadcast %108 : vector<1x32xf32> to vector<8x32xf32>
    %110 = arith.addf %107, %109 : vector<8x32xf32>
    %cst_61 = arith.constant 0.000000e+00 : f32
    %111 = vector.broadcast %cst_61 : f32 to vector<8x32xf32>
    %112 = arith.maximumf %110, %111 : vector<8x32xf32>
    %113 = vector.broadcast %10 : vector<1x32xf32> to vector<8x32xf32>
    %114 = arith.mulf %112, %113 : vector<8x32xf32>
    %cst_62 = arith.constant dense<0.000000e+00> : vector<8xf32>
    %115 = vector.multi_reduction <add>, %114, %cst_62 [1] : vector<8x32xf32> to vector<8xf32>
    %116 = vector.shape_cast %115 : vector<8xf32> to vector<8x1xf32>
    %117 = vector.broadcast %11 : f32 to vector<8x1xf32>
    %118 = arith.addf %116, %117 : vector<8x1xf32>
    %cst_63 = arith.constant dense<0.000000e+00> : vector<8xf32>
    %119 = vector.multi_reduction <add>, %26, %cst_63 [1] : vector<8x32xf32> to vector<8xf32>
    %120 = vector.shape_cast %119 : vector<8xf32> to vector<8x1xf32>
    %cst_64 = arith.constant 3.200000e+01 : f32
    %121 = vector.broadcast %cst_64 : f32 to vector<8x1xf32>
    %122 = arith.divf %120, %121 : vector<8x1xf32>
    %123 = vector.broadcast %122 : vector<8x1xf32> to vector<8x32xf32>
    %124 = arith.subf %26, %123 : vector<8x32xf32>
    %125 = arith.mulf %124, %124 : vector<8x32xf32>
    %cst_65 = arith.constant dense<0.000000e+00> : vector<8xf32>
    %126 = vector.multi_reduction <add>, %125, %cst_65 [1] : vector<8x32xf32> to vector<8xf32>
    %127 = vector.shape_cast %126 : vector<8xf32> to vector<8x1xf32>
    %cst_66 = arith.constant 3.200000e+01 : f32
    %128 = vector.broadcast %cst_66 : f32 to vector<8x1xf32>
    %129 = arith.divf %127, %128 : vector<8x1xf32>
    %cst_67 = arith.constant 9.99999974E-6 : f32
    %130 = vector.broadcast %cst_67 : f32 to vector<8x1xf32>
    %131 = arith.addf %129, %130 : vector<8x1xf32>
    %132 = math.rsqrt %131 : vector<8x1xf32>
    %133 = vector.broadcast %132 : vector<8x1xf32> to vector<8x32xf32>
    %134 = arith.mulf %124, %133 : vector<8x32xf32>
    %c8 = arith.constant 8 : index
    %c0_68 = arith.constant 0 : index
    %135 = vector.load %arg10[%c8, %c0_68] : memref<19x32xf32, #tpu.memory_space<vmem>>, vector<1x32xf32>
    %136 = vector.broadcast %135 : vector<1x32xf32> to vector<8x32xf32>
    %137 = arith.mulf %134, %136 : vector<8x32xf32>
    %c9 = arith.constant 9 : index
    %c0_69 = arith.constant 0 : index
    %138 = vector.load %arg10[%c9, %c0_69] : memref<19x32xf32, #tpu.memory_space<vmem>>, vector<1x32xf32>
    %139 = vector.broadcast %138 : vector<1x32xf32> to vector<8x32xf32>
    %140 = arith.addf %137, %139 : vector<8x32xf32>
    %cst_70 = arith.constant 0.000000e+00 : f32
    %141 = vector.broadcast %cst_70 : f32 to vector<8x32xf32>
    %142 = arith.maximumf %140, %141 : vector<8x32xf32>
    %c2_71 = arith.constant 2 : index
    %c0_72 = arith.constant 0 : index
    %c0_73 = arith.constant 0 : index
    %143 = vector.load %arg6[%c2_71, %c0_72, %c0_73] : memref<5x32x32xbf16, #tpu.memory_space<vmem>>, vector<1x32x32xbf16>
    %144 = vector.shape_cast %143 : vector<1x32x32xbf16> to vector<32x32xbf16>
    %145 = arith.truncf %142 : vector<8x32xf32> to vector<8x32xbf16>
    %cst_74 = arith.constant dense<0.000000e+00> : vector<8x32xf32>
    %146 = tpu.matmul %145, %144, %cst_74 {dimension_numbers = #tpu.dot_dimension_numbers<[1], [0], [0], [1], [0, 0, 1, 1], [], []>} : vector<8x32xbf16>, vector<32x32xbf16>, vector<8x32xf32> -> vector<8x32xf32>
    %c10 = arith.constant 10 : index
    %c0_75 = arith.constant 0 : index
    %147 = vector.load %arg10[%c10, %c0_75] : memref<19x32xf32, #tpu.memory_space<vmem>>, vector<1x32xf32>
    %148 = vector.broadcast %147 : vector<1x32xf32> to vector<8x32xf32>
    %149 = arith.addf %146, %148 : vector<8x32xf32>
    %cst_76 = arith.constant dense<0.000000e+00> : vector<8xf32>
    %150 = vector.multi_reduction <add>, %149, %cst_76 [1] : vector<8x32xf32> to vector<8xf32>
    %151 = vector.shape_cast %150 : vector<8xf32> to vector<8x1xf32>
    %cst_77 = arith.constant 3.200000e+01 : f32
    %152 = vector.broadcast %cst_77 : f32 to vector<8x1xf32>
    %153 = arith.divf %151, %152 : vector<8x1xf32>
    %154 = vector.broadcast %153 : vector<8x1xf32> to vector<8x32xf32>
    %155 = arith.subf %149, %154 : vector<8x32xf32>
    %156 = arith.mulf %155, %155 : vector<8x32xf32>
    %cst_78 = arith.constant dense<0.000000e+00> : vector<8xf32>
    %157 = vector.multi_reduction <add>, %156, %cst_78 [1] : vector<8x32xf32> to vector<8xf32>
    %158 = vector.shape_cast %157 : vector<8xf32> to vector<8x1xf32>
    %cst_79 = arith.constant 3.200000e+01 : f32
    %159 = vector.broadcast %cst_79 : f32 to vector<8x1xf32>
    %160 = arith.divf %158, %159 : vector<8x1xf32>
    %cst_80 = arith.constant 9.99999974E-6 : f32
    %161 = vector.broadcast %cst_80 : f32 to vector<8x1xf32>
    %162 = arith.addf %160, %161 : vector<8x1xf32>
    %163 = math.rsqrt %162 : vector<8x1xf32>
    %164 = vector.broadcast %163 : vector<8x1xf32> to vector<8x32xf32>
    %165 = arith.mulf %155, %164 : vector<8x32xf32>
    %c11 = arith.constant 11 : index
    %c0_81 = arith.constant 0 : index
    %166 = vector.load %arg10[%c11, %c0_81] : memref<19x32xf32, #tpu.memory_space<vmem>>, vector<1x32xf32>
    %167 = vector.broadcast %166 : vector<1x32xf32> to vector<8x32xf32>
    %168 = arith.mulf %165, %167 : vector<8x32xf32>
    %c12 = arith.constant 12 : index
    %c0_82 = arith.constant 0 : index
    %169 = vector.load %arg10[%c12, %c0_82] : memref<19x32xf32, #tpu.memory_space<vmem>>, vector<1x32xf32>
    %170 = vector.broadcast %169 : vector<1x32xf32> to vector<8x32xf32>
    %171 = arith.addf %168, %170 : vector<8x32xf32>
    %cst_83 = arith.constant 0.000000e+00 : f32
    %172 = vector.broadcast %cst_83 : f32 to vector<8x32xf32>
    %173 = arith.maximumf %171, %172 : vector<8x32xf32>
    %c3_84 = arith.constant 3 : index
    %c0_85 = arith.constant 0 : index
    %c0_86 = arith.constant 0 : index
    %174 = vector.load %arg6[%c3_84, %c0_85, %c0_86] : memref<5x32x32xbf16, #tpu.memory_space<vmem>>, vector<1x32x32xbf16>
    %175 = vector.shape_cast %174 : vector<1x32x32xbf16> to vector<32x32xbf16>
    %176 = arith.truncf %173 : vector<8x32xf32> to vector<8x32xbf16>
    %cst_87 = arith.constant dense<0.000000e+00> : vector<8x32xf32>
    %177 = tpu.matmul %176, %175, %cst_87 {dimension_numbers = #tpu.dot_dimension_numbers<[1], [0], [0], [1], [0, 0, 1, 1], [], []>} : vector<8x32xbf16>, vector<32x32xbf16>, vector<8x32xf32> -> vector<8x32xf32>
    %c13 = arith.constant 13 : index
    %c0_88 = arith.constant 0 : index
    %178 = vector.load %arg10[%c13, %c0_88] : memref<19x32xf32, #tpu.memory_space<vmem>>, vector<1x32xf32>
    %179 = vector.broadcast %178 : vector<1x32xf32> to vector<8x32xf32>
    %180 = arith.addf %177, %179 : vector<8x32xf32>
    %cst_89 = arith.constant dense<0.000000e+00> : vector<8xf32>
    %181 = vector.multi_reduction <add>, %180, %cst_89 [1] : vector<8x32xf32> to vector<8xf32>
    %182 = vector.shape_cast %181 : vector<8xf32> to vector<8x1xf32>
    %cst_90 = arith.constant 3.200000e+01 : f32
    %183 = vector.broadcast %cst_90 : f32 to vector<8x1xf32>
    %184 = arith.divf %182, %183 : vector<8x1xf32>
    %185 = vector.broadcast %184 : vector<8x1xf32> to vector<8x32xf32>
    %186 = arith.subf %180, %185 : vector<8x32xf32>
    %187 = arith.mulf %186, %186 : vector<8x32xf32>
    %cst_91 = arith.constant dense<0.000000e+00> : vector<8xf32>
    %188 = vector.multi_reduction <add>, %187, %cst_91 [1] : vector<8x32xf32> to vector<8xf32>
    %189 = vector.shape_cast %188 : vector<8xf32> to vector<8x1xf32>
    %cst_92 = arith.constant 3.200000e+01 : f32
    %190 = vector.broadcast %cst_92 : f32 to vector<8x1xf32>
    %191 = arith.divf %189, %190 : vector<8x1xf32>
    %cst_93 = arith.constant 9.99999974E-6 : f32
    %192 = vector.broadcast %cst_93 : f32 to vector<8x1xf32>
    %193 = arith.addf %191, %192 : vector<8x1xf32>
    %194 = math.rsqrt %193 : vector<8x1xf32>
    %195 = vector.broadcast %194 : vector<8x1xf32> to vector<8x32xf32>
    %196 = arith.mulf %186, %195 : vector<8x32xf32>
    %c14 = arith.constant 14 : index
    %c0_94 = arith.constant 0 : index
    %197 = vector.load %arg10[%c14, %c0_94] : memref<19x32xf32, #tpu.memory_space<vmem>>, vector<1x32xf32>
    %198 = vector.broadcast %197 : vector<1x32xf32> to vector<8x32xf32>
    %199 = arith.mulf %196, %198 : vector<8x32xf32>
    %c15 = arith.constant 15 : index
    %c0_95 = arith.constant 0 : index
    %200 = vector.load %arg10[%c15, %c0_95] : memref<19x32xf32, #tpu.memory_space<vmem>>, vector<1x32xf32>
    %201 = vector.broadcast %200 : vector<1x32xf32> to vector<8x32xf32>
    %202 = arith.addf %199, %201 : vector<8x32xf32>
    %cst_96 = arith.constant 0.000000e+00 : f32
    %203 = vector.broadcast %cst_96 : f32 to vector<8x32xf32>
    %204 = arith.maximumf %202, %203 : vector<8x32xf32>
    %c0_97 = arith.constant 0 : index
    %c0_98 = arith.constant 0 : index
    %c0_99 = arith.constant 0 : index
    %205 = vector.load %arg7[%c0_97, %c0_98, %c0_99] : memref<2x32x12xbf16, #tpu.memory_space<vmem>>, vector<1x32x12xbf16>
    %206 = vector.shape_cast %205 : vector<1x32x12xbf16> to vector<32x12xbf16>
    %207 = arith.truncf %204 : vector<8x32xf32> to vector<8x32xbf16>
    %cst_100 = arith.constant dense<0.000000e+00> : vector<8x12xf32>
    %208 = tpu.matmul %207, %206, %cst_100 {dimension_numbers = #tpu.dot_dimension_numbers<[1], [0], [0], [1], [0, 0, 1, 1], [], []>} : vector<8x32xbf16>, vector<32x12xbf16>, vector<8x12xf32> -> vector<8x12xf32>
    %c0_101 = arith.constant 0 : index
    %c0_102 = arith.constant 0 : index
    %209 = vector.load %arg11[%c0_101, %c0_102] : memref<2x12xf32, #tpu.memory_space<vmem>>, vector<1x12xf32>
    %210 = vector.broadcast %209 : vector<1x12xf32> to vector<8x12xf32>
    %211 = arith.addf %208, %210 : vector<8x12xf32>
    %c4_103 = arith.constant 4 : index
    %c0_104 = arith.constant 0 : index
    %c0_105 = arith.constant 0 : index
    %212 = vector.load %arg6[%c4_103, %c0_104, %c0_105] : memref<5x32x32xbf16, #tpu.memory_space<vmem>>, vector<1x32x32xbf16>
    %213 = vector.shape_cast %212 : vector<1x32x32xbf16> to vector<32x32xbf16>
    %214 = arith.truncf %173 : vector<8x32xf32> to vector<8x32xbf16>
    %cst_106 = arith.constant dense<0.000000e+00> : vector<8x32xf32>
    %215 = tpu.matmul %214, %213, %cst_106 {dimension_numbers = #tpu.dot_dimension_numbers<[1], [0], [0], [1], [0, 0, 1, 1], [], []>} : vector<8x32xbf16>, vector<32x32xbf16>, vector<8x32xf32> -> vector<8x32xf32>
    %c16 = arith.constant 16 : index
    %c0_107 = arith.constant 0 : index
    %216 = vector.load %arg10[%c16, %c0_107] : memref<19x32xf32, #tpu.memory_space<vmem>>, vector<1x32xf32>
    %217 = vector.broadcast %216 : vector<1x32xf32> to vector<8x32xf32>
    %218 = arith.addf %215, %217 : vector<8x32xf32>
    %cst_108 = arith.constant dense<0.000000e+00> : vector<8xf32>
    %219 = vector.multi_reduction <add>, %218, %cst_108 [1] : vector<8x32xf32> to vector<8xf32>
    %220 = vector.shape_cast %219 : vector<8xf32> to vector<8x1xf32>
    %cst_109 = arith.constant 3.200000e+01 : f32
    %221 = vector.broadcast %cst_109 : f32 to vector<8x1xf32>
    %222 = arith.divf %220, %221 : vector<8x1xf32>
    %223 = vector.broadcast %222 : vector<8x1xf32> to vector<8x32xf32>
    %224 = arith.subf %218, %223 : vector<8x32xf32>
    %225 = arith.mulf %224, %224 : vector<8x32xf32>
    %cst_110 = arith.constant dense<0.000000e+00> : vector<8xf32>
    %226 = vector.multi_reduction <add>, %225, %cst_110 [1] : vector<8x32xf32> to vector<8xf32>
    %227 = vector.shape_cast %226 : vector<8xf32> to vector<8x1xf32>
    %cst_111 = arith.constant 3.200000e+01 : f32
    %228 = vector.broadcast %cst_111 : f32 to vector<8x1xf32>
    %229 = arith.divf %227, %228 : vector<8x1xf32>
    %cst_112 = arith.constant 9.99999974E-6 : f32
    %230 = vector.broadcast %cst_112 : f32 to vector<8x1xf32>
    %231 = arith.addf %229, %230 : vector<8x1xf32>
    %232 = math.rsqrt %231 : vector<8x1xf32>
    %233 = vector.broadcast %232 : vector<8x1xf32> to vector<8x32xf32>
    %234 = arith.mulf %224, %233 : vector<8x32xf32>
    %c17 = arith.constant 17 : index
    %c0_113 = arith.constant 0 : index
    %235 = vector.load %arg10[%c17, %c0_113] : memref<19x32xf32, #tpu.memory_space<vmem>>, vector<1x32xf32>
    %236 = vector.broadcast %235 : vector<1x32xf32> to vector<8x32xf32>
    %237 = arith.mulf %234, %236 : vector<8x32xf32>
    %c18 = arith.constant 18 : index
    %c0_114 = arith.constant 0 : index
    %238 = vector.load %arg10[%c18, %c0_114] : memref<19x32xf32, #tpu.memory_space<vmem>>, vector<1x32xf32>
    %239 = vector.broadcast %238 : vector<1x32xf32> to vector<8x32xf32>
    %240 = arith.addf %237, %239 : vector<8x32xf32>
    %cst_115 = arith.constant 0.000000e+00 : f32
    %241 = vector.broadcast %cst_115 : f32 to vector<8x32xf32>
    %242 = arith.maximumf %240, %241 : vector<8x32xf32>
    %c1_116 = arith.constant 1 : index
    %c0_117 = arith.constant 0 : index
    %c0_118 = arith.constant 0 : index
    %243 = vector.load %arg7[%c1_116, %c0_117, %c0_118] : memref<2x32x12xbf16, #tpu.memory_space<vmem>>, vector<1x32x12xbf16>
    %244 = vector.shape_cast %243 : vector<1x32x12xbf16> to vector<32x12xbf16>
    %245 = arith.truncf %242 : vector<8x32xf32> to vector<8x32xbf16>
    %cst_119 = arith.constant dense<0.000000e+00> : vector<8x12xf32>
    %246 = tpu.matmul %245, %244, %cst_119 {dimension_numbers = #tpu.dot_dimension_numbers<[1], [0], [0], [1], [0, 0, 1, 1], [], []>} : vector<8x32xbf16>, vector<32x12xbf16>, vector<8x12xf32> -> vector<8x12xf32>
    %c1_120 = arith.constant 1 : index
    %c0_121 = arith.constant 0 : index
    %247 = vector.load %arg11[%c1_120, %c0_121] : memref<2x12xf32, #tpu.memory_space<vmem>>, vector<1x12xf32>
    %248 = vector.broadcast %247 : vector<1x12xf32> to vector<8x12xf32>
    %249 = arith.addf %246, %248 : vector<8x12xf32>
    %cst_122 = arith.constant 0.000000e+00 : f32
    %250 = vector.broadcast %cst_122 : f32 to vector<8x12xf32>
    %251 = arith.cmpf ogt, %249, %250 : vector<8x12xf32>
    %cst_123 = arith.constant 0.000000e+00 : f32
    %252 = vector.broadcast %cst_123 : f32 to vector<8x12xf32>
    %253 = arith.minimumf %249, %252 : vector<8x12xf32>
    %254 = math.exp %253 : vector<8x12xf32>
    %cst_124 = arith.constant 1.000000e+00 : f32
    %255 = vector.broadcast %cst_124 : f32 to vector<8x12xf32>
    %256 = arith.subf %254, %255 : vector<8x12xf32>
    %257 = arith.select %251, %249, %256 : vector<8x12xi1>, vector<8x12xf32>
    %cst_125 = arith.constant 1.000000e+00 : f32
    %258 = vector.broadcast %cst_125 : f32 to vector<8x12xf32>
    %259 = arith.addf %257, %258 : vector<8x12xf32>
    %cst_126 = arith.constant 1.000000e-03 : f32
    %260 = vector.broadcast %cst_126 : f32 to vector<8x12xf32>
    %261 = arith.addf %259, %260 : vector<8x12xf32>
    %262 = tpu.concatenate %211, %261, %118, %12 in 1 : vector<8x12xf32>, vector<8x12xf32>, vector<8x1xf32>, vector<8x103xf32> -> vector<8x128xf32>
    %c0_127 = arith.constant 0 : index
    %c0_128 = arith.constant 0 : index
    %c0_129 = arith.constant 0 : index
    %263 = vector.load %arg14[%c0_127, %c0_128, %c0_129] : memref<4x8x128xf32, #tpu.memory_space<vmem>>, vector<1x8x128xf32>
    %264 = vector.shape_cast %263 : vector<1x8x128xf32> to vector<8x128xf32>
    %265 = vector.shape_cast %262 : vector<8x128xf32> to vector<1x8x128xf32>
    tpu.vector_store %arg14[%c0_127, %c0_128, %c0_129], %265 {strides = array<i32>} : memref<4x8x128xf32, #tpu.memory_space<vmem>>, vector<1x8x128xf32>,
    %c1_130 = arith.constant 1 : index
    %c0_131 = arith.constant 0 : index
    %c0_132 = arith.constant 0 : index
    %266 = vector.load %arg4[%c1_130, %c0_131, %c0_132] : memref<4x64x32xbf16, #tpu.memory_space<vmem>>, vector<1x64x32xbf16>
    %267 = vector.shape_cast %266 : vector<1x64x32xbf16> to vector<64x32xbf16>
    %cst_133 = arith.constant dense<0.000000e+00> : vector<8x32xf32>
    %268 = tpu.matmul %3, %267, %cst_133 {dimension_numbers = #tpu.dot_dimension_numbers<[1], [0], [0], [1], [0, 0, 1, 1], [], []>} : vector<8x64xbf16>, vector<64x32xbf16>, vector<8x32xf32> -> vector<8x32xf32>
    %269 = arith.addf %6, %268 : vector<8x32xf32>
    %c1_134 = arith.constant 1 : index
    %c0_135 = arith.constant 0 : index
    %270 = vector.load %arg8[%c1_134, %c0_135] : memref<4x32xf32, #tpu.memory_space<vmem>>, vector<1x32xf32>
    %271 = vector.broadcast %270 : vector<1x32xf32> to vector<8x32xf32>
    %272 = arith.addf %269, %271 : vector<8x32xf32>
    %c1_136 = arith.constant 1 : index
    %c0_137 = arith.constant 0 : index
    %c0_138 = arith.constant 0 : index
    %273 = vector.load %arg5[%c1_136, %c0_137, %c0_138] : memref<4x64x32xbf16, #tpu.memory_space<vmem>>, vector<1x64x32xbf16>
    %274 = vector.shape_cast %273 : vector<1x64x32xbf16> to vector<64x32xbf16>
    %cst_139 = arith.constant dense<0.000000e+00> : vector<8x32xf32>
    %275 = tpu.matmul %3, %274, %cst_139 {dimension_numbers = #tpu.dot_dimension_numbers<[1], [0], [0], [1], [0, 0, 1, 1], [], []>} : vector<8x64xbf16>, vector<64x32xbf16>, vector<8x32xf32> -> vector<8x32xf32>
    %276 = arith.addf %9, %275 : vector<8x32xf32>
    %c1_140 = arith.constant 1 : index
    %c0_141 = arith.constant 0 : index
    %277 = vector.load %arg9[%c1_140, %c0_141] : memref<4x32xf32, #tpu.memory_space<vmem>>, vector<1x32xf32>
    %278 = vector.broadcast %277 : vector<1x32xf32> to vector<8x32xf32>
    %279 = arith.addf %276, %278 : vector<8x32xf32>
    %cst_142 = arith.constant dense<0.000000e+00> : vector<8xf32>
    %280 = vector.multi_reduction <add>, %272, %cst_142 [1] : vector<8x32xf32> to vector<8xf32>
    %281 = vector.shape_cast %280 : vector<8xf32> to vector<8x1xf32>
    %cst_143 = arith.constant 3.200000e+01 : f32
    %282 = vector.broadcast %cst_143 : f32 to vector<8x1xf32>
    %283 = arith.divf %281, %282 : vector<8x1xf32>
    %284 = vector.broadcast %283 : vector<8x1xf32> to vector<8x32xf32>
    %285 = arith.subf %272, %284 : vector<8x32xf32>
    %286 = arith.mulf %285, %285 : vector<8x32xf32>
    %cst_144 = arith.constant dense<0.000000e+00> : vector<8xf32>
    %287 = vector.multi_reduction <add>, %286, %cst_144 [1] : vector<8x32xf32> to vector<8xf32>
    %288 = vector.shape_cast %287 : vector<8xf32> to vector<8x1xf32>
    %cst_145 = arith.constant 3.200000e+01 : f32
    %289 = vector.broadcast %cst_145 : f32 to vector<8x1xf32>
    %290 = arith.divf %288, %289 : vector<8x1xf32>
    %cst_146 = arith.constant 9.99999974E-6 : f32
    %291 = vector.broadcast %cst_146 : f32 to vector<8x1xf32>
    %292 = arith.addf %290, %291 : vector<8x1xf32>
    %293 = math.rsqrt %292 : vector<8x1xf32>
    %294 = vector.broadcast %293 : vector<8x1xf32> to vector<8x32xf32>
    %295 = arith.mulf %285, %294 : vector<8x32xf32>
    %c0_147 = arith.constant 0 : index
    %c0_148 = arith.constant 0 : index
    %296 = vector.load %arg10[%c0_147, %c0_148] : memref<19x32xf32, #tpu.memory_space<vmem>>, vector<1x32xf32>
    %297 = vector.broadcast %296 : vector<1x32xf32> to vector<8x32xf32>
    %298 = arith.mulf %295, %297 : vector<8x32xf32>
    %c1_149 = arith.constant 1 : index
    %c0_150 = arith.constant 0 : index
    %299 = vector.load %arg10[%c1_149, %c0_150] : memref<19x32xf32, #tpu.memory_space<vmem>>, vector<1x32xf32>
    %300 = vector.broadcast %299 : vector<1x32xf32> to vector<8x32xf32>
    %301 = arith.addf %298, %300 : vector<8x32xf32>
    %cst_151 = arith.constant 0.000000e+00 : f32
    %302 = vector.broadcast %cst_151 : f32 to vector<8x32xf32>
    %303 = arith.maximumf %301, %302 : vector<8x32xf32>
    %c0_152 = arith.constant 0 : index
    %c0_153 = arith.constant 0 : index
    %c0_154 = arith.constant 0 : index
    %304 = vector.load %arg6[%c0_152, %c0_153, %c0_154] : memref<5x32x32xbf16, #tpu.memory_space<vmem>>, vector<1x32x32xbf16>
    %305 = vector.shape_cast %304 : vector<1x32x32xbf16> to vector<32x32xbf16>
    %306 = arith.truncf %303 : vector<8x32xf32> to vector<8x32xbf16>
    %cst_155 = arith.constant dense<0.000000e+00> : vector<8x32xf32>
    %307 = tpu.matmul %306, %305, %cst_155 {dimension_numbers = #tpu.dot_dimension_numbers<[1], [0], [0], [1], [0, 0, 1, 1], [], []>} : vector<8x32xbf16>, vector<32x32xbf16>, vector<8x32xf32> -> vector<8x32xf32>
    %c2_156 = arith.constant 2 : index
    %c0_157 = arith.constant 0 : index
    %308 = vector.load %arg10[%c2_156, %c0_157] : memref<19x32xf32, #tpu.memory_space<vmem>>, vector<1x32xf32>
    %309 = vector.broadcast %308 : vector<1x32xf32> to vector<8x32xf32>
    %310 = arith.addf %307, %309 : vector<8x32xf32>
    %cst_158 = arith.constant dense<0.000000e+00> : vector<8xf32>
    %311 = vector.multi_reduction <add>, %310, %cst_158 [1] : vector<8x32xf32> to vector<8xf32>
    %312 = vector.shape_cast %311 : vector<8xf32> to vector<8x1xf32>
    %cst_159 = arith.constant 3.200000e+01 : f32
    %313 = vector.broadcast %cst_159 : f32 to vector<8x1xf32>
    %314 = arith.divf %312, %313 : vector<8x1xf32>
    %315 = vector.broadcast %314 : vector<8x1xf32> to vector<8x32xf32>
    %316 = arith.subf %310, %315 : vector<8x32xf32>
    %317 = arith.mulf %316, %316 : vector<8x32xf32>
    %cst_160 = arith.constant dense<0.000000e+00> : vector<8xf32>
    %318 = vector.multi_reduction <add>, %317, %cst_160 [1] : vector<8x32xf32> to vector<8xf32>
    %319 = vector.shape_cast %318 : vector<8xf32> to vector<8x1xf32>
    %cst_161 = arith.constant 3.200000e+01 : f32
    %320 = vector.broadcast %cst_161 : f32 to vector<8x1xf32>
    %321 = arith.divf %319, %320 : vector<8x1xf32>
    %cst_162 = arith.constant 9.99999974E-6 : f32
    %322 = vector.broadcast %cst_162 : f32 to vector<8x1xf32>
    %323 = arith.addf %321, %322 : vector<8x1xf32>
    %324 = math.rsqrt %323 : vector<8x1xf32>
    %325 = vector.broadcast %324 : vector<8x1xf32> to vector<8x32xf32>
    %326 = arith.mulf %316, %325 : vector<8x32xf32>
    %c3_163 = arith.constant 3 : index
    %c0_164 = arith.constant 0 : index
    %327 = vector.load %arg10[%c3_163, %c0_164] : memref<19x32xf32, #tpu.memory_space<vmem>>, vector<1x32xf32>
    %328 = vector.broadcast %327 : vector<1x32xf32> to vector<8x32xf32>
    %329 = arith.mulf %326, %328 : vector<8x32xf32>
    %c4_165 = arith.constant 4 : index
    %c0_166 = arith.constant 0 : index
    %330 = vector.load %arg10[%c4_165, %c0_166] : memref<19x32xf32, #tpu.memory_space<vmem>>, vector<1x32xf32>
    %331 = vector.broadcast %330 : vector<1x32xf32> to vector<8x32xf32>
    %332 = arith.addf %329, %331 : vector<8x32xf32>
    %cst_167 = arith.constant 0.000000e+00 : f32
    %333 = vector.broadcast %cst_167 : f32 to vector<8x32xf32>
    %334 = arith.maximumf %332, %333 : vector<8x32xf32>
    %c1_168 = arith.constant 1 : index
    %c0_169 = arith.constant 0 : index
    %c0_170 = arith.constant 0 : index
    %335 = vector.load %arg6[%c1_168, %c0_169, %c0_170] : memref<5x32x32xbf16, #tpu.memory_space<vmem>>, vector<1x32x32xbf16>
    %336 = vector.shape_cast %335 : vector<1x32x32xbf16> to vector<32x32xbf16>
    %337 = arith.truncf %334 : vector<8x32xf32> to vector<8x32xbf16>
    %cst_171 = arith.constant dense<0.000000e+00> : vector<8x32xf32>
    %338 = tpu.matmul %337, %336, %cst_171 {dimension_numbers = #tpu.dot_dimension_numbers<[1], [0], [0], [1], [0, 0, 1, 1], [], []>} : vector<8x32xbf16>, vector<32x32xbf16>, vector<8x32xf32> -> vector<8x32xf32>
    %c5_172 = arith.constant 5 : index
    %c0_173 = arith.constant 0 : index
    %339 = vector.load %arg10[%c5_172, %c0_173] : memref<19x32xf32, #tpu.memory_space<vmem>>, vector<1x32xf32>
    %340 = vector.broadcast %339 : vector<1x32xf32> to vector<8x32xf32>
    %341 = arith.addf %338, %340 : vector<8x32xf32>
    %cst_174 = arith.constant dense<0.000000e+00> : vector<8xf32>
    %342 = vector.multi_reduction <add>, %341, %cst_174 [1] : vector<8x32xf32> to vector<8xf32>
    %343 = vector.shape_cast %342 : vector<8xf32> to vector<8x1xf32>
    %cst_175 = arith.constant 3.200000e+01 : f32
    %344 = vector.broadcast %cst_175 : f32 to vector<8x1xf32>
    %345 = arith.divf %343, %344 : vector<8x1xf32>
    %346 = vector.broadcast %345 : vector<8x1xf32> to vector<8x32xf32>
    %347 = arith.subf %341, %346 : vector<8x32xf32>
    %348 = arith.mulf %347, %347 : vector<8x32xf32>
    %cst_176 = arith.constant dense<0.000000e+00> : vector<8xf32>
    %349 = vector.multi_reduction <add>, %348, %cst_176 [1] : vector<8x32xf32> to vector<8xf32>
    %350 = vector.shape_cast %349 : vector<8xf32> to vector<8x1xf32>
    %cst_177 = arith.constant 3.200000e+01 : f32
    %351 = vector.broadcast %cst_177 : f32 to vector<8x1xf32>
    %352 = arith.divf %350, %351 : vector<8x1xf32>
    %cst_178 = arith.constant 9.99999974E-6 : f32
    %353 = vector.broadcast %cst_178 : f32 to vector<8x1xf32>
    %354 = arith.addf %352, %353 : vector<8x1xf32>
    %355 = math.rsqrt %354 : vector<8x1xf32>
    %356 = vector.broadcast %355 : vector<8x1xf32> to vector<8x32xf32>
    %357 = arith.mulf %347, %356 : vector<8x32xf32>
    %c6_179 = arith.constant 6 : index
    %c0_180 = arith.constant 0 : index
    %358 = vector.load %arg10[%c6_179, %c0_180] : memref<19x32xf32, #tpu.memory_space<vmem>>, vector<1x32xf32>
    %359 = vector.broadcast %358 : vector<1x32xf32> to vector<8x32xf32>
    %360 = arith.mulf %357, %359 : vector<8x32xf32>
    %c7_181 = arith.constant 7 : index
    %c0_182 = arith.constant 0 : index
    %361 = vector.load %arg10[%c7_181, %c0_182] : memref<19x32xf32, #tpu.memory_space<vmem>>, vector<1x32xf32>
    %362 = vector.broadcast %361 : vector<1x32xf32> to vector<8x32xf32>
    %363 = arith.addf %360, %362 : vector<8x32xf32>
    %cst_183 = arith.constant 0.000000e+00 : f32
    %364 = vector.broadcast %cst_183 : f32 to vector<8x32xf32>
    %365 = arith.maximumf %363, %364 : vector<8x32xf32>
    %366 = vector.broadcast %10 : vector<1x32xf32> to vector<8x32xf32>
    %367 = arith.mulf %365, %366 : vector<8x32xf32>
    %cst_184 = arith.constant dense<0.000000e+00> : vector<8xf32>
    %368 = vector.multi_reduction <add>, %367, %cst_184 [1] : vector<8x32xf32> to vector<8xf32>
    %369 = vector.shape_cast %368 : vector<8xf32> to vector<8x1xf32>
    %370 = vector.broadcast %11 : f32 to vector<8x1xf32>
    %371 = arith.addf %369, %370 : vector<8x1xf32>
    %cst_185 = arith.constant dense<0.000000e+00> : vector<8xf32>
    %372 = vector.multi_reduction <add>, %279, %cst_185 [1] : vector<8x32xf32> to vector<8xf32>
    %373 = vector.shape_cast %372 : vector<8xf32> to vector<8x1xf32>
    %cst_186 = arith.constant 3.200000e+01 : f32
    %374 = vector.broadcast %cst_186 : f32 to vector<8x1xf32>
    %375 = arith.divf %373, %374 : vector<8x1xf32>
    %376 = vector.broadcast %375 : vector<8x1xf32> to vector<8x32xf32>
    %377 = arith.subf %279, %376 : vector<8x32xf32>
    %378 = arith.mulf %377, %377 : vector<8x32xf32>
    %cst_187 = arith.constant dense<0.000000e+00> : vector<8xf32>
    %379 = vector.multi_reduction <add>, %378, %cst_187 [1] : vector<8x32xf32> to vector<8xf32>
    %380 = vector.shape_cast %379 : vector<8xf32> to vector<8x1xf32>
    %cst_188 = arith.constant 3.200000e+01 : f32
    %381 = vector.broadcast %cst_188 : f32 to vector<8x1xf32>
    %382 = arith.divf %380, %381 : vector<8x1xf32>
    %cst_189 = arith.constant 9.99999974E-6 : f32
    %383 = vector.broadcast %cst_189 : f32 to vector<8x1xf32>
    %384 = arith.addf %382, %383 : vector<8x1xf32>
    %385 = math.rsqrt %384 : vector<8x1xf32>
    %386 = vector.broadcast %385 : vector<8x1xf32> to vector<8x32xf32>
    %387 = arith.mulf %377, %386 : vector<8x32xf32>
    %c8_190 = arith.constant 8 : index
    %c0_191 = arith.constant 0 : index
    %388 = vector.load %arg10[%c8_190, %c0_191] : memref<19x32xf32, #tpu.memory_space<vmem>>, vector<1x32xf32>
    %389 = vector.broadcast %388 : vector<1x32xf32> to vector<8x32xf32>
    %390 = arith.mulf %387, %389 : vector<8x32xf32>
    %c9_192 = arith.constant 9 : index
    %c0_193 = arith.constant 0 : index
    %391 = vector.load %arg10[%c9_192, %c0_193] : memref<19x32xf32, #tpu.memory_space<vmem>>, vector<1x32xf32>
    %392 = vector.broadcast %391 : vector<1x32xf32> to vector<8x32xf32>
    %393 = arith.addf %390, %392 : vector<8x32xf32>
    %cst_194 = arith.constant 0.000000e+00 : f32
    %394 = vector.broadcast %cst_194 : f32 to vector<8x32xf32>
    %395 = arith.maximumf %393, %394 : vector<8x32xf32>
    %c2_195 = arith.constant 2 : index
    %c0_196 = arith.constant 0 : index
    %c0_197 = arith.constant 0 : index
    %396 = vector.load %arg6[%c2_195, %c0_196, %c0_197] : memref<5x32x32xbf16, #tpu.memory_space<vmem>>, vector<1x32x32xbf16>
    %397 = vector.shape_cast %396 : vector<1x32x32xbf16> to vector<32x32xbf16>
    %398 = arith.truncf %395 : vector<8x32xf32> to vector<8x32xbf16>
    %cst_198 = arith.constant dense<0.000000e+00> : vector<8x32xf32>
    %399 = tpu.matmul %398, %397, %cst_198 {dimension_numbers = #tpu.dot_dimension_numbers<[1], [0], [0], [1], [0, 0, 1, 1], [], []>} : vector<8x32xbf16>, vector<32x32xbf16>, vector<8x32xf32> -> vector<8x32xf32>
    %c10_199 = arith.constant 10 : index
    %c0_200 = arith.constant 0 : index
    %400 = vector.load %arg10[%c10_199, %c0_200] : memref<19x32xf32, #tpu.memory_space<vmem>>, vector<1x32xf32>
    %401 = vector.broadcast %400 : vector<1x32xf32> to vector<8x32xf32>
    %402 = arith.addf %399, %401 : vector<8x32xf32>
    %cst_201 = arith.constant dense<0.000000e+00> : vector<8xf32>
    %403 = vector.multi_reduction <add>, %402, %cst_201 [1] : vector<8x32xf32> to vector<8xf32>
    %404 = vector.shape_cast %403 : vector<8xf32> to vector<8x1xf32>
    %cst_202 = arith.constant 3.200000e+01 : f32
    %405 = vector.broadcast %cst_202 : f32 to vector<8x1xf32>
    %406 = arith.divf %404, %405 : vector<8x1xf32>
    %407 = vector.broadcast %406 : vector<8x1xf32> to vector<8x32xf32>
    %408 = arith.subf %402, %407 : vector<8x32xf32>
    %409 = arith.mulf %408, %408 : vector<8x32xf32>
    %cst_203 = arith.constant dense<0.000000e+00> : vector<8xf32>
    %410 = vector.multi_reduction <add>, %409, %cst_203 [1] : vector<8x32xf32> to vector<8xf32>
    %411 = vector.shape_cast %410 : vector<8xf32> to vector<8x1xf32>
    %cst_204 = arith.constant 3.200000e+01 : f32
    %412 = vector.broadcast %cst_204 : f32 to vector<8x1xf32>
    %413 = arith.divf %411, %412 : vector<8x1xf32>
    %cst_205 = arith.constant 9.99999974E-6 : f32
    %414 = vector.broadcast %cst_205 : f32 to vector<8x1xf32>
    %415 = arith.addf %413, %414 : vector<8x1xf32>
    %416 = math.rsqrt %415 : vector<8x1xf32>
    %417 = vector.broadcast %416 : vector<8x1xf32> to vector<8x32xf32>
    %418 = arith.mulf %408, %417 : vector<8x32xf32>
    %c11_206 = arith.constant 11 : index
    %c0_207 = arith.constant 0 : index
    %419 = vector.load %arg10[%c11_206, %c0_207] : memref<19x32xf32, #tpu.memory_space<vmem>>, vector<1x32xf32>
    %420 = vector.broadcast %419 : vector<1x32xf32> to vector<8x32xf32>
    %421 = arith.mulf %418, %420 : vector<8x32xf32>
    %c12_208 = arith.constant 12 : index
    %c0_209 = arith.constant 0 : index
    %422 = vector.load %arg10[%c12_208, %c0_209] : memref<19x32xf32, #tpu.memory_space<vmem>>, vector<1x32xf32>
    %423 = vector.broadcast %422 : vector<1x32xf32> to vector<8x32xf32>
    %424 = arith.addf %421, %423 : vector<8x32xf32>
    %cst_210 = arith.constant 0.000000e+00 : f32
    %425 = vector.broadcast %cst_210 : f32 to vector<8x32xf32>
    %426 = arith.maximumf %424, %425 : vector<8x32xf32>
    %c3_211 = arith.constant 3 : index
    %c0_212 = arith.constant 0 : index
    %c0_213 = arith.constant 0 : index
    %427 = vector.load %arg6[%c3_211, %c0_212, %c0_213] : memref<5x32x32xbf16, #tpu.memory_space<vmem>>, vector<1x32x32xbf16>
    %428 = vector.shape_cast %427 : vector<1x32x32xbf16> to vector<32x32xbf16>
    %429 = arith.truncf %426 : vector<8x32xf32> to vector<8x32xbf16>
    %cst_214 = arith.constant dense<0.000000e+00> : vector<8x32xf32>
    %430 = tpu.matmul %429, %428, %cst_214 {dimension_numbers = #tpu.dot_dimension_numbers<[1], [0], [0], [1], [0, 0, 1, 1], [], []>} : vector<8x32xbf16>, vector<32x32xbf16>, vector<8x32xf32> -> vector<8x32xf32>
    %c13_215 = arith.constant 13 : index
    %c0_216 = arith.constant 0 : index
    %431 = vector.load %arg10[%c13_215, %c0_216] : memref<19x32xf32, #tpu.memory_space<vmem>>, vector<1x32xf32>
    %432 = vector.broadcast %431 : vector<1x32xf32> to vector<8x32xf32>
    %433 = arith.addf %430, %432 : vector<8x32xf32>
    %cst_217 = arith.constant dense<0.000000e+00> : vector<8xf32>
    %434 = vector.multi_reduction <add>, %433, %cst_217 [1] : vector<8x32xf32> to vector<8xf32>
    %435 = vector.shape_cast %434 : vector<8xf32> to vector<8x1xf32>
    %cst_218 = arith.constant 3.200000e+01 : f32
    %436 = vector.broadcast %cst_218 : f32 to vector<8x1xf32>
    %437 = arith.divf %435, %436 : vector<8x1xf32>
    %438 = vector.broadcast %437 : vector<8x1xf32> to vector<8x32xf32>
    %439 = arith.subf %433, %438 : vector<8x32xf32>
    %440 = arith.mulf %439, %439 : vector<8x32xf32>
    %cst_219 = arith.constant dense<0.000000e+00> : vector<8xf32>
    %441 = vector.multi_reduction <add>, %440, %cst_219 [1] : vector<8x32xf32> to vector<8xf32>
    %442 = vector.shape_cast %441 : vector<8xf32> to vector<8x1xf32>
    %cst_220 = arith.constant 3.200000e+01 : f32
    %443 = vector.broadcast %cst_220 : f32 to vector<8x1xf32>
    %444 = arith.divf %442, %443 : vector<8x1xf32>
    %cst_221 = arith.constant 9.99999974E-6 : f32
    %445 = vector.broadcast %cst_221 : f32 to vector<8x1xf32>
    %446 = arith.addf %444, %445 : vector<8x1xf32>
    %447 = math.rsqrt %446 : vector<8x1xf32>
    %448 = vector.broadcast %447 : vector<8x1xf32> to vector<8x32xf32>
    %449 = arith.mulf %439, %448 : vector<8x32xf32>
    %c14_222 = arith.constant 14 : index
    %c0_223 = arith.constant 0 : index
    %450 = vector.load %arg10[%c14_222, %c0_223] : memref<19x32xf32, #tpu.memory_space<vmem>>, vector<1x32xf32>
    %451 = vector.broadcast %450 : vector<1x32xf32> to vector<8x32xf32>
    %452 = arith.mulf %449, %451 : vector<8x32xf32>
    %c15_224 = arith.constant 15 : index
    %c0_225 = arith.constant 0 : index
    %453 = vector.load %arg10[%c15_224, %c0_225] : memref<19x32xf32, #tpu.memory_space<vmem>>, vector<1x32xf32>
    %454 = vector.broadcast %453 : vector<1x32xf32> to vector<8x32xf32>
    %455 = arith.addf %452, %454 : vector<8x32xf32>
    %cst_226 = arith.constant 0.000000e+00 : f32
    %456 = vector.broadcast %cst_226 : f32 to vector<8x32xf32>
    %457 = arith.maximumf %455, %456 : vector<8x32xf32>
    %c0_227 = arith.constant 0 : index
    %c0_228 = arith.constant 0 : index
    %c0_229 = arith.constant 0 : index
    %458 = vector.load %arg7[%c0_227, %c0_228, %c0_229] : memref<2x32x12xbf16, #tpu.memory_space<vmem>>, vector<1x32x12xbf16>
    %459 = vector.shape_cast %458 : vector<1x32x12xbf16> to vector<32x12xbf16>
    %460 = arith.truncf %457 : vector<8x32xf32> to vector<8x32xbf16>
    %cst_230 = arith.constant dense<0.000000e+00> : vector<8x12xf32>
    %461 = tpu.matmul %460, %459, %cst_230 {dimension_numbers = #tpu.dot_dimension_numbers<[1], [0], [0], [1], [0, 0, 1, 1], [], []>} : vector<8x32xbf16>, vector<32x12xbf16>, vector<8x12xf32> -> vector<8x12xf32>
    %c0_231 = arith.constant 0 : index
    %c0_232 = arith.constant 0 : index
    %462 = vector.load %arg11[%c0_231, %c0_232] : memref<2x12xf32, #tpu.memory_space<vmem>>, vector<1x12xf32>
    %463 = vector.broadcast %462 : vector<1x12xf32> to vector<8x12xf32>
    %464 = arith.addf %461, %463 : vector<8x12xf32>
    %c4_233 = arith.constant 4 : index
    %c0_234 = arith.constant 0 : index
    %c0_235 = arith.constant 0 : index
    %465 = vector.load %arg6[%c4_233, %c0_234, %c0_235] : memref<5x32x32xbf16, #tpu.memory_space<vmem>>, vector<1x32x32xbf16>
    %466 = vector.shape_cast %465 : vector<1x32x32xbf16> to vector<32x32xbf16>
    %467 = arith.truncf %426 : vector<8x32xf32> to vector<8x32xbf16>
    %cst_236 = arith.constant dense<0.000000e+00> : vector<8x32xf32>
    %468 = tpu.matmul %467, %466, %cst_236 {dimension_numbers = #tpu.dot_dimension_numbers<[1], [0], [0], [1], [0, 0, 1, 1], [], []>} : vector<8x32xbf16>, vector<32x32xbf16>, vector<8x32xf32> -> vector<8x32xf32>
    %c16_237 = arith.constant 16 : index
    %c0_238 = arith.constant 0 : index
    %469 = vector.load %arg10[%c16_237, %c0_238] : memref<19x32xf32, #tpu.memory_space<vmem>>, vector<1x32xf32>
    %470 = vector.broadcast %469 : vector<1x32xf32> to vector<8x32xf32>
    %471 = arith.addf %468, %470 : vector<8x32xf32>
    %cst_239 = arith.constant dense<0.000000e+00> : vector<8xf32>
    %472 = vector.multi_reduction <add>, %471, %cst_239 [1] : vector<8x32xf32> to vector<8xf32>
    %473 = vector.shape_cast %472 : vector<8xf32> to vector<8x1xf32>
    %cst_240 = arith.constant 3.200000e+01 : f32
    %474 = vector.broadcast %cst_240 : f32 to vector<8x1xf32>
    %475 = arith.divf %473, %474 : vector<8x1xf32>
    %476 = vector.broadcast %475 : vector<8x1xf32> to vector<8x32xf32>
    %477 = arith.subf %471, %476 : vector<8x32xf32>
    %478 = arith.mulf %477, %477 : vector<8x32xf32>
    %cst_241 = arith.constant dense<0.000000e+00> : vector<8xf32>
    %479 = vector.multi_reduction <add>, %478, %cst_241 [1] : vector<8x32xf32> to vector<8xf32>
    %480 = vector.shape_cast %479 : vector<8xf32> to vector<8x1xf32>
    %cst_242 = arith.constant 3.200000e+01 : f32
    %481 = vector.broadcast %cst_242 : f32 to vector<8x1xf32>
    %482 = arith.divf %480, %481 : vector<8x1xf32>
    %cst_243 = arith.constant 9.99999974E-6 : f32
    %483 = vector.broadcast %cst_243 : f32 to vector<8x1xf32>
    %484 = arith.addf %482, %483 : vector<8x1xf32>
    %485 = math.rsqrt %484 : vector<8x1xf32>
    %486 = vector.broadcast %485 : vector<8x1xf32> to vector<8x32xf32>
    %487 = arith.mulf %477, %486 : vector<8x32xf32>
    %c17_244 = arith.constant 17 : index
    %c0_245 = arith.constant 0 : index
    %488 = vector.load %arg10[%c17_244, %c0_245] : memref<19x32xf32, #tpu.memory_space<vmem>>, vector<1x32xf32>
    %489 = vector.broadcast %488 : vector<1x32xf32> to vector<8x32xf32>
    %490 = arith.mulf %487, %489 : vector<8x32xf32>
    %c18_246 = arith.constant 18 : index
    %c0_247 = arith.constant 0 : index
    %491 = vector.load %arg10[%c18_246, %c0_247] : memref<19x32xf32, #tpu.memory_space<vmem>>, vector<1x32xf32>
    %492 = vector.broadcast %491 : vector<1x32xf32> to vector<8x32xf32>
    %493 = arith.addf %490, %492 : vector<8x32xf32>
    %cst_248 = arith.constant 0.000000e+00 : f32
    %494 = vector.broadcast %cst_248 : f32 to vector<8x32xf32>
    %495 = arith.maximumf %493, %494 : vector<8x32xf32>
    %c1_249 = arith.constant 1 : index
    %c0_250 = arith.constant 0 : index
    %c0_251 = arith.constant 0 : index
    %496 = vector.load %arg7[%c1_249, %c0_250, %c0_251] : memref<2x32x12xbf16, #tpu.memory_space<vmem>>, vector<1x32x12xbf16>
    %497 = vector.shape_cast %496 : vector<1x32x12xbf16> to vector<32x12xbf16>
    %498 = arith.truncf %495 : vector<8x32xf32> to vector<8x32xbf16>
    %cst_252 = arith.constant dense<0.000000e+00> : vector<8x12xf32>
    %499 = tpu.matmul %498, %497, %cst_252 {dimension_numbers = #tpu.dot_dimension_numbers<[1], [0], [0], [1], [0, 0, 1, 1], [], []>} : vector<8x32xbf16>, vector<32x12xbf16>, vector<8x12xf32> -> vector<8x12xf32>
    %c1_253 = arith.constant 1 : index
    %c0_254 = arith.constant 0 : index
    %500 = vector.load %arg11[%c1_253, %c0_254] : memref<2x12xf32, #tpu.memory_space<vmem>>, vector<1x12xf32>
    %501 = vector.broadcast %500 : vector<1x12xf32> to vector<8x12xf32>
    %502 = arith.addf %499, %501 : vector<8x12xf32>
    %cst_255 = arith.constant 0.000000e+00 : f32
    %503 = vector.broadcast %cst_255 : f32 to vector<8x12xf32>
    %504 = arith.cmpf ogt, %502, %503 : vector<8x12xf32>
    %cst_256 = arith.constant 0.000000e+00 : f32
    %505 = vector.broadcast %cst_256 : f32 to vector<8x12xf32>
    %506 = arith.minimumf %502, %505 : vector<8x12xf32>
    %507 = math.exp %506 : vector<8x12xf32>
    %cst_257 = arith.constant 1.000000e+00 : f32
    %508 = vector.broadcast %cst_257 : f32 to vector<8x12xf32>
    %509 = arith.subf %507, %508 : vector<8x12xf32>
    %510 = arith.select %504, %502, %509 : vector<8x12xi1>, vector<8x12xf32>
    %cst_258 = arith.constant 1.000000e+00 : f32
    %511 = vector.broadcast %cst_258 : f32 to vector<8x12xf32>
    %512 = arith.addf %510, %511 : vector<8x12xf32>
    %cst_259 = arith.constant 1.000000e-03 : f32
    %513 = vector.broadcast %cst_259 : f32 to vector<8x12xf32>
    %514 = arith.addf %512, %513 : vector<8x12xf32>
    %515 = tpu.concatenate %464, %514, %371, %12 in 1 : vector<8x12xf32>, vector<8x12xf32>, vector<8x1xf32>, vector<8x103xf32> -> vector<8x128xf32>
    %c1_260 = arith.constant 1 : index
    %c0_261 = arith.constant 0 : index
    %c0_262 = arith.constant 0 : index
    %516 = vector.load %arg14[%c1_260, %c0_261, %c0_262] : memref<4x8x128xf32, #tpu.memory_space<vmem>>, vector<1x8x128xf32>
    %517 = vector.shape_cast %516 : vector<1x8x128xf32> to vector<8x128xf32>
    %518 = vector.shape_cast %515 : vector<8x128xf32> to vector<1x8x128xf32>
    tpu.vector_store %arg14[%c1_260, %c0_261, %c0_262], %518 {strides = array<i32>} : memref<4x8x128xf32, #tpu.memory_space<vmem>>, vector<1x8x128xf32>,
    %c2_263 = arith.constant 2 : index
    %c0_264 = arith.constant 0 : index
    %c0_265 = arith.constant 0 : index
    %519 = vector.load %arg4[%c2_263, %c0_264, %c0_265] : memref<4x64x32xbf16, #tpu.memory_space<vmem>>, vector<1x64x32xbf16>
    %520 = vector.shape_cast %519 : vector<1x64x32xbf16> to vector<64x32xbf16>
    %cst_266 = arith.constant dense<0.000000e+00> : vector<8x32xf32>
    %521 = tpu.matmul %3, %520, %cst_266 {dimension_numbers = #tpu.dot_dimension_numbers<[1], [0], [0], [1], [0, 0, 1, 1], [], []>} : vector<8x64xbf16>, vector<64x32xbf16>, vector<8x32xf32> -> vector<8x32xf32>
    %522 = arith.addf %6, %521 : vector<8x32xf32>
    %c2_267 = arith.constant 2 : index
    %c0_268 = arith.constant 0 : index
    %523 = vector.load %arg8[%c2_267, %c0_268] : memref<4x32xf32, #tpu.memory_space<vmem>>, vector<1x32xf32>
    %524 = vector.broadcast %523 : vector<1x32xf32> to vector<8x32xf32>
    %525 = arith.addf %522, %524 : vector<8x32xf32>
    %c2_269 = arith.constant 2 : index
    %c0_270 = arith.constant 0 : index
    %c0_271 = arith.constant 0 : index
    %526 = vector.load %arg5[%c2_269, %c0_270, %c0_271] : memref<4x64x32xbf16, #tpu.memory_space<vmem>>, vector<1x64x32xbf16>
    %527 = vector.shape_cast %526 : vector<1x64x32xbf16> to vector<64x32xbf16>
    %cst_272 = arith.constant dense<0.000000e+00> : vector<8x32xf32>
    %528 = tpu.matmul %3, %527, %cst_272 {dimension_numbers = #tpu.dot_dimension_numbers<[1], [0], [0], [1], [0, 0, 1, 1], [], []>} : vector<8x64xbf16>, vector<64x32xbf16>, vector<8x32xf32> -> vector<8x32xf32>
    %529 = arith.addf %9, %528 : vector<8x32xf32>
    %c2_273 = arith.constant 2 : index
    %c0_274 = arith.constant 0 : index
    %530 = vector.load %arg9[%c2_273, %c0_274] : memref<4x32xf32, #tpu.memory_space<vmem>>, vector<1x32xf32>
    %531 = vector.broadcast %530 : vector<1x32xf32> to vector<8x32xf32>
    %532 = arith.addf %529, %531 : vector<8x32xf32>
    %cst_275 = arith.constant dense<0.000000e+00> : vector<8xf32>
    %533 = vector.multi_reduction <add>, %525, %cst_275 [1] : vector<8x32xf32> to vector<8xf32>
    %534 = vector.shape_cast %533 : vector<8xf32> to vector<8x1xf32>
    %cst_276 = arith.constant 3.200000e+01 : f32
    %535 = vector.broadcast %cst_276 : f32 to vector<8x1xf32>
    %536 = arith.divf %534, %535 : vector<8x1xf32>
    %537 = vector.broadcast %536 : vector<8x1xf32> to vector<8x32xf32>
    %538 = arith.subf %525, %537 : vector<8x32xf32>
    %539 = arith.mulf %538, %538 : vector<8x32xf32>
    %cst_277 = arith.constant dense<0.000000e+00> : vector<8xf32>
    %540 = vector.multi_reduction <add>, %539, %cst_277 [1] : vector<8x32xf32> to vector<8xf32>
    %541 = vector.shape_cast %540 : vector<8xf32> to vector<8x1xf32>
    %cst_278 = arith.constant 3.200000e+01 : f32
    %542 = vector.broadcast %cst_278 : f32 to vector<8x1xf32>
    %543 = arith.divf %541, %542 : vector<8x1xf32>
    %cst_279 = arith.constant 9.99999974E-6 : f32
    %544 = vector.broadcast %cst_279 : f32 to vector<8x1xf32>
    %545 = arith.addf %543, %544 : vector<8x1xf32>
    %546 = math.rsqrt %545 : vector<8x1xf32>
    %547 = vector.broadcast %546 : vector<8x1xf32> to vector<8x32xf32>
    %548 = arith.mulf %538, %547 : vector<8x32xf32>
    %c0_280 = arith.constant 0 : index
    %c0_281 = arith.constant 0 : index
    %549 = vector.load %arg10[%c0_280, %c0_281] : memref<19x32xf32, #tpu.memory_space<vmem>>, vector<1x32xf32>
    %550 = vector.broadcast %549 : vector<1x32xf32> to vector<8x32xf32>
    %551 = arith.mulf %548, %550 : vector<8x32xf32>
    %c1_282 = arith.constant 1 : index
    %c0_283 = arith.constant 0 : index
    %552 = vector.load %arg10[%c1_282, %c0_283] : memref<19x32xf32, #tpu.memory_space<vmem>>, vector<1x32xf32>
    %553 = vector.broadcast %552 : vector<1x32xf32> to vector<8x32xf32>
    %554 = arith.addf %551, %553 : vector<8x32xf32>
    %cst_284 = arith.constant 0.000000e+00 : f32
    %555 = vector.broadcast %cst_284 : f32 to vector<8x32xf32>
    %556 = arith.maximumf %554, %555 : vector<8x32xf32>
    %c0_285 = arith.constant 0 : index
    %c0_286 = arith.constant 0 : index
    %c0_287 = arith.constant 0 : index
    %557 = vector.load %arg6[%c0_285, %c0_286, %c0_287] : memref<5x32x32xbf16, #tpu.memory_space<vmem>>, vector<1x32x32xbf16>
    %558 = vector.shape_cast %557 : vector<1x32x32xbf16> to vector<32x32xbf16>
    %559 = arith.truncf %556 : vector<8x32xf32> to vector<8x32xbf16>
    %cst_288 = arith.constant dense<0.000000e+00> : vector<8x32xf32>
    %560 = tpu.matmul %559, %558, %cst_288 {dimension_numbers = #tpu.dot_dimension_numbers<[1], [0], [0], [1], [0, 0, 1, 1], [], []>} : vector<8x32xbf16>, vector<32x32xbf16>, vector<8x32xf32> -> vector<8x32xf32>
    %c2_289 = arith.constant 2 : index
    %c0_290 = arith.constant 0 : index
    %561 = vector.load %arg10[%c2_289, %c0_290] : memref<19x32xf32, #tpu.memory_space<vmem>>, vector<1x32xf32>
    %562 = vector.broadcast %561 : vector<1x32xf32> to vector<8x32xf32>
    %563 = arith.addf %560, %562 : vector<8x32xf32>
    %cst_291 = arith.constant dense<0.000000e+00> : vector<8xf32>
    %564 = vector.multi_reduction <add>, %563, %cst_291 [1] : vector<8x32xf32> to vector<8xf32>
    %565 = vector.shape_cast %564 : vector<8xf32> to vector<8x1xf32>
    %cst_292 = arith.constant 3.200000e+01 : f32
    %566 = vector.broadcast %cst_292 : f32 to vector<8x1xf32>
    %567 = arith.divf %565, %566 : vector<8x1xf32>
    %568 = vector.broadcast %567 : vector<8x1xf32> to vector<8x32xf32>
    %569 = arith.subf %563, %568 : vector<8x32xf32>
    %570 = arith.mulf %569, %569 : vector<8x32xf32>
    %cst_293 = arith.constant dense<0.000000e+00> : vector<8xf32>
    %571 = vector.multi_reduction <add>, %570, %cst_293 [1] : vector<8x32xf32> to vector<8xf32>
    %572 = vector.shape_cast %571 : vector<8xf32> to vector<8x1xf32>
    %cst_294 = arith.constant 3.200000e+01 : f32
    %573 = vector.broadcast %cst_294 : f32 to vector<8x1xf32>
    %574 = arith.divf %572, %573 : vector<8x1xf32>
    %cst_295 = arith.constant 9.99999974E-6 : f32
    %575 = vector.broadcast %cst_295 : f32 to vector<8x1xf32>
    %576 = arith.addf %574, %575 : vector<8x1xf32>
    %577 = math.rsqrt %576 : vector<8x1xf32>
    %578 = vector.broadcast %577 : vector<8x1xf32> to vector<8x32xf32>
    %579 = arith.mulf %569, %578 : vector<8x32xf32>
    %c3_296 = arith.constant 3 : index
    %c0_297 = arith.constant 0 : index
    %580 = vector.load %arg10[%c3_296, %c0_297] : memref<19x32xf32, #tpu.memory_space<vmem>>, vector<1x32xf32>
    %581 = vector.broadcast %580 : vector<1x32xf32> to vector<8x32xf32>
    %582 = arith.mulf %579, %581 : vector<8x32xf32>
    %c4_298 = arith.constant 4 : index
    %c0_299 = arith.constant 0 : index
    %583 = vector.load %arg10[%c4_298, %c0_299] : memref<19x32xf32, #tpu.memory_space<vmem>>, vector<1x32xf32>
    %584 = vector.broadcast %583 : vector<1x32xf32> to vector<8x32xf32>
    %585 = arith.addf %582, %584 : vector<8x32xf32>
    %cst_300 = arith.constant 0.000000e+00 : f32
    %586 = vector.broadcast %cst_300 : f32 to vector<8x32xf32>
    %587 = arith.maximumf %585, %586 : vector<8x32xf32>
    %c1_301 = arith.constant 1 : index
    %c0_302 = arith.constant 0 : index
    %c0_303 = arith.constant 0 : index
    %588 = vector.load %arg6[%c1_301, %c0_302, %c0_303] : memref<5x32x32xbf16, #tpu.memory_space<vmem>>, vector<1x32x32xbf16>
    %589 = vector.shape_cast %588 : vector<1x32x32xbf16> to vector<32x32xbf16>
    %590 = arith.truncf %587 : vector<8x32xf32> to vector<8x32xbf16>
    %cst_304 = arith.constant dense<0.000000e+00> : vector<8x32xf32>
    %591 = tpu.matmul %590, %589, %cst_304 {dimension_numbers = #tpu.dot_dimension_numbers<[1], [0], [0], [1], [0, 0, 1, 1], [], []>} : vector<8x32xbf16>, vector<32x32xbf16>, vector<8x32xf32> -> vector<8x32xf32>
    %c5_305 = arith.constant 5 : index
    %c0_306 = arith.constant 0 : index
    %592 = vector.load %arg10[%c5_305, %c0_306] : memref<19x32xf32, #tpu.memory_space<vmem>>, vector<1x32xf32>
    %593 = vector.broadcast %592 : vector<1x32xf32> to vector<8x32xf32>
    %594 = arith.addf %591, %593 : vector<8x32xf32>
    %cst_307 = arith.constant dense<0.000000e+00> : vector<8xf32>
    %595 = vector.multi_reduction <add>, %594, %cst_307 [1] : vector<8x32xf32> to vector<8xf32>
    %596 = vector.shape_cast %595 : vector<8xf32> to vector<8x1xf32>
    %cst_308 = arith.constant 3.200000e+01 : f32
    %597 = vector.broadcast %cst_308 : f32 to vector<8x1xf32>
    %598 = arith.divf %596, %597 : vector<8x1xf32>
    %599 = vector.broadcast %598 : vector<8x1xf32> to vector<8x32xf32>
    %600 = arith.subf %594, %599 : vector<8x32xf32>
    %601 = arith.mulf %600, %600 : vector<8x32xf32>
    %cst_309 = arith.constant dense<0.000000e+00> : vector<8xf32>
    %602 = vector.multi_reduction <add>, %601, %cst_309 [1] : vector<8x32xf32> to vector<8xf32>
    %603 = vector.shape_cast %602 : vector<8xf32> to vector<8x1xf32>
    %cst_310 = arith.constant 3.200000e+01 : f32
    %604 = vector.broadcast %cst_310 : f32 to vector<8x1xf32>
    %605 = arith.divf %603, %604 : vector<8x1xf32>
    %cst_311 = arith.constant 9.99999974E-6 : f32
    %606 = vector.broadcast %cst_311 : f32 to vector<8x1xf32>
    %607 = arith.addf %605, %606 : vector<8x1xf32>
    %608 = math.rsqrt %607 : vector<8x1xf32>
    %609 = vector.broadcast %608 : vector<8x1xf32> to vector<8x32xf32>
    %610 = arith.mulf %600, %609 : vector<8x32xf32>
    %c6_312 = arith.constant 6 : index
    %c0_313 = arith.constant 0 : index
    %611 = vector.load %arg10[%c6_312, %c0_313] : memref<19x32xf32, #tpu.memory_space<vmem>>, vector<1x32xf32>
    %612 = vector.broadcast %611 : vector<1x32xf32> to vector<8x32xf32>
    %613 = arith.mulf %610, %612 : vector<8x32xf32>
    %c7_314 = arith.constant 7 : index
    %c0_315 = arith.constant 0 : index
    %614 = vector.load %arg10[%c7_314, %c0_315] : memref<19x32xf32, #tpu.memory_space<vmem>>, vector<1x32xf32>
    %615 = vector.broadcast %614 : vector<1x32xf32> to vector<8x32xf32>
    %616 = arith.addf %613, %615 : vector<8x32xf32>
    %cst_316 = arith.constant 0.000000e+00 : f32
    %617 = vector.broadcast %cst_316 : f32 to vector<8x32xf32>
    %618 = arith.maximumf %616, %617 : vector<8x32xf32>
    %619 = vector.broadcast %10 : vector<1x32xf32> to vector<8x32xf32>
    %620 = arith.mulf %618, %619 : vector<8x32xf32>
    %cst_317 = arith.constant dense<0.000000e+00> : vector<8xf32>
    %621 = vector.multi_reduction <add>, %620, %cst_317 [1] : vector<8x32xf32> to vector<8xf32>
    %622 = vector.shape_cast %621 : vector<8xf32> to vector<8x1xf32>
    %623 = vector.broadcast %11 : f32 to vector<8x1xf32>
    %624 = arith.addf %622, %623 : vector<8x1xf32>
    %cst_318 = arith.constant dense<0.000000e+00> : vector<8xf32>
    %625 = vector.multi_reduction <add>, %532, %cst_318 [1] : vector<8x32xf32> to vector<8xf32>
    %626 = vector.shape_cast %625 : vector<8xf32> to vector<8x1xf32>
    %cst_319 = arith.constant 3.200000e+01 : f32
    %627 = vector.broadcast %cst_319 : f32 to vector<8x1xf32>
    %628 = arith.divf %626, %627 : vector<8x1xf32>
    %629 = vector.broadcast %628 : vector<8x1xf32> to vector<8x32xf32>
    %630 = arith.subf %532, %629 : vector<8x32xf32>
    %631 = arith.mulf %630, %630 : vector<8x32xf32>
    %cst_320 = arith.constant dense<0.000000e+00> : vector<8xf32>
    %632 = vector.multi_reduction <add>, %631, %cst_320 [1] : vector<8x32xf32> to vector<8xf32>
    %633 = vector.shape_cast %632 : vector<8xf32> to vector<8x1xf32>
    %cst_321 = arith.constant 3.200000e+01 : f32
    %634 = vector.broadcast %cst_321 : f32 to vector<8x1xf32>
    %635 = arith.divf %633, %634 : vector<8x1xf32>
    %cst_322 = arith.constant 9.99999974E-6 : f32
    %636 = vector.broadcast %cst_322 : f32 to vector<8x1xf32>
    %637 = arith.addf %635, %636 : vector<8x1xf32>
    %638 = math.rsqrt %637 : vector<8x1xf32>
    %639 = vector.broadcast %638 : vector<8x1xf32> to vector<8x32xf32>
    %640 = arith.mulf %630, %639 : vector<8x32xf32>
    %c8_323 = arith.constant 8 : index
    %c0_324 = arith.constant 0 : index
    %641 = vector.load %arg10[%c8_323, %c0_324] : memref<19x32xf32, #tpu.memory_space<vmem>>, vector<1x32xf32>
    %642 = vector.broadcast %641 : vector<1x32xf32> to vector<8x32xf32>
    %643 = arith.mulf %640, %642 : vector<8x32xf32>
    %c9_325 = arith.constant 9 : index
    %c0_326 = arith.constant 0 : index
    %644 = vector.load %arg10[%c9_325, %c0_326] : memref<19x32xf32, #tpu.memory_space<vmem>>, vector<1x32xf32>
    %645 = vector.broadcast %644 : vector<1x32xf32> to vector<8x32xf32>
    %646 = arith.addf %643, %645 : vector<8x32xf32>
    %cst_327 = arith.constant 0.000000e+00 : f32
    %647 = vector.broadcast %cst_327 : f32 to vector<8x32xf32>
    %648 = arith.maximumf %646, %647 : vector<8x32xf32>
    %c2_328 = arith.constant 2 : index
    %c0_329 = arith.constant 0 : index
    %c0_330 = arith.constant 0 : index
    %649 = vector.load %arg6[%c2_328, %c0_329, %c0_330] : memref<5x32x32xbf16, #tpu.memory_space<vmem>>, vector<1x32x32xbf16>
    %650 = vector.shape_cast %649 : vector<1x32x32xbf16> to vector<32x32xbf16>
    %651 = arith.truncf %648 : vector<8x32xf32> to vector<8x32xbf16>
    %cst_331 = arith.constant dense<0.000000e+00> : vector<8x32xf32>
    %652 = tpu.matmul %651, %650, %cst_331 {dimension_numbers = #tpu.dot_dimension_numbers<[1], [0], [0], [1], [0, 0, 1, 1], [], []>} : vector<8x32xbf16>, vector<32x32xbf16>, vector<8x32xf32> -> vector<8x32xf32>
    %c10_332 = arith.constant 10 : index
    %c0_333 = arith.constant 0 : index
    %653 = vector.load %arg10[%c10_332, %c0_333] : memref<19x32xf32, #tpu.memory_space<vmem>>, vector<1x32xf32>
    %654 = vector.broadcast %653 : vector<1x32xf32> to vector<8x32xf32>
    %655 = arith.addf %652, %654 : vector<8x32xf32>
    %cst_334 = arith.constant dense<0.000000e+00> : vector<8xf32>
    %656 = vector.multi_reduction <add>, %655, %cst_334 [1] : vector<8x32xf32> to vector<8xf32>
    %657 = vector.shape_cast %656 : vector<8xf32> to vector<8x1xf32>
    %cst_335 = arith.constant 3.200000e+01 : f32
    %658 = vector.broadcast %cst_335 : f32 to vector<8x1xf32>
    %659 = arith.divf %657, %658 : vector<8x1xf32>
    %660 = vector.broadcast %659 : vector<8x1xf32> to vector<8x32xf32>
    %661 = arith.subf %655, %660 : vector<8x32xf32>
    %662 = arith.mulf %661, %661 : vector<8x32xf32>
    %cst_336 = arith.constant dense<0.000000e+00> : vector<8xf32>
    %663 = vector.multi_reduction <add>, %662, %cst_336 [1] : vector<8x32xf32> to vector<8xf32>
    %664 = vector.shape_cast %663 : vector<8xf32> to vector<8x1xf32>
    %cst_337 = arith.constant 3.200000e+01 : f32
    %665 = vector.broadcast %cst_337 : f32 to vector<8x1xf32>
    %666 = arith.divf %664, %665 : vector<8x1xf32>
    %cst_338 = arith.constant 9.99999974E-6 : f32
    %667 = vector.broadcast %cst_338 : f32 to vector<8x1xf32>
    %668 = arith.addf %666, %667 : vector<8x1xf32>
    %669 = math.rsqrt %668 : vector<8x1xf32>
    %670 = vector.broadcast %669 : vector<8x1xf32> to vector<8x32xf32>
    %671 = arith.mulf %661, %670 : vector<8x32xf32>
    %c11_339 = arith.constant 11 : index
    %c0_340 = arith.constant 0 : index
    %672 = vector.load %arg10[%c11_339, %c0_340] : memref<19x32xf32, #tpu.memory_space<vmem>>, vector<1x32xf32>
    %673 = vector.broadcast %672 : vector<1x32xf32> to vector<8x32xf32>
    %674 = arith.mulf %671, %673 : vector<8x32xf32>
    %c12_341 = arith.constant 12 : index
    %c0_342 = arith.constant 0 : index
    %675 = vector.load %arg10[%c12_341, %c0_342] : memref<19x32xf32, #tpu.memory_space<vmem>>, vector<1x32xf32>
    %676 = vector.broadcast %675 : vector<1x32xf32> to vector<8x32xf32>
    %677 = arith.addf %674, %676 : vector<8x32xf32>
    %cst_343 = arith.constant 0.000000e+00 : f32
    %678 = vector.broadcast %cst_343 : f32 to vector<8x32xf32>
    %679 = arith.maximumf %677, %678 : vector<8x32xf32>
    %c3_344 = arith.constant 3 : index
    %c0_345 = arith.constant 0 : index
    %c0_346 = arith.constant 0 : index
    %680 = vector.load %arg6[%c3_344, %c0_345, %c0_346] : memref<5x32x32xbf16, #tpu.memory_space<vmem>>, vector<1x32x32xbf16>
    %681 = vector.shape_cast %680 : vector<1x32x32xbf16> to vector<32x32xbf16>
    %682 = arith.truncf %679 : vector<8x32xf32> to vector<8x32xbf16>
    %cst_347 = arith.constant dense<0.000000e+00> : vector<8x32xf32>
    %683 = tpu.matmul %682, %681, %cst_347 {dimension_numbers = #tpu.dot_dimension_numbers<[1], [0], [0], [1], [0, 0, 1, 1], [], []>} : vector<8x32xbf16>, vector<32x32xbf16>, vector<8x32xf32> -> vector<8x32xf32>
    %c13_348 = arith.constant 13 : index
    %c0_349 = arith.constant 0 : index
    %684 = vector.load %arg10[%c13_348, %c0_349] : memref<19x32xf32, #tpu.memory_space<vmem>>, vector<1x32xf32>
    %685 = vector.broadcast %684 : vector<1x32xf32> to vector<8x32xf32>
    %686 = arith.addf %683, %685 : vector<8x32xf32>
    %cst_350 = arith.constant dense<0.000000e+00> : vector<8xf32>
    %687 = vector.multi_reduction <add>, %686, %cst_350 [1] : vector<8x32xf32> to vector<8xf32>
    %688 = vector.shape_cast %687 : vector<8xf32> to vector<8x1xf32>
    %cst_351 = arith.constant 3.200000e+01 : f32
    %689 = vector.broadcast %cst_351 : f32 to vector<8x1xf32>
    %690 = arith.divf %688, %689 : vector<8x1xf32>
    %691 = vector.broadcast %690 : vector<8x1xf32> to vector<8x32xf32>
    %692 = arith.subf %686, %691 : vector<8x32xf32>
    %693 = arith.mulf %692, %692 : vector<8x32xf32>
    %cst_352 = arith.constant dense<0.000000e+00> : vector<8xf32>
    %694 = vector.multi_reduction <add>, %693, %cst_352 [1] : vector<8x32xf32> to vector<8xf32>
    %695 = vector.shape_cast %694 : vector<8xf32> to vector<8x1xf32>
    %cst_353 = arith.constant 3.200000e+01 : f32
    %696 = vector.broadcast %cst_353 : f32 to vector<8x1xf32>
    %697 = arith.divf %695, %696 : vector<8x1xf32>
    %cst_354 = arith.constant 9.99999974E-6 : f32
    %698 = vector.broadcast %cst_354 : f32 to vector<8x1xf32>
    %699 = arith.addf %697, %698 : vector<8x1xf32>
    %700 = math.rsqrt %699 : vector<8x1xf32>
    %701 = vector.broadcast %700 : vector<8x1xf32> to vector<8x32xf32>
    %702 = arith.mulf %692, %701 : vector<8x32xf32>
    %c14_355 = arith.constant 14 : index
    %c0_356 = arith.constant 0 : index
    %703 = vector.load %arg10[%c14_355, %c0_356] : memref<19x32xf32, #tpu.memory_space<vmem>>, vector<1x32xf32>
    %704 = vector.broadcast %703 : vector<1x32xf32> to vector<8x32xf32>
    %705 = arith.mulf %702, %704 : vector<8x32xf32>
    %c15_357 = arith.constant 15 : index
    %c0_358 = arith.constant 0 : index
    %706 = vector.load %arg10[%c15_357, %c0_358] : memref<19x32xf32, #tpu.memory_space<vmem>>, vector<1x32xf32>
    %707 = vector.broadcast %706 : vector<1x32xf32> to vector<8x32xf32>
    %708 = arith.addf %705, %707 : vector<8x32xf32>
    %cst_359 = arith.constant 0.000000e+00 : f32
    %709 = vector.broadcast %cst_359 : f32 to vector<8x32xf32>
    %710 = arith.maximumf %708, %709 : vector<8x32xf32>
    %c0_360 = arith.constant 0 : index
    %c0_361 = arith.constant 0 : index
    %c0_362 = arith.constant 0 : index
    %711 = vector.load %arg7[%c0_360, %c0_361, %c0_362] : memref<2x32x12xbf16, #tpu.memory_space<vmem>>, vector<1x32x12xbf16>
    %712 = vector.shape_cast %711 : vector<1x32x12xbf16> to vector<32x12xbf16>
    %713 = arith.truncf %710 : vector<8x32xf32> to vector<8x32xbf16>
    %cst_363 = arith.constant dense<0.000000e+00> : vector<8x12xf32>
    %714 = tpu.matmul %713, %712, %cst_363 {dimension_numbers = #tpu.dot_dimension_numbers<[1], [0], [0], [1], [0, 0, 1, 1], [], []>} : vector<8x32xbf16>, vector<32x12xbf16>, vector<8x12xf32> -> vector<8x12xf32>
    %c0_364 = arith.constant 0 : index
    %c0_365 = arith.constant 0 : index
    %715 = vector.load %arg11[%c0_364, %c0_365] : memref<2x12xf32, #tpu.memory_space<vmem>>, vector<1x12xf32>
    %716 = vector.broadcast %715 : vector<1x12xf32> to vector<8x12xf32>
    %717 = arith.addf %714, %716 : vector<8x12xf32>
    %c4_366 = arith.constant 4 : index
    %c0_367 = arith.constant 0 : index
    %c0_368 = arith.constant 0 : index
    %718 = vector.load %arg6[%c4_366, %c0_367, %c0_368] : memref<5x32x32xbf16, #tpu.memory_space<vmem>>, vector<1x32x32xbf16>
    %719 = vector.shape_cast %718 : vector<1x32x32xbf16> to vector<32x32xbf16>
    %720 = arith.truncf %679 : vector<8x32xf32> to vector<8x32xbf16>
    %cst_369 = arith.constant dense<0.000000e+00> : vector<8x32xf32>
    %721 = tpu.matmul %720, %719, %cst_369 {dimension_numbers = #tpu.dot_dimension_numbers<[1], [0], [0], [1], [0, 0, 1, 1], [], []>} : vector<8x32xbf16>, vector<32x32xbf16>, vector<8x32xf32> -> vector<8x32xf32>
    %c16_370 = arith.constant 16 : index
    %c0_371 = arith.constant 0 : index
    %722 = vector.load %arg10[%c16_370, %c0_371] : memref<19x32xf32, #tpu.memory_space<vmem>>, vector<1x32xf32>
    %723 = vector.broadcast %722 : vector<1x32xf32> to vector<8x32xf32>
    %724 = arith.addf %721, %723 : vector<8x32xf32>
    %cst_372 = arith.constant dense<0.000000e+00> : vector<8xf32>
    %725 = vector.multi_reduction <add>, %724, %cst_372 [1] : vector<8x32xf32> to vector<8xf32>
    %726 = vector.shape_cast %725 : vector<8xf32> to vector<8x1xf32>
    %cst_373 = arith.constant 3.200000e+01 : f32
    %727 = vector.broadcast %cst_373 : f32 to vector<8x1xf32>
    %728 = arith.divf %726, %727 : vector<8x1xf32>
    %729 = vector.broadcast %728 : vector<8x1xf32> to vector<8x32xf32>
    %730 = arith.subf %724, %729 : vector<8x32xf32>
    %731 = arith.mulf %730, %730 : vector<8x32xf32>
    %cst_374 = arith.constant dense<0.000000e+00> : vector<8xf32>
    %732 = vector.multi_reduction <add>, %731, %cst_374 [1] : vector<8x32xf32> to vector<8xf32>
    %733 = vector.shape_cast %732 : vector<8xf32> to vector<8x1xf32>
    %cst_375 = arith.constant 3.200000e+01 : f32
    %734 = vector.broadcast %cst_375 : f32 to vector<8x1xf32>
    %735 = arith.divf %733, %734 : vector<8x1xf32>
    %cst_376 = arith.constant 9.99999974E-6 : f32
    %736 = vector.broadcast %cst_376 : f32 to vector<8x1xf32>
    %737 = arith.addf %735, %736 : vector<8x1xf32>
    %738 = math.rsqrt %737 : vector<8x1xf32>
    %739 = vector.broadcast %738 : vector<8x1xf32> to vector<8x32xf32>
    %740 = arith.mulf %730, %739 : vector<8x32xf32>
    %c17_377 = arith.constant 17 : index
    %c0_378 = arith.constant 0 : index
    %741 = vector.load %arg10[%c17_377, %c0_378] : memref<19x32xf32, #tpu.memory_space<vmem>>, vector<1x32xf32>
    %742 = vector.broadcast %741 : vector<1x32xf32> to vector<8x32xf32>
    %743 = arith.mulf %740, %742 : vector<8x32xf32>
    %c18_379 = arith.constant 18 : index
    %c0_380 = arith.constant 0 : index
    %744 = vector.load %arg10[%c18_379, %c0_380] : memref<19x32xf32, #tpu.memory_space<vmem>>, vector<1x32xf32>
    %745 = vector.broadcast %744 : vector<1x32xf32> to vector<8x32xf32>
    %746 = arith.addf %743, %745 : vector<8x32xf32>
    %cst_381 = arith.constant 0.000000e+00 : f32
    %747 = vector.broadcast %cst_381 : f32 to vector<8x32xf32>
    %748 = arith.maximumf %746, %747 : vector<8x32xf32>
    %c1_382 = arith.constant 1 : index
    %c0_383 = arith.constant 0 : index
    %c0_384 = arith.constant 0 : index
    %749 = vector.load %arg7[%c1_382, %c0_383, %c0_384] : memref<2x32x12xbf16, #tpu.memory_space<vmem>>, vector<1x32x12xbf16>
    %750 = vector.shape_cast %749 : vector<1x32x12xbf16> to vector<32x12xbf16>
    %751 = arith.truncf %748 : vector<8x32xf32> to vector<8x32xbf16>
    %cst_385 = arith.constant dense<0.000000e+00> : vector<8x12xf32>
    %752 = tpu.matmul %751, %750, %cst_385 {dimension_numbers = #tpu.dot_dimension_numbers<[1], [0], [0], [1], [0, 0, 1, 1], [], []>} : vector<8x32xbf16>, vector<32x12xbf16>, vector<8x12xf32> -> vector<8x12xf32>
    %c1_386 = arith.constant 1 : index
    %c0_387 = arith.constant 0 : index
    %753 = vector.load %arg11[%c1_386, %c0_387] : memref<2x12xf32, #tpu.memory_space<vmem>>, vector<1x12xf32>
    %754 = vector.broadcast %753 : vector<1x12xf32> to vector<8x12xf32>
    %755 = arith.addf %752, %754 : vector<8x12xf32>
    %cst_388 = arith.constant 0.000000e+00 : f32
    %756 = vector.broadcast %cst_388 : f32 to vector<8x12xf32>
    %757 = arith.cmpf ogt, %755, %756 : vector<8x12xf32>
    %cst_389 = arith.constant 0.000000e+00 : f32
    %758 = vector.broadcast %cst_389 : f32 to vector<8x12xf32>
    %759 = arith.minimumf %755, %758 : vector<8x12xf32>
    %760 = math.exp %759 : vector<8x12xf32>
    %cst_390 = arith.constant 1.000000e+00 : f32
    %761 = vector.broadcast %cst_390 : f32 to vector<8x12xf32>
    %762 = arith.subf %760, %761 : vector<8x12xf32>
    %763 = arith.select %757, %755, %762 : vector<8x12xi1>, vector<8x12xf32>
    %cst_391 = arith.constant 1.000000e+00 : f32
    %764 = vector.broadcast %cst_391 : f32 to vector<8x12xf32>
    %765 = arith.addf %763, %764 : vector<8x12xf32>
    %cst_392 = arith.constant 1.000000e-03 : f32
    %766 = vector.broadcast %cst_392 : f32 to vector<8x12xf32>
    %767 = arith.addf %765, %766 : vector<8x12xf32>
    %768 = tpu.concatenate %717, %767, %624, %12 in 1 : vector<8x12xf32>, vector<8x12xf32>, vector<8x1xf32>, vector<8x103xf32> -> vector<8x128xf32>
    %c2_393 = arith.constant 2 : index
    %c0_394 = arith.constant 0 : index
    %c0_395 = arith.constant 0 : index
    %769 = vector.load %arg14[%c2_393, %c0_394, %c0_395] : memref<4x8x128xf32, #tpu.memory_space<vmem>>, vector<1x8x128xf32>
    %770 = vector.shape_cast %769 : vector<1x8x128xf32> to vector<8x128xf32>
    %771 = vector.shape_cast %768 : vector<8x128xf32> to vector<1x8x128xf32>
    tpu.vector_store %arg14[%c2_393, %c0_394, %c0_395], %771 {strides = array<i32>} : memref<4x8x128xf32, #tpu.memory_space<vmem>>, vector<1x8x128xf32>,
    %c3_396 = arith.constant 3 : index
    %c0_397 = arith.constant 0 : index
    %c0_398 = arith.constant 0 : index
    %772 = vector.load %arg4[%c3_396, %c0_397, %c0_398] : memref<4x64x32xbf16, #tpu.memory_space<vmem>>, vector<1x64x32xbf16>
    %773 = vector.shape_cast %772 : vector<1x64x32xbf16> to vector<64x32xbf16>
    %cst_399 = arith.constant dense<0.000000e+00> : vector<8x32xf32>
    %774 = tpu.matmul %3, %773, %cst_399 {dimension_numbers = #tpu.dot_dimension_numbers<[1], [0], [0], [1], [0, 0, 1, 1], [], []>} : vector<8x64xbf16>, vector<64x32xbf16>, vector<8x32xf32> -> vector<8x32xf32>
    %775 = arith.addf %6, %774 : vector<8x32xf32>
    %c3_400 = arith.constant 3 : index
    %c0_401 = arith.constant 0 : index
    %776 = vector.load %arg8[%c3_400, %c0_401] : memref<4x32xf32, #tpu.memory_space<vmem>>, vector<1x32xf32>
    %777 = vector.broadcast %776 : vector<1x32xf32> to vector<8x32xf32>
    %778 = arith.addf %775, %777 : vector<8x32xf32>
    %c3_402 = arith.constant 3 : index
    %c0_403 = arith.constant 0 : index
    %c0_404 = arith.constant 0 : index
    %779 = vector.load %arg5[%c3_402, %c0_403, %c0_404] : memref<4x64x32xbf16, #tpu.memory_space<vmem>>, vector<1x64x32xbf16>
    %780 = vector.shape_cast %779 : vector<1x64x32xbf16> to vector<64x32xbf16>
    %cst_405 = arith.constant dense<0.000000e+00> : vector<8x32xf32>
    %781 = tpu.matmul %3, %780, %cst_405 {dimension_numbers = #tpu.dot_dimension_numbers<[1], [0], [0], [1], [0, 0, 1, 1], [], []>} : vector<8x64xbf16>, vector<64x32xbf16>, vector<8x32xf32> -> vector<8x32xf32>
    %782 = arith.addf %9, %781 : vector<8x32xf32>
    %c3_406 = arith.constant 3 : index
    %c0_407 = arith.constant 0 : index
    %783 = vector.load %arg9[%c3_406, %c0_407] : memref<4x32xf32, #tpu.memory_space<vmem>>, vector<1x32xf32>
    %784 = vector.broadcast %783 : vector<1x32xf32> to vector<8x32xf32>
    %785 = arith.addf %782, %784 : vector<8x32xf32>
    %cst_408 = arith.constant dense<0.000000e+00> : vector<8xf32>
    %786 = vector.multi_reduction <add>, %778, %cst_408 [1] : vector<8x32xf32> to vector<8xf32>
    %787 = vector.shape_cast %786 : vector<8xf32> to vector<8x1xf32>
    %cst_409 = arith.constant 3.200000e+01 : f32
    %788 = vector.broadcast %cst_409 : f32 to vector<8x1xf32>
    %789 = arith.divf %787, %788 : vector<8x1xf32>
    %790 = vector.broadcast %789 : vector<8x1xf32> to vector<8x32xf32>
    %791 = arith.subf %778, %790 : vector<8x32xf32>
    %792 = arith.mulf %791, %791 : vector<8x32xf32>
    %cst_410 = arith.constant dense<0.000000e+00> : vector<8xf32>
    %793 = vector.multi_reduction <add>, %792, %cst_410 [1] : vector<8x32xf32> to vector<8xf32>
    %794 = vector.shape_cast %793 : vector<8xf32> to vector<8x1xf32>
    %cst_411 = arith.constant 3.200000e+01 : f32
    %795 = vector.broadcast %cst_411 : f32 to vector<8x1xf32>
    %796 = arith.divf %794, %795 : vector<8x1xf32>
    %cst_412 = arith.constant 9.99999974E-6 : f32
    %797 = vector.broadcast %cst_412 : f32 to vector<8x1xf32>
    %798 = arith.addf %796, %797 : vector<8x1xf32>
    %799 = math.rsqrt %798 : vector<8x1xf32>
    %800 = vector.broadcast %799 : vector<8x1xf32> to vector<8x32xf32>
    %801 = arith.mulf %791, %800 : vector<8x32xf32>
    %c0_413 = arith.constant 0 : index
    %c0_414 = arith.constant 0 : index
    %802 = vector.load %arg10[%c0_413, %c0_414] : memref<19x32xf32, #tpu.memory_space<vmem>>, vector<1x32xf32>
    %803 = vector.broadcast %802 : vector<1x32xf32> to vector<8x32xf32>
    %804 = arith.mulf %801, %803 : vector<8x32xf32>
    %c1_415 = arith.constant 1 : index
    %c0_416 = arith.constant 0 : index
    %805 = vector.load %arg10[%c1_415, %c0_416] : memref<19x32xf32, #tpu.memory_space<vmem>>, vector<1x32xf32>
    %806 = vector.broadcast %805 : vector<1x32xf32> to vector<8x32xf32>
    %807 = arith.addf %804, %806 : vector<8x32xf32>
    %cst_417 = arith.constant 0.000000e+00 : f32
    %808 = vector.broadcast %cst_417 : f32 to vector<8x32xf32>
    %809 = arith.maximumf %807, %808 : vector<8x32xf32>
    %c0_418 = arith.constant 0 : index
    %c0_419 = arith.constant 0 : index
    %c0_420 = arith.constant 0 : index
    %810 = vector.load %arg6[%c0_418, %c0_419, %c0_420] : memref<5x32x32xbf16, #tpu.memory_space<vmem>>, vector<1x32x32xbf16>
    %811 = vector.shape_cast %810 : vector<1x32x32xbf16> to vector<32x32xbf16>
    %812 = arith.truncf %809 : vector<8x32xf32> to vector<8x32xbf16>
    %cst_421 = arith.constant dense<0.000000e+00> : vector<8x32xf32>
    %813 = tpu.matmul %812, %811, %cst_421 {dimension_numbers = #tpu.dot_dimension_numbers<[1], [0], [0], [1], [0, 0, 1, 1], [], []>} : vector<8x32xbf16>, vector<32x32xbf16>, vector<8x32xf32> -> vector<8x32xf32>
    %c2_422 = arith.constant 2 : index
    %c0_423 = arith.constant 0 : index
    %814 = vector.load %arg10[%c2_422, %c0_423] : memref<19x32xf32, #tpu.memory_space<vmem>>, vector<1x32xf32>
    %815 = vector.broadcast %814 : vector<1x32xf32> to vector<8x32xf32>
    %816 = arith.addf %813, %815 : vector<8x32xf32>
    %cst_424 = arith.constant dense<0.000000e+00> : vector<8xf32>
    %817 = vector.multi_reduction <add>, %816, %cst_424 [1] : vector<8x32xf32> to vector<8xf32>
    %818 = vector.shape_cast %817 : vector<8xf32> to vector<8x1xf32>
    %cst_425 = arith.constant 3.200000e+01 : f32
    %819 = vector.broadcast %cst_425 : f32 to vector<8x1xf32>
    %820 = arith.divf %818, %819 : vector<8x1xf32>
    %821 = vector.broadcast %820 : vector<8x1xf32> to vector<8x32xf32>
    %822 = arith.subf %816, %821 : vector<8x32xf32>
    %823 = arith.mulf %822, %822 : vector<8x32xf32>
    %cst_426 = arith.constant dense<0.000000e+00> : vector<8xf32>
    %824 = vector.multi_reduction <add>, %823, %cst_426 [1] : vector<8x32xf32> to vector<8xf32>
    %825 = vector.shape_cast %824 : vector<8xf32> to vector<8x1xf32>
    %cst_427 = arith.constant 3.200000e+01 : f32
    %826 = vector.broadcast %cst_427 : f32 to vector<8x1xf32>
    %827 = arith.divf %825, %826 : vector<8x1xf32>
    %cst_428 = arith.constant 9.99999974E-6 : f32
    %828 = vector.broadcast %cst_428 : f32 to vector<8x1xf32>
    %829 = arith.addf %827, %828 : vector<8x1xf32>
    %830 = math.rsqrt %829 : vector<8x1xf32>
    %831 = vector.broadcast %830 : vector<8x1xf32> to vector<8x32xf32>
    %832 = arith.mulf %822, %831 : vector<8x32xf32>
    %c3_429 = arith.constant 3 : index
    %c0_430 = arith.constant 0 : index
    %833 = vector.load %arg10[%c3_429, %c0_430] : memref<19x32xf32, #tpu.memory_space<vmem>>, vector<1x32xf32>
    %834 = vector.broadcast %833 : vector<1x32xf32> to vector<8x32xf32>
    %835 = arith.mulf %832, %834 : vector<8x32xf32>
    %c4_431 = arith.constant 4 : index
    %c0_432 = arith.constant 0 : index
    %836 = vector.load %arg10[%c4_431, %c0_432] : memref<19x32xf32, #tpu.memory_space<vmem>>, vector<1x32xf32>
    %837 = vector.broadcast %836 : vector<1x32xf32> to vector<8x32xf32>
    %838 = arith.addf %835, %837 : vector<8x32xf32>
    %cst_433 = arith.constant 0.000000e+00 : f32
    %839 = vector.broadcast %cst_433 : f32 to vector<8x32xf32>
    %840 = arith.maximumf %838, %839 : vector<8x32xf32>
    %c1_434 = arith.constant 1 : index
    %c0_435 = arith.constant 0 : index
    %c0_436 = arith.constant 0 : index
    %841 = vector.load %arg6[%c1_434, %c0_435, %c0_436] : memref<5x32x32xbf16, #tpu.memory_space<vmem>>, vector<1x32x32xbf16>
    %842 = vector.shape_cast %841 : vector<1x32x32xbf16> to vector<32x32xbf16>
    %843 = arith.truncf %840 : vector<8x32xf32> to vector<8x32xbf16>
    %cst_437 = arith.constant dense<0.000000e+00> : vector<8x32xf32>
    %844 = tpu.matmul %843, %842, %cst_437 {dimension_numbers = #tpu.dot_dimension_numbers<[1], [0], [0], [1], [0, 0, 1, 1], [], []>} : vector<8x32xbf16>, vector<32x32xbf16>, vector<8x32xf32> -> vector<8x32xf32>
    %c5_438 = arith.constant 5 : index
    %c0_439 = arith.constant 0 : index
    %845 = vector.load %arg10[%c5_438, %c0_439] : memref<19x32xf32, #tpu.memory_space<vmem>>, vector<1x32xf32>
    %846 = vector.broadcast %845 : vector<1x32xf32> to vector<8x32xf32>
    %847 = arith.addf %844, %846 : vector<8x32xf32>
    %cst_440 = arith.constant dense<0.000000e+00> : vector<8xf32>
    %848 = vector.multi_reduction <add>, %847, %cst_440 [1] : vector<8x32xf32> to vector<8xf32>
    %849 = vector.shape_cast %848 : vector<8xf32> to vector<8x1xf32>
    %cst_441 = arith.constant 3.200000e+01 : f32
    %850 = vector.broadcast %cst_441 : f32 to vector<8x1xf32>
    %851 = arith.divf %849, %850 : vector<8x1xf32>
    %852 = vector.broadcast %851 : vector<8x1xf32> to vector<8x32xf32>
    %853 = arith.subf %847, %852 : vector<8x32xf32>
    %854 = arith.mulf %853, %853 : vector<8x32xf32>
    %cst_442 = arith.constant dense<0.000000e+00> : vector<8xf32>
    %855 = vector.multi_reduction <add>, %854, %cst_442 [1] : vector<8x32xf32> to vector<8xf32>
    %856 = vector.shape_cast %855 : vector<8xf32> to vector<8x1xf32>
    %cst_443 = arith.constant 3.200000e+01 : f32
    %857 = vector.broadcast %cst_443 : f32 to vector<8x1xf32>
    %858 = arith.divf %856, %857 : vector<8x1xf32>
    %cst_444 = arith.constant 9.99999974E-6 : f32
    %859 = vector.broadcast %cst_444 : f32 to vector<8x1xf32>
    %860 = arith.addf %858, %859 : vector<8x1xf32>
    %861 = math.rsqrt %860 : vector<8x1xf32>
    %862 = vector.broadcast %861 : vector<8x1xf32> to vector<8x32xf32>
    %863 = arith.mulf %853, %862 : vector<8x32xf32>
    %c6_445 = arith.constant 6 : index
    %c0_446 = arith.constant 0 : index
    %864 = vector.load %arg10[%c6_445, %c0_446] : memref<19x32xf32, #tpu.memory_space<vmem>>, vector<1x32xf32>
    %865 = vector.broadcast %864 : vector<1x32xf32> to vector<8x32xf32>
    %866 = arith.mulf %863, %865 : vector<8x32xf32>
    %c7_447 = arith.constant 7 : index
    %c0_448 = arith.constant 0 : index
    %867 = vector.load %arg10[%c7_447, %c0_448] : memref<19x32xf32, #tpu.memory_space<vmem>>, vector<1x32xf32>
    %868 = vector.broadcast %867 : vector<1x32xf32> to vector<8x32xf32>
    %869 = arith.addf %866, %868 : vector<8x32xf32>
    %cst_449 = arith.constant 0.000000e+00 : f32
    %870 = vector.broadcast %cst_449 : f32 to vector<8x32xf32>
    %871 = arith.maximumf %869, %870 : vector<8x32xf32>
    %872 = vector.broadcast %10 : vector<1x32xf32> to vector<8x32xf32>
    %873 = arith.mulf %871, %872 : vector<8x32xf32>
    %cst_450 = arith.constant dense<0.000000e+00> : vector<8xf32>
    %874 = vector.multi_reduction <add>, %873, %cst_450 [1] : vector<8x32xf32> to vector<8xf32>
    %875 = vector.shape_cast %874 : vector<8xf32> to vector<8x1xf32>
    %876 = vector.broadcast %11 : f32 to vector<8x1xf32>
    %877 = arith.addf %875, %876 : vector<8x1xf32>
    %cst_451 = arith.constant dense<0.000000e+00> : vector<8xf32>
    %878 = vector.multi_reduction <add>, %785, %cst_451 [1] : vector<8x32xf32> to vector<8xf32>
    %879 = vector.shape_cast %878 : vector<8xf32> to vector<8x1xf32>
    %cst_452 = arith.constant 3.200000e+01 : f32
    %880 = vector.broadcast %cst_452 : f32 to vector<8x1xf32>
    %881 = arith.divf %879, %880 : vector<8x1xf32>
    %882 = vector.broadcast %881 : vector<8x1xf32> to vector<8x32xf32>
    %883 = arith.subf %785, %882 : vector<8x32xf32>
    %884 = arith.mulf %883, %883 : vector<8x32xf32>
    %cst_453 = arith.constant dense<0.000000e+00> : vector<8xf32>
    %885 = vector.multi_reduction <add>, %884, %cst_453 [1] : vector<8x32xf32> to vector<8xf32>
    %886 = vector.shape_cast %885 : vector<8xf32> to vector<8x1xf32>
    %cst_454 = arith.constant 3.200000e+01 : f32
    %887 = vector.broadcast %cst_454 : f32 to vector<8x1xf32>
    %888 = arith.divf %886, %887 : vector<8x1xf32>
    %cst_455 = arith.constant 9.99999974E-6 : f32
    %889 = vector.broadcast %cst_455 : f32 to vector<8x1xf32>
    %890 = arith.addf %888, %889 : vector<8x1xf32>
    %891 = math.rsqrt %890 : vector<8x1xf32>
    %892 = vector.broadcast %891 : vector<8x1xf32> to vector<8x32xf32>
    %893 = arith.mulf %883, %892 : vector<8x32xf32>
    %c8_456 = arith.constant 8 : index
    %c0_457 = arith.constant 0 : index
    %894 = vector.load %arg10[%c8_456, %c0_457] : memref<19x32xf32, #tpu.memory_space<vmem>>, vector<1x32xf32>
    %895 = vector.broadcast %894 : vector<1x32xf32> to vector<8x32xf32>
    %896 = arith.mulf %893, %895 : vector<8x32xf32>
    %c9_458 = arith.constant 9 : index
    %c0_459 = arith.constant 0 : index
    %897 = vector.load %arg10[%c9_458, %c0_459] : memref<19x32xf32, #tpu.memory_space<vmem>>, vector<1x32xf32>
    %898 = vector.broadcast %897 : vector<1x32xf32> to vector<8x32xf32>
    %899 = arith.addf %896, %898 : vector<8x32xf32>
    %cst_460 = arith.constant 0.000000e+00 : f32
    %900 = vector.broadcast %cst_460 : f32 to vector<8x32xf32>
    %901 = arith.maximumf %899, %900 : vector<8x32xf32>
    %c2_461 = arith.constant 2 : index
    %c0_462 = arith.constant 0 : index
    %c0_463 = arith.constant 0 : index
    %902 = vector.load %arg6[%c2_461, %c0_462, %c0_463] : memref<5x32x32xbf16, #tpu.memory_space<vmem>>, vector<1x32x32xbf16>
    %903 = vector.shape_cast %902 : vector<1x32x32xbf16> to vector<32x32xbf16>
    %904 = arith.truncf %901 : vector<8x32xf32> to vector<8x32xbf16>
    %cst_464 = arith.constant dense<0.000000e+00> : vector<8x32xf32>
    %905 = tpu.matmul %904, %903, %cst_464 {dimension_numbers = #tpu.dot_dimension_numbers<[1], [0], [0], [1], [0, 0, 1, 1], [], []>} : vector<8x32xbf16>, vector<32x32xbf16>, vector<8x32xf32> -> vector<8x32xf32>
    %c10_465 = arith.constant 10 : index
    %c0_466 = arith.constant 0 : index
    %906 = vector.load %arg10[%c10_465, %c0_466] : memref<19x32xf32, #tpu.memory_space<vmem>>, vector<1x32xf32>
    %907 = vector.broadcast %906 : vector<1x32xf32> to vector<8x32xf32>
    %908 = arith.addf %905, %907 : vector<8x32xf32>
    %cst_467 = arith.constant dense<0.000000e+00> : vector<8xf32>
    %909 = vector.multi_reduction <add>, %908, %cst_467 [1] : vector<8x32xf32> to vector<8xf32>
    %910 = vector.shape_cast %909 : vector<8xf32> to vector<8x1xf32>
    %cst_468 = arith.constant 3.200000e+01 : f32
    %911 = vector.broadcast %cst_468 : f32 to vector<8x1xf32>
    %912 = arith.divf %910, %911 : vector<8x1xf32>
    %913 = vector.broadcast %912 : vector<8x1xf32> to vector<8x32xf32>
    %914 = arith.subf %908, %913 : vector<8x32xf32>
    %915 = arith.mulf %914, %914 : vector<8x32xf32>
    %cst_469 = arith.constant dense<0.000000e+00> : vector<8xf32>
    %916 = vector.multi_reduction <add>, %915, %cst_469 [1] : vector<8x32xf32> to vector<8xf32>
    %917 = vector.shape_cast %916 : vector<8xf32> to vector<8x1xf32>
    %cst_470 = arith.constant 3.200000e+01 : f32
    %918 = vector.broadcast %cst_470 : f32 to vector<8x1xf32>
    %919 = arith.divf %917, %918 : vector<8x1xf32>
    %cst_471 = arith.constant 9.99999974E-6 : f32
    %920 = vector.broadcast %cst_471 : f32 to vector<8x1xf32>
    %921 = arith.addf %919, %920 : vector<8x1xf32>
    %922 = math.rsqrt %921 : vector<8x1xf32>
    %923 = vector.broadcast %922 : vector<8x1xf32> to vector<8x32xf32>
    %924 = arith.mulf %914, %923 : vector<8x32xf32>
    %c11_472 = arith.constant 11 : index
    %c0_473 = arith.constant 0 : index
    %925 = vector.load %arg10[%c11_472, %c0_473] : memref<19x32xf32, #tpu.memory_space<vmem>>, vector<1x32xf32>
    %926 = vector.broadcast %925 : vector<1x32xf32> to vector<8x32xf32>
    %927 = arith.mulf %924, %926 : vector<8x32xf32>
    %c12_474 = arith.constant 12 : index
    %c0_475 = arith.constant 0 : index
    %928 = vector.load %arg10[%c12_474, %c0_475] : memref<19x32xf32, #tpu.memory_space<vmem>>, vector<1x32xf32>
    %929 = vector.broadcast %928 : vector<1x32xf32> to vector<8x32xf32>
    %930 = arith.addf %927, %929 : vector<8x32xf32>
    %cst_476 = arith.constant 0.000000e+00 : f32
    %931 = vector.broadcast %cst_476 : f32 to vector<8x32xf32>
    %932 = arith.maximumf %930, %931 : vector<8x32xf32>
    %c3_477 = arith.constant 3 : index
    %c0_478 = arith.constant 0 : index
    %c0_479 = arith.constant 0 : index
    %933 = vector.load %arg6[%c3_477, %c0_478, %c0_479] : memref<5x32x32xbf16, #tpu.memory_space<vmem>>, vector<1x32x32xbf16>
    %934 = vector.shape_cast %933 : vector<1x32x32xbf16> to vector<32x32xbf16>
    %935 = arith.truncf %932 : vector<8x32xf32> to vector<8x32xbf16>
    %cst_480 = arith.constant dense<0.000000e+00> : vector<8x32xf32>
    %936 = tpu.matmul %935, %934, %cst_480 {dimension_numbers = #tpu.dot_dimension_numbers<[1], [0], [0], [1], [0, 0, 1, 1], [], []>} : vector<8x32xbf16>, vector<32x32xbf16>, vector<8x32xf32> -> vector<8x32xf32>
    %c13_481 = arith.constant 13 : index
    %c0_482 = arith.constant 0 : index
    %937 = vector.load %arg10[%c13_481, %c0_482] : memref<19x32xf32, #tpu.memory_space<vmem>>, vector<1x32xf32>
    %938 = vector.broadcast %937 : vector<1x32xf32> to vector<8x32xf32>
    %939 = arith.addf %936, %938 : vector<8x32xf32>
    %cst_483 = arith.constant dense<0.000000e+00> : vector<8xf32>
    %940 = vector.multi_reduction <add>, %939, %cst_483 [1] : vector<8x32xf32> to vector<8xf32>
    %941 = vector.shape_cast %940 : vector<8xf32> to vector<8x1xf32>
    %cst_484 = arith.constant 3.200000e+01 : f32
    %942 = vector.broadcast %cst_484 : f32 to vector<8x1xf32>
    %943 = arith.divf %941, %942 : vector<8x1xf32>
    %944 = vector.broadcast %943 : vector<8x1xf32> to vector<8x32xf32>
    %945 = arith.subf %939, %944 : vector<8x32xf32>
    %946 = arith.mulf %945, %945 : vector<8x32xf32>
    %cst_485 = arith.constant dense<0.000000e+00> : vector<8xf32>
    %947 = vector.multi_reduction <add>, %946, %cst_485 [1] : vector<8x32xf32> to vector<8xf32>
    %948 = vector.shape_cast %947 : vector<8xf32> to vector<8x1xf32>
    %cst_486 = arith.constant 3.200000e+01 : f32
    %949 = vector.broadcast %cst_486 : f32 to vector<8x1xf32>
    %950 = arith.divf %948, %949 : vector<8x1xf32>
    %cst_487 = arith.constant 9.99999974E-6 : f32
    %951 = vector.broadcast %cst_487 : f32 to vector<8x1xf32>
    %952 = arith.addf %950, %951 : vector<8x1xf32>
    %953 = math.rsqrt %952 : vector<8x1xf32>
    %954 = vector.broadcast %953 : vector<8x1xf32> to vector<8x32xf32>
    %955 = arith.mulf %945, %954 : vector<8x32xf32>
    %c14_488 = arith.constant 14 : index
    %c0_489 = arith.constant 0 : index
    %956 = vector.load %arg10[%c14_488, %c0_489] : memref<19x32xf32, #tpu.memory_space<vmem>>, vector<1x32xf32>
    %957 = vector.broadcast %956 : vector<1x32xf32> to vector<8x32xf32>
    %958 = arith.mulf %955, %957 : vector<8x32xf32>
    %c15_490 = arith.constant 15 : index
    %c0_491 = arith.constant 0 : index
    %959 = vector.load %arg10[%c15_490, %c0_491] : memref<19x32xf32, #tpu.memory_space<vmem>>, vector<1x32xf32>
    %960 = vector.broadcast %959 : vector<1x32xf32> to vector<8x32xf32>
    %961 = arith.addf %958, %960 : vector<8x32xf32>
    %cst_492 = arith.constant 0.000000e+00 : f32
    %962 = vector.broadcast %cst_492 : f32 to vector<8x32xf32>
    %963 = arith.maximumf %961, %962 : vector<8x32xf32>
    %c0_493 = arith.constant 0 : index
    %c0_494 = arith.constant 0 : index
    %c0_495 = arith.constant 0 : index
    %964 = vector.load %arg7[%c0_493, %c0_494, %c0_495] : memref<2x32x12xbf16, #tpu.memory_space<vmem>>, vector<1x32x12xbf16>
    %965 = vector.shape_cast %964 : vector<1x32x12xbf16> to vector<32x12xbf16>
    %966 = arith.truncf %963 : vector<8x32xf32> to vector<8x32xbf16>
    %cst_496 = arith.constant dense<0.000000e+00> : vector<8x12xf32>
    %967 = tpu.matmul %966, %965, %cst_496 {dimension_numbers = #tpu.dot_dimension_numbers<[1], [0], [0], [1], [0, 0, 1, 1], [], []>} : vector<8x32xbf16>, vector<32x12xbf16>, vector<8x12xf32> -> vector<8x12xf32>
    %c0_497 = arith.constant 0 : index
    %c0_498 = arith.constant 0 : index
    %968 = vector.load %arg11[%c0_497, %c0_498] : memref<2x12xf32, #tpu.memory_space<vmem>>, vector<1x12xf32>
    %969 = vector.broadcast %968 : vector<1x12xf32> to vector<8x12xf32>
    %970 = arith.addf %967, %969 : vector<8x12xf32>
    %c4_499 = arith.constant 4 : index
    %c0_500 = arith.constant 0 : index
    %c0_501 = arith.constant 0 : index
    %971 = vector.load %arg6[%c4_499, %c0_500, %c0_501] : memref<5x32x32xbf16, #tpu.memory_space<vmem>>, vector<1x32x32xbf16>
    %972 = vector.shape_cast %971 : vector<1x32x32xbf16> to vector<32x32xbf16>
    %973 = arith.truncf %932 : vector<8x32xf32> to vector<8x32xbf16>
    %cst_502 = arith.constant dense<0.000000e+00> : vector<8x32xf32>
    %974 = tpu.matmul %973, %972, %cst_502 {dimension_numbers = #tpu.dot_dimension_numbers<[1], [0], [0], [1], [0, 0, 1, 1], [], []>} : vector<8x32xbf16>, vector<32x32xbf16>, vector<8x32xf32> -> vector<8x32xf32>
    %c16_503 = arith.constant 16 : index
    %c0_504 = arith.constant 0 : index
    %975 = vector.load %arg10[%c16_503, %c0_504] : memref<19x32xf32, #tpu.memory_space<vmem>>, vector<1x32xf32>
    %976 = vector.broadcast %975 : vector<1x32xf32> to vector<8x32xf32>
    %977 = arith.addf %974, %976 : vector<8x32xf32>
    %cst_505 = arith.constant dense<0.000000e+00> : vector<8xf32>
    %978 = vector.multi_reduction <add>, %977, %cst_505 [1] : vector<8x32xf32> to vector<8xf32>
    %979 = vector.shape_cast %978 : vector<8xf32> to vector<8x1xf32>
    %cst_506 = arith.constant 3.200000e+01 : f32
    %980 = vector.broadcast %cst_506 : f32 to vector<8x1xf32>
    %981 = arith.divf %979, %980 : vector<8x1xf32>
    %982 = vector.broadcast %981 : vector<8x1xf32> to vector<8x32xf32>
    %983 = arith.subf %977, %982 : vector<8x32xf32>
    %984 = arith.mulf %983, %983 : vector<8x32xf32>
    %cst_507 = arith.constant dense<0.000000e+00> : vector<8xf32>
    %985 = vector.multi_reduction <add>, %984, %cst_507 [1] : vector<8x32xf32> to vector<8xf32>
    %986 = vector.shape_cast %985 : vector<8xf32> to vector<8x1xf32>
    %cst_508 = arith.constant 3.200000e+01 : f32
    %987 = vector.broadcast %cst_508 : f32 to vector<8x1xf32>
    %988 = arith.divf %986, %987 : vector<8x1xf32>
    %cst_509 = arith.constant 9.99999974E-6 : f32
    %989 = vector.broadcast %cst_509 : f32 to vector<8x1xf32>
    %990 = arith.addf %988, %989 : vector<8x1xf32>
    %991 = math.rsqrt %990 : vector<8x1xf32>
    %992 = vector.broadcast %991 : vector<8x1xf32> to vector<8x32xf32>
    %993 = arith.mulf %983, %992 : vector<8x32xf32>
    %c17_510 = arith.constant 17 : index
    %c0_511 = arith.constant 0 : index
    %994 = vector.load %arg10[%c17_510, %c0_511] : memref<19x32xf32, #tpu.memory_space<vmem>>, vector<1x32xf32>
    %995 = vector.broadcast %994 : vector<1x32xf32> to vector<8x32xf32>
    %996 = arith.mulf %993, %995 : vector<8x32xf32>
    %c18_512 = arith.constant 18 : index
    %c0_513 = arith.constant 0 : index
    %997 = vector.load %arg10[%c18_512, %c0_513] : memref<19x32xf32, #tpu.memory_space<vmem>>, vector<1x32xf32>
    %998 = vector.broadcast %997 : vector<1x32xf32> to vector<8x32xf32>
    %999 = arith.addf %996, %998 : vector<8x32xf32>
    %cst_514 = arith.constant 0.000000e+00 : f32
    %1000 = vector.broadcast %cst_514 : f32 to vector<8x32xf32>
    %1001 = arith.maximumf %999, %1000 : vector<8x32xf32>
    %c1_515 = arith.constant 1 : index
    %c0_516 = arith.constant 0 : index
    %c0_517 = arith.constant 0 : index
    %1002 = vector.load %arg7[%c1_515, %c0_516, %c0_517] : memref<2x32x12xbf16, #tpu.memory_space<vmem>>, vector<1x32x12xbf16>
    %1003 = vector.shape_cast %1002 : vector<1x32x12xbf16> to vector<32x12xbf16>
    %1004 = arith.truncf %1001 : vector<8x32xf32> to vector<8x32xbf16>
    %cst_518 = arith.constant dense<0.000000e+00> : vector<8x12xf32>
    %1005 = tpu.matmul %1004, %1003, %cst_518 {dimension_numbers = #tpu.dot_dimension_numbers<[1], [0], [0], [1], [0, 0, 1, 1], [], []>} : vector<8x32xbf16>, vector<32x12xbf16>, vector<8x12xf32> -> vector<8x12xf32>
    %c1_519 = arith.constant 1 : index
    %c0_520 = arith.constant 0 : index
    %1006 = vector.load %arg11[%c1_519, %c0_520] : memref<2x12xf32, #tpu.memory_space<vmem>>, vector<1x12xf32>
    %1007 = vector.broadcast %1006 : vector<1x12xf32> to vector<8x12xf32>
    %1008 = arith.addf %1005, %1007 : vector<8x12xf32>
    %cst_521 = arith.constant 0.000000e+00 : f32
    %1009 = vector.broadcast %cst_521 : f32 to vector<8x12xf32>
    %1010 = arith.cmpf ogt, %1008, %1009 : vector<8x12xf32>
    %cst_522 = arith.constant 0.000000e+00 : f32
    %1011 = vector.broadcast %cst_522 : f32 to vector<8x12xf32>
    %1012 = arith.minimumf %1008, %1011 : vector<8x12xf32>
    %1013 = math.exp %1012 : vector<8x12xf32>
    %cst_523 = arith.constant 1.000000e+00 : f32
    %1014 = vector.broadcast %cst_523 : f32 to vector<8x12xf32>
    %1015 = arith.subf %1013, %1014 : vector<8x12xf32>
    %1016 = arith.select %1010, %1008, %1015 : vector<8x12xi1>, vector<8x12xf32>
    %cst_524 = arith.constant 1.000000e+00 : f32
    %1017 = vector.broadcast %cst_524 : f32 to vector<8x12xf32>
    %1018 = arith.addf %1016, %1017 : vector<8x12xf32>
    %cst_525 = arith.constant 1.000000e-03 : f32
    %1019 = vector.broadcast %cst_525 : f32 to vector<8x12xf32>
    %1020 = arith.addf %1018, %1019 : vector<8x12xf32>
    %1021 = tpu.concatenate %970, %1020, %877, %12 in 1 : vector<8x12xf32>, vector<8x12xf32>, vector<8x1xf32>, vector<8x103xf32> -> vector<8x128xf32>
    %c3_526 = arith.constant 3 : index
    %c0_527 = arith.constant 0 : index
    %c0_528 = arith.constant 0 : index
    %1022 = vector.load %arg14[%c3_526, %c0_527, %c0_528] : memref<4x8x128xf32, #tpu.memory_space<vmem>>, vector<1x8x128xf32>
    %1023 = vector.shape_cast %1022 : vector<1x8x128xf32> to vector<8x128xf32>
    %1024 = vector.shape_cast %1021 : vector<8x128xf32> to vector<1x8x128xf32>
    tpu.vector_store %arg14[%c3_526, %c0_527, %c0_528], %1024 {strides = array<i32>} : memref<4x8x128xf32, #tpu.memory_space<vmem>>, vector<1x8x128xf32>,
    return
  }
  func.func @transform_0(%arg0: i32) -> (i32, i32) {
    %c0_i32 = arith.constant 0 : i32
    %c0_i32_0 = arith.constant 0 : i32
    return %arg0, %c0_i32 : i32, i32
  }
  func.func @transform_1(%arg0: i32) -> (i32, i32) {
    %c0_i32 = arith.constant 0 : i32
    %c0_i32_0 = arith.constant 0 : i32
    return %arg0, %c0_i32 : i32, i32
  }
  func.func @transform_2(%arg0: i32) -> (i32, i32, i32) {
    %c0_i32 = arith.constant 0 : i32
    %c0_i32_0 = arith.constant 0 : i32
    %c0_i32_1 = arith.constant 0 : i32
    %c0_i32_2 = arith.constant 0 : i32
    return %c0_i32, %c0_i32_0, %c0_i32_1 : i32, i32, i32
  }
  func.func @transform_3(%arg0: i32) -> (i32, i32, i32) {
    %c0_i32 = arith.constant 0 : i32
    %c0_i32_0 = arith.constant 0 : i32
    %c0_i32_1 = arith.constant 0 : i32
    %c0_i32_2 = arith.constant 0 : i32
    return %c0_i32, %c0_i32_0, %c0_i32_1 : i32, i32, i32
  }
  func.func @transform_4(%arg0: i32) -> (i32, i32, i32) {
    %c0_i32 = arith.constant 0 : i32
    %c0_i32_0 = arith.constant 0 : i32
    %c0_i32_1 = arith.constant 0 : i32
    %c0_i32_2 = arith.constant 0 : i32
    return %c0_i32, %c0_i32_0, %c0_i32_1 : i32, i32, i32
  }
  func.func @transform_5(%arg0: i32) -> (i32, i32, i32) {
    %c0_i32 = arith.constant 0 : i32
    %c0_i32_0 = arith.constant 0 : i32
    %c0_i32_1 = arith.constant 0 : i32
    %c0_i32_2 = arith.constant 0 : i32
    return %c0_i32, %c0_i32_0, %c0_i32_1 : i32, i32, i32
  }
  func.func @transform_6(%arg0: i32) -> (i32, i32, i32) {
    %c0_i32 = arith.constant 0 : i32
    %c0_i32_0 = arith.constant 0 : i32
    %c0_i32_1 = arith.constant 0 : i32
    %c0_i32_2 = arith.constant 0 : i32
    return %c0_i32, %c0_i32_0, %c0_i32_1 : i32, i32, i32
  }
  func.func @transform_7(%arg0: i32) -> (i32, i32) {
    %c0_i32 = arith.constant 0 : i32
    %c0_i32_0 = arith.constant 0 : i32
    %c0_i32_1 = arith.constant 0 : i32
    return %c0_i32, %c0_i32_0 : i32, i32
  }
  func.func @transform_8(%arg0: i32) -> (i32, i32) {
    %c0_i32 = arith.constant 0 : i32
    %c0_i32_0 = arith.constant 0 : i32
    %c0_i32_1 = arith.constant 0 : i32
    return %c0_i32, %c0_i32_0 : i32, i32
  }
  func.func @transform_9(%arg0: i32) -> (i32, i32) {
    %c0_i32 = arith.constant 0 : i32
    %c0_i32_0 = arith.constant 0 : i32
    %c0_i32_1 = arith.constant 0 : i32
    return %c0_i32, %c0_i32_0 : i32, i32
  }
  func.func @transform_10(%arg0: i32) -> (i32, i32) {
    %c0_i32 = arith.constant 0 : i32
    %c0_i32_0 = arith.constant 0 : i32
    %c0_i32_1 = arith.constant 0 : i32
    return %c0_i32, %c0_i32_0 : i32, i32
  }
  func.func @transform_11(%arg0: i32) -> (i32, i32) {
    %c0_i32 = arith.constant 0 : i32
    %c0_i32_0 = arith.constant 0 : i32
    %c0_i32_1 = arith.constant 0 : i32
    return %c0_i32, %c0_i32_0 : i32, i32
  }
  func.func @transform_12(%arg0: i32) -> (i32, i32) {
    %c0_i32 = arith.constant 0 : i32
    %c0_i32_0 = arith.constant 0 : i32
    %c0_i32_1 = arith.constant 0 : i32
    return %c0_i32, %c0_i32_0 : i32, i32
  }
  func.func @transform_13(%arg0: i32) -> (i32, i32, i32) {
    %c0_i32 = arith.constant 0 : i32
    %c0_i32_0 = arith.constant 0 : i32
    %c0_i32_1 = arith.constant 0 : i32
    return %c0_i32, %arg0, %c0_i32_0 : i32, i32, i32
  }
}

</mosaic_0001>

<bundles_post_ra>
// kernel: tpu_custom_call.1
= control target key start
LH: loop header
LB: loop body
LE: loop exit
PB: predicated region body
PF: predicated region fallthrough
CT: control target
= control target key end

     0   :  { %v4587_v1 = vmov 0.0   ;;  %vm4588_vm0 = vmmov 0   ;;  %vm99_vm1 = vcmask 785408   ;;  %vm266_vm2 = vcmask 523264   ;;  %s5637_s0 = inlined_call_operand.vmem [shape: f32[8,96], index: 0, kind: input, shape index: {}]   ;;  %s5638_s1 = inlined_call_operand.vmem [shape: f32[8,64], index: 1, kind: input, shape index: {}]   ;;  %s5639_s2 = inlined_call_operand.vmem [shape: bf16[2,96,32], index: 2, kind: input, shape index: {}]   ;;  %s5640_s3 = inlined_call_operand.vmem [shape: bf16[4,64,32], index: 3, kind: input, shape index: {}]   ;;  %s5641_s4 = inlined_call_operand.vmem [shape: bf16[4,64,32], index: 4, kind: input, shape index: {}]   ;;  %s5642_s5 = inlined_call_operand.vmem [shape: bf16[5,32,32], index: 5, kind: input, shape index: {}]   ;;  %s5643_s6 = inlined_call_operand.vmem [shape: bf16[2,32,12], index: 6, kind: input, shape index: {}]   ;;  %s5644_s7 = inlined_call_operand.vmem [shape: f32[4,32], index: 7, kind: input, shape index: {}]   ;;  %s5645_s8 = inlined_call_operand.vmem [shape: f32[4,32], index: 8, kind: input, shape index: {}]   ;;  %s5646_s9 = inlined_call_operand.vmem [shape: f32[19,32], index: 9, kind: input, shape index: {}]   ;;  %s5647_s10 = inlined_call_operand.vmem [shape: f32[2,12], index: 10, kind: input, shape index: {}]   ;;  %s5648_s11 = inlined_call_operand.vmem [shape: f32[1,32], index: 11, kind: input, shape index: {}]   ;;  %s5649_s12 = inlined_call_operand.<no memory space> [shape: f32[1,1], index: 12, kind: input, shape index: {}]   ;;  %s5650_s13 = inlined_call_operand.hbm [shape: f32[4,8,128], index: 13, kind: output, shape index: {}]  }
   0x1   :  { %v4399_v0 = vld [vmem:[%s5639_s2] sm:$0xff]   ;;  %4041 = vmatprep.subr.bf16.mxu0 %v4587_v1  ;;  %4057 = vmatprep.subr.bf16.mxu1 %v4587_v1  ;;  %v4400_v2 = vld [vmem:[%s5639_s2 + $0x30] sm:$0xff]   ;;  %v4401_v3 = vld [vmem:[%s5639_s2 + $0x8] sm:$0xff]  }
   0x2   :  { %4042 = vmatpush3.bf16.msra.mxu0 %v4399_v0  ;;  %4053 = vmatprep.mubr.msk.bf16.mxu0 %vm4588_vm0, %v4587_v1  ;;  %v4402_v4 = vld [vmem:[%s5639_s2 + $0x38] sm:$0xff]   ;;  %v4403_v5 = vld [vmem:[%s5639_s2 + $0x10] sm:$0xff]   ;;  %v4404_v6 = vld [vmem:[%s5639_s2 + $0x40] sm:$0xff]  }
   0x3   :  { %4058 = vmatpush3.bf16.msra.mxu1 %v4400_v2  ;;  %4043 = vmatprep.subr.bf16.mxu0 %v4587_v1  ;;  %v4405_v7 = vld [vmem:[%s5639_s2 + $0x18] sm:$0xff]   ;;  %v4406_v8 = vld [vmem:[%s5639_s2 + $0x48] sm:$0xff]   ;;  %v4407_v9 = vld [vmem:[%s5639_s2 + $0x20] sm:$0xff]  }
   0x4   :  { %4059 = vmatprep.subr.bf16.mxu1 %v4587_v1  ;;  %4069 = vmatprep.mubr.msk.bf16.mxu1 %vm4588_vm0, %v4587_v1  ;;  %v4408_v10 = vld [vmem:[%s5639_s2 + $0x50] sm:$0xff]   ;;  %v4409_v11 = vld [vmem:[%s5639_s2 + $0x28] sm:$0xff]   ;;  %v47_v12 = vld [vmem:[%s5637_s0] sm:$0xff] }
   0x5   :  { %v4410_v13 = vld [vmem:[%s5639_s2 + $0x58] sm:$0xff]   ;;  %v4411_v14 = vld [vmem:[%s5640_s3] sm:$0xff]   ;;  %v48_v15 = vpack.c.bf16 %v47_v12, %v47_v12  ;;  %v4413_v17 = vld [vmem:[%s5640_s3 + $0x8] sm:$0xff]  }
   0x6   :  { %4044 = vmatpush3.bf16.msra.mxu0 %v4401_v3  ;;  %v4412_v16 = vld [vmem:[%s5641_s4] sm:$0xff]   ;;  %v4414_v18 = vld [vmem:[%s5641_s4 + $0x8] sm:$0xff]   ;;  %v4415_v19 = vld [vmem:[%s5640_s3 + $0x10] sm:$0xff]  }
   0x7   :  { %4060 = vmatpush3.bf16.msra.mxu1 %v4402_v4  ;;  %4045 = vmatprep.subr.bf16.mxu0 %v4587_v1  ;;  %v4416_v20 = vld [vmem:[%s5641_s4 + $0x10] sm:$0xff]   ;;  %v4417_v21 = vld [vmem:[%s5640_s3 + $0x18] sm:$0xff]   ;;  %v49_v22 = vld [vmem:[%s5638_s1] sm:$0xff] }
   0x8   :  { %4061 = vmatprep.subr.bf16.mxu1 %v4587_v1  ;;  %v4418_v23 = vld [vmem:[%s5641_s4 + $0x18] sm:$0xff]   ;;  %v4757_v24 = vpack.c.bf16 %v49_v22, %v49_v22 }
   0xa   :  { %4046 = vmatpush3.bf16.msra.mxu0 %v4403_v5 }
   0xb   :  { %4062 = vmatpush3.bf16.msra.mxu1 %v4404_v6  ;;  %4047 = vmatprep.subr.bf16.mxu0 %v4587_v1 }
   0xc   :  { %4063 = vmatprep.subr.bf16.mxu1 %v4587_v1 }
   0xe   :  { %4048 = vmatpush3.bf16.msra.mxu0 %v4405_v7 }
   0xf   :  { %4064 = vmatpush3.bf16.msra.mxu1 %v4406_v8  ;;  %4049 = vmatprep.subr.bf16.mxu0 %v4587_v1 }
  0x10   :  { %4065 = vmatprep.subr.bf16.mxu1 %v4587_v1 }
  0x12   :  { %4050 = vmatpush3.bf16.msra.mxu0 %v4407_v9 }
  0x13   :  { %4066 = vmatpush3.bf16.msra.mxu1 %v4408_v10  ;;  %4051 = vmatprep.subr.bf16.mxu0 %v4587_v1 }
  0x14   :  { %4067 = vmatprep.subr.bf16.mxu1 %v4587_v1 }
  0x16   :  { %4052 = vmatpush3.bf16.msra.mxu0 %v4409_v11 }
  0x17   :  { %4068 = vmatpush3.bf16.msra.mxu1 %v4410_v13  ;;  %4073 = vmatprep.subr.bf16.mxu0 %v4587_v1 }
  0x18   :  { %4085 = vmatprep.subr.bf16.mxu1 %v4587_v1 }
  0x19   :  { %4054 = vmatmul.mubr.msk.bf16.vlgmr.msra.gmra.mrb[0].mxu0 %vm99_vm1, %v48_v15 }
  0x1a   :  { %4070 = vmatmul.mubr.msk.bf16.vlgmr.msra.gmra.mrb[0].mxu1 %vm99_vm1, %v48_v15  ;;  %4074 = vmatpush3.bf16.msra.mxu0 %v4411_v14 }
  0x1b   :  { %4086 = vmatpush3.bf16.msra.mxu1 %v4412_v16  ;;  %4075 = vmatprep.subr.bf16.mxu0 %v4587_v1 }
  0x1c   :  { %4087 = vmatprep.subr.bf16.mxu1 %v4587_v1  ;;  %4081 = vmatprep.mubr.msk.bf16.mxu0 %vm4588_vm0, %v4587_v1 }
  0x1d   :  { %4093 = vmatprep.mubr.msk.bf16.mxu1 %vm4588_vm0, %v4587_v1 }
  0x1e   :  { %4076 = vmatpush3.bf16.msra.mxu0 %v4413_v17 }
  0x1f   :  { %4088 = vmatpush3.bf16.msra.mxu1 %v4414_v18  ;;  %4077 = vmatprep.subr.bf16.mxu0 %v4587_v1 }
  0x20   :  { %4089 = vmatprep.subr.bf16.mxu1 %v4587_v1 }
  0x22   :  { %4078 = vmatpush3.bf16.msra.mxu0 %v4415_v19 }
  0x23   :  { %4090 = vmatpush3.bf16.msra.mxu1 %v4416_v20  ;;  %4079 = vmatprep.subr.bf16.mxu0 %v4587_v1 }
  0x24   :  { %4091 = vmatprep.subr.bf16.mxu1 %v4587_v1 }
  0x26   :  { %4080 = vmatpush3.bf16.msra.mxu0 %v4417_v21 }
  0x27   :  { %4092 = vmatpush3.bf16.msra.mxu1 %v4418_v23  ;;  %4097 = vmatprep.subr.bf16.mxu0 %v4587_v1 }
  0x28   :  { %4105 = vmatprep.subr.bf16.mxu1 %v4587_v1 }
  0x29   :  { %4082 = vmatmul.mubr.msk.bf16.vlgmr.msra.gmra.mrb[4].mxu0 %vm266_vm2, %v4757_v24 }
  0x2a   :  { %4094 = vmatmul.mubr.msk.bf16.vlgmr.msra.gmra.mrb[4].mxu1 %vm266_vm2, %v4757_v24  ;;  %4101 = vmatprep.mubr.msk.bf16.mxu0 %vm4588_vm0, %v4587_v1 }
  0x2b   :  { %4109 = vmatprep.mubr.msk.bf16.mxu1 %vm4588_vm0, %v4587_v1 }
  0x2c   :  { %19 = vsyncpa [#allocation4], 0  ;;  %v3559_v34 = vld [vmem:[%s5644_s7] ss:$0 sm:$0xff]  ;;  %vm396_vm3 = vcmask 261120   ;;  %v4420_v60 = vld [vmem:[%s5642_s5 + $0x8] sm:$0xff]  }
  0x2d   :  { %v3565_v41 = vld [vmem:[%s5645_s8] ss:$0 sm:$0xff]  ;;  %v4801_v7 = vld [vmem:[%s5646_s9 + $0x1] ss:$0 sm:$0xff]  ;;  %v4807_v10 = vld [vmem:[%s5646_s9 + $0x8] ss:$0 sm:$0xff] }
  0x2e   :  { %v4419_v59 = vld [vmem:[%s5642_s5] sm:$0xff]   ;;  %v4813_v13 = vld [vmem:[%s5646_s9 + $0x9] ss:$0 sm:$0xff]  ;;  %vm1060_vm8 = vcmask 97280   ;;  %vm1062_vm9 = vcmask 195584   ;;  %vm1064_vm10 = vcmask 203776  }
  0x2f   :  { %4098 = vmatpush3.bf16.msra.mxu0 %v4419_v59  ;;  %v4796_v5 = vld [vmem:[%s5646_s9] ss:$0 sm:$0xff]  ;;  %v4422_v19 = vld [vmem:[%s5642_s5 + $0x28] sm:$0xff]   ;;  %v4834_v22 = vld [vmem:[%s5646_s9 + $0x2] ss:$0 sm:$0xff] }
  0x30   :  { %4099 = vmatprep.subr.bf16.mxu0 %v4587_v1  ;;  %v4421_v16 = vld [vmem:[%s5642_s5 + $0x20] sm:$0xff]  }
  0x33   :  { %4100 = vmatpush3.bf16.msra.mxu0 %v4420_v60  ;;  %v4863_v60 = vld [vmem:[%s5646_s9 + $0x4] ss:$0 sm:$0xff] }
  0x34   :  { %4113 = vmatprep.subr.bf16.mxu0 %v4587_v1 }
  0xec   :  { %v4769_v25 = vpop.f32.mrb[0].mxu0 }
  0xed   :  { %v4055_v26 = vpop.f32.mrb[1].mxu0  ;;  %v4771_v27 = vpop.f32.mrb[0].mxu1 }
  0xee   :  { %v140_v28 = vpop.f32.mrb[2].mxu0  ;;  %v4071_v29 = vpop.f32.mrb[1].mxu1 }
  0xef   :  { %v4056_v30 = vpop.f32.mrb[3].mxu0  ;;  %v229_v31 = vpop.f32.mrb[2].mxu1 }
  0xf0   :  { %v4072_v32 = vpop.f32.mrb[3].mxu1 }
  0xf1   :  { %v4841_v32 = vld [vmem:[%s5646_s9 + $0xa] ss:$0 sm:$0xff] }
  0xfc   :  { %v304_v33 = vpop.f32.mrb[4].mxu0 }
  0xfd   :  { %v310_v35 = vadd.f32 %v304_v33, %v4769_v25  ;;  %v383_v36 = vpop.f32.mrb[4].mxu1  ;;  %v4083_v37 = vpop.f32.mrb[5].mxu0 }
  0xfe   :  { %v389_v38 = vadd.f32 %v383_v36, %v4771_v27  ;;  %v307_v39 = vpop.f32.mrb[6].mxu0  ;;  %v4095_v40 = vpop.f32.mrb[5].mxu1 }
  0xff   :  { %v4084_v42 = vpop.f32.mrb[7].mxu0  ;;  %v316_v43 = vadd.f32 %v3559_v34, %v310_v35  ;;  %v386_v44 = vpop.f32.mrb[6].mxu1 }
 0x100   :  { %v4096_v45 = vpop.f32.mrb[7].mxu1  ;;  %v395_v47 = vadd.f32 %v3565_v41, %v389_v38 }
 0x101   :  { %v397_v46 = vsel %vm396_vm3, %v316_v43, 0.0 }
 0x102   :  { %398 = vadd.xlane.f32.xlu0 %v397_v46  ;;  %v619_v48 = vsel %vm396_vm3, %v395_v47, 0.0 }
 0x106   :  { %620 = vadd.xlane.f32.xlu0 %v619_v48 }
 0x18f   :  { %v399_v49 = vpop.xlane.xlu0 %398 }
 0x190   :  { %v401_v50 = vmul.f32 0.03125, %v399_v49  ;;  %v4423_v49 = vld [vmem:[%s5642_s5 + $0x10] sm:$0xff]  }
 0x191   :  { %4106 = vmatpush3.bf16.msra.mxu1 %v4423_v49 }
 0x192   :  { %v402_v51 = vsub.f32 %v316_v43, %v401_v50  ;;  %4107 = vmatprep.subr.bf16.mxu1 %v4587_v1  ;;  %v4424_v50 = vld [vmem:[%s5642_s5 + $0x18] sm:$0xff]  }
 0x193   :  { %v621_v52 = vpop.xlane.xlu0 %620 }
 0x194   :  { %v622_v53 = vmul.f32 0.03125, %v621_v52  ;;  %v403_v54 = vmul.f32 %v402_v51, %v402_v51 }
 0x195   :  { %4108 = vmatpush3.bf16.msra.mxu1 %v4424_v50 }
 0x196   :  { %v623_v55 = vsub.f32 %v395_v47, %v622_v53  ;;  %v404_v56 = vsel %vm396_vm3, %v403_v54, 0.0  ;;  %4121 = vmatprep.subr.bf16.mxu1 %v4587_v1 }
 0x197   :  { %405 = vadd.xlane.f32.xlu1 %v404_v56 }
 0x198   :  { %v624_v57 = vmul.f32 %v623_v55, %v623_v55 }
 0x19a   :  { %v625_v58 = vsel %vm396_vm3, %v624_v57, 0.0 }
 0x19b   :  { %626 = vadd.xlane.f32.xlu1 %v625_v58  ;;  %v4858_v58 = vld [vmem:[%s5646_s9 + $0x3] ss:$0 sm:$0xff] }
 0x224   :  { %v406_v61 = vpop.xlane.xlu1 %405 }
 0x225   :  { %v407_v62 = vmul.f32 0.03125, %v406_v61 }
 0x227   :  { %v408_v63 = vadd.f32 1e-05, %v407_v62 }
 0x228   :  { %v627_v0 = vpop.xlane.xlu1 %626 }
 0x229   :  { %4499 = vrsqrt.f32 %v408_v63  ;;  %v628_v2 = vmul.f32 0.03125, %v627_v0 }
 0x22b   :  { %v629_v3 = vadd.f32 1e-05, %v628_v2  ;;  %v4870_v2 = vld [vmem:[%s5646_s9 + $0xb] ss:$0 sm:$0xff] }
 0x22d   :  { %4501 = vrsqrt.f32 %v629_v3  ;;  %v4425_v3 = vld [vmem:[%s5642_s5 + $0x30] sm:$0xff]  }
 0x233   :  { %v4500_v4 = vpop.eup %4499 }
 0x234   :  { %v410_v6 = vmul.f32 %v4500_v4, %v402_v51 }
 0x236   :  { %v416_v8 = vmul.f32 %v4796_v5, %v410_v6 }
 0x237   :  { %v4502_v9 = vpop.eup %4501 }
 0x238   :  { %v631_v11 = vmul.f32 %v4502_v9, %v623_v55  ;;  %v422_v12 = vadd.f32 %v4801_v7, %v416_v8  ;;  %v4878_v8 = vld [vmem:[%s5646_s9 + $0xc] ss:$0 sm:$0xff] }
 0x23a   :  { %v637_v14 = vmul.f32 %v4807_v10, %v631_v11  ;;  %v423_v15 = vmax.f32 %v422_v12, 0.0  ;;  %v4426_v11 = vld [vmem:[%s5642_s5 + $0x38] sm:$0xff]  }
 0x23c   :  { %v428_v17 = vpack.c.bf16 %v423_v15, %v423_v15  ;;  %v643_v18 = vadd.f32 %v4813_v13, %v637_v14  ;;  %v4427_v15 = vld [vmem:[%s5642_s5 + $0x40] sm:$0xff]  }
 0x23e   :  { %4102 = vmatmul.mubr.msk.bf16.vlgmr.msra.gmra.mrb[8].mxu0 %vm396_vm3, %v428_v17  ;;  %v644_v20 = vmax.f32 %v643_v18, 0.0  ;;  %v4428_v17 = vld [vmem:[%s5642_s5 + $0x48] sm:$0xff]   ;;  %v4429_v18 = vld [vmem:[%s5640_s3 + $0x20] sm:$0xff]  }
 0x23f   :  { %4114 = vmatpush3.bf16.msra.mxu0 %v4421_v16  ;;  %4117 = vmatprep.mubr.msk.bf16.mxu0 %vm4588_vm0, %v4587_v1 }
 0x240   :  { %4115 = vmatprep.subr.bf16.mxu0 %v4587_v1  ;;  %v650_v21 = vpack.c.bf16 %v644_v20, %v644_v20  ;;  %v4431_v20 = vld [vmem:[%s5640_s3 + $0x30] sm:$0xff]  }
 0x243   :  { %4116 = vmatpush3.bf16.msra.mxu0 %v4422_v19  ;;  %v4430_v19 = vld [vmem:[%s5640_s3 + $0x28] sm:$0xff]  }
 0x244   :  { %4129 = vmatprep.subr.bf16.mxu0 %v4587_v1 }
 0x246   :  { %4118 = vmatmul.mubr.msk.bf16.vlgmr.msra.gmra.mrb[12].mxu0 %vm396_vm3, %v650_v21  ;;  %v4432_v21 = vld [vmem:[%s5640_s3 + $0x38] sm:$0xff]  }
 0x247   :  { %4133 = vmatprep.mubr.msk.bf16.mxu0 %vm4588_vm0, %v4587_v1 }
 0x311   :  { %v483_v23 = vpop.f32.mrb[8].mxu0 }
 0x312   :  { %v484_v26 = vadd.f32 %v4834_v22, %v483_v23  ;;  %v4103_v28 = vpop.f32.mrb[9].mxu0 }
 0x313   :  { %v486_v29 = vpop.f32.mrb[10].mxu0 }
 0x314   :  { %v4104_v30 = vpop.f32.mrb[11].mxu0  ;;  %v489_v31 = vsel %vm396_vm3, %v484_v26, 0.0 }
 0x315   :  { %490 = vadd.xlane.f32.xlu0 %v489_v31  ;;  %v4929_v30 = vld [vmem:[%s5646_s9 + $0xd] ss:$0 sm:$0xff] }
 0x319   :  { %v705_v33 = vpop.f32.mrb[12].mxu0 }
 0x31a   :  { %v706_v34 = vadd.f32 %v4841_v32, %v705_v33  ;;  %v4119_v35 = vpop.f32.mrb[13].mxu0 }
 0x31b   :  { %v708_v36 = vpop.f32.mrb[14].mxu0 }
 0x31c   :  { %v4120_v37 = vpop.f32.mrb[15].mxu0  ;;  %v711_v38 = vsel %vm396_vm3, %v706_v34, 0.0 }
 0x31d   :  { %712 = vadd.xlane.f32.xlu1 %v711_v38  ;;  %v4936_v38 = vld [vmem:[%s5646_s9 + $0x10] ss:$0 sm:$0xff] }
 0x3a2   :  { %v491_v39 = vpop.xlane.xlu0 %490 }
 0x3a3   :  { %v492_v40 = vmul.f32 0.03125, %v491_v39 }
 0x3a5   :  { %v493_v41 = vsub.f32 %v484_v26, %v492_v40 }
 0x3a7   :  { %v494_v42 = vmul.f32 %v493_v41, %v493_v41 }
 0x3a9   :  { %v495_v43 = vsel %vm396_vm3, %v494_v42, 0.0 }
 0x3aa   :  { %496 = vadd.xlane.f32.xlu0 %v495_v43  ;;  %v713_v44 = vpop.xlane.xlu1 %712 }
 0x3ab   :  { %v714_v45 = vmul.f32 0.03125, %v713_v44 }
 0x3ad   :  { %v715_v46 = vsub.f32 %v706_v34, %v714_v45 }
 0x3af   :  { %v716_v47 = vmul.f32 %v715_v46, %v715_v46 }
 0x3b1   :  { %v717_v48 = vsel %vm396_vm3, %v716_v47, 0.0 }
 0x3b2   :  { %718 = vadd.xlane.f32.xlu1 %v717_v48 }
 0x437   :  { %v497_v51 = vpop.xlane.xlu0 %496 }
 0x438   :  { %v498_v52 = vmul.f32 0.03125, %v497_v51 }
 0x43a   :  { %v499_v53 = vadd.f32 1e-05, %v498_v52 }
 0x43c   :  { %4503 = vrsqrt.f32 %v499_v53  ;;  %v3643_v53 = vld [vmem:[%s5644_s7 + $0x1] ss:$0 sm:$0xff] }
 0x43f   :  { %v719_v54 = vpop.xlane.xlu1 %718 }
 0x440   :  { %v720_v55 = vmul.f32 0.03125, %v719_v54 }
 0x442   :  { %v721_v56 = vadd.f32 1e-05, %v720_v55 }
 0x444   :  { %4505 = vrsqrt.f32 %v721_v56 }
 0x446   :  { %v4504_v57 = vpop.eup %4503 }
 0x447   :  { %v501_v59 = vmul.f32 %v4504_v57, %v493_v41 }
 0x449   :  { %v507_v61 = vmul.f32 %v4858_v58, %v501_v59 }
 0x44b   :  { %v513_v62 = vadd.f32 %v4863_v60, %v507_v61 }
 0x44d   :  { %v514_v63 = vmax.f32 %v513_v62, 0.0 }
 0x44e   :  { %v4506_v0 = vpop.eup %4505 }
 0x44f   :  { %v723_v4 = vmul.f32 %v4506_v0, %v715_v46  ;;  %v520_v6 = vpack.c.bf16 %v514_v63, %v514_v63 }
 0x451   :  { %v729_v9 = vmul.f32 %v4870_v2, %v723_v4  ;;  %4110 = vmatmul.mubr.msk.bf16.vlgmr.msra.gmra.mrb[8].mxu1 %vm396_vm3, %v520_v6  ;;  %v4434_v4 = vld [vmem:[%s5643_s6 + $0x8] sm:$0xff]  }
 0x452   :  { %4122 = vmatpush3.bf16.msra.mxu1 %v4425_v3  ;;  %4125 = vmatprep.mubr.msk.bf16.mxu1 %vm4588_vm0, %v4587_v1  ;;  %v4433_v3 = vld [vmem:[%s5643_s6] sm:$0xff]  }
 0x453   :  { %4123 = vmatprep.subr.bf16.mxu1 %v4587_v1  ;;  %v735_v12 = vadd.f32 %v4878_v8, %v729_v9  ;;  %4130 = vmatpush3.bf16.msra.mxu0 %v4433_v3 }
 0x454   :  { %4131 = vmatprep.subr.bf16.mxu0 %v4587_v1 }
 0x455   :  { %v736_v14 = vmax.f32 %v735_v12, 0.0 }
 0x456   :  { %4124 = vmatpush3.bf16.msra.mxu1 %v4426_v11 }
 0x457   :  { %4137 = vmatprep.subr.bf16.mxu1 %v4587_v1  ;;  %v742_v16 = vpack.c.bf16 %v736_v14, %v736_v14  ;;  %4132 = vmatpush3.bf16.msra.mxu0 %v4434_v4 }
 0x458   :  { %4145 = vmatprep.subr.bf16.mxu0 %v4587_v1 }
 0x459   :  { %4126 = vmatmul.mubr.msk.bf16.vlgmr.msra.gmra.mrb[12].mxu1 %vm396_vm3, %v742_v16 }
 0x45a   :  { %4138 = vmatpush3.bf16.msra.mxu1 %v4427_v15  ;;  %4141 = vmatprep.mubr.msk.bf16.mxu1 %vm4588_vm0, %v4587_v1 }
 0x45b   :  { %4139 = vmatprep.subr.bf16.mxu1 %v4587_v1 }
 0x45e   :  { %4140 = vmatpush3.bf16.msra.mxu1 %v4428_v17 }
 0x45f   :  { %4153 = vmatprep.subr.bf16.mxu1 %v4587_v1 }
 0x461   :  { %4142 = vmatmul.mubr.msk.bf16.vlgmr.msra.gmra.mrb[16].mxu1 %vm396_vm3, %v742_v16 }
 0x462   :  { %4154 = vmatpush3.bf16.msra.mxu1 %v4429_v18  ;;  %4161 = vmatprep.mubr.msk.bf16.mxu1 %vm4588_vm0, %v4587_v1 }
 0x463   :  { %4155 = vmatprep.subr.bf16.mxu1 %v4587_v1 }
 0x466   :  { %4156 = vmatpush3.bf16.msra.mxu1 %v4430_v19 }
 0x467   :  { %4157 = vmatprep.subr.bf16.mxu1 %v4587_v1 }
 0x46a   :  { %4158 = vmatpush3.bf16.msra.mxu1 %v4431_v20 }
 0x46b   :  { %4159 = vmatprep.subr.bf16.mxu1 %v4587_v1 }
 0x46e   :  { %4160 = vmatpush3.bf16.msra.mxu1 %v4432_v21 }
 0x46f   :  { %4177 = vmatprep.subr.bf16.mxu1 %v4587_v1 }
 0x471   :  { %4162 = vmatmul.mubr.msk.bf16.vlgmr.msra.gmra.mrb[20].mxu1 %vm266_vm2, %v4757_v24 }
 0x472   :  { %4181 = vmatprep.mubr.msk.bf16.mxu1 %vm4588_vm0, %v4587_v1 }
 0x524   :  { %v4924_v23 = vpop.f32.mrb[8].mxu1 }
 0x525   :  { %v4111_v26 = vpop.f32.mrb[9].mxu1 }
 0x526   :  { %v578_v28 = vpop.f32.mrb[10].mxu1  ;;  %v4959_v26 = vld [vmem:[%s5646_s9 + $0xe] ss:$0 sm:$0xff] }
 0x527   :  { %v4112_v29 = vpop.f32.mrb[11].mxu1 }
 0x528   :  { %v4964_v29 = vld [vmem:[%s5646_s9 + $0xf] ss:$0 sm:$0xff] }
 0x52c   :  { %v797_v31 = vpop.f32.mrb[12].mxu1 }
 0x52d   :  { %v798_v33 = vadd.f32 %v4929_v30, %v797_v31  ;;  %v4127_v34 = vpop.f32.mrb[13].mxu1 }
 0x52e   :  { %v800_v35 = vpop.f32.mrb[14].mxu1 }
 0x52f   :  { %v4128_v36 = vpop.f32.mrb[15].mxu1  ;;  %v803_v37 = vsel %vm396_vm3, %v798_v33, 0.0 }
 0x530   :  { %804 = vadd.xlane.f32.xlu0 %v803_v37  ;;  %v4971_v36 = vld [vmem:[%s5646_s9 + $0x11] ss:$0 sm:$0xff] }
 0x531   :  { %v4435_v37 = vld [vmem:[%s5643_s6 + $0x10] sm:$0xff]  }
 0x534   :  { %v950_v39 = vpop.f32.mrb[16].mxu1 }
 0x535   :  { %v951_v40 = vadd.f32 %v4936_v38, %v950_v39  ;;  %v4143_v41 = vpop.f32.mrb[17].mxu1 }
 0x536   :  { %v953_v42 = vpop.f32.mrb[18].mxu1  ;;  %v4979_v41 = vld [vmem:[%s5646_s9 + $0x12] ss:$0 sm:$0xff] }
 0x537   :  { %v4144_v43 = vpop.f32.mrb[19].mxu1  ;;  %v956_v44 = vsel %vm396_vm3, %v951_v40, 0.0 }
 0x538   :  { %957 = vadd.xlane.f32.xlu1 %v956_v44  ;;  %v4436_v43 = vld [vmem:[%s5643_s6 + $0x18] sm:$0xff]  }
 0x544   :  { %v1134_v45 = vpop.f32.mrb[20].mxu1 }
 0x545   :  { %v1140_v46 = vadd.f32 %v1134_v45, %v4769_v25  ;;  %v4163_v47 = vpop.f32.mrb[21].mxu1 }
 0x546   :  { %v1137_v48 = vpop.f32.mrb[22].mxu1 }
 0x547   :  { %v4164_v49 = vpop.f32.mrb[23].mxu1  ;;  %v1146_v56 = vadd.f32 %v3643_v53, %v1140_v46  ;;  %v4437_v46 = vld [vmem:[%s5641_s4 + $0x20] sm:$0xff]   ;;  %v4438_v48 = vld [vmem:[%s5641_s4 + $0x28] sm:$0xff]  }
 0x548   :  { %v4439_v49 = vld [vmem:[%s5641_s4 + $0x30] sm:$0xff]  }
 0x549   :  { %v1227_v62 = vsel %vm396_vm3, %v1146_v56, 0.0 }
 0x5bd   :  { %v805_v50 = vpop.xlane.xlu0 %804 }
 0x5be   :  { %v806_v51 = vmul.f32 0.03125, %v805_v50  ;;  %v4440_v50 = vld [vmem:[%s5641_s4 + $0x38] sm:$0xff]  }
 0x5c0   :  { %v807_v52 = vsub.f32 %v798_v33, %v806_v51  ;;  %v4441_v51 = vld [vmem:[%s5642_s5] sm:$0xff]  }
 0x5c1   :  { %4178 = vmatpush3.bf16.msra.mxu1 %v4441_v51 }
 0x5c2   :  { %v808_v54 = vmul.f32 %v807_v52, %v807_v52  ;;  %4179 = vmatprep.subr.bf16.mxu1 %v4587_v1 }
 0x5c4   :  { %v809_v55 = vsel %vm396_vm3, %v808_v54, 0.0 }
 0x5c5   :  { %810 = vadd.xlane.f32.xlu0 %v809_v55  ;;  %v958_v57 = vpop.xlane.xlu1 %957 }
 0x5c6   :  { %v959_v59 = vmul.f32 0.03125, %v958_v57 }
 0x5c8   :  { %v960_v61 = vsub.f32 %v951_v40, %v959_v59 }
 0x5c9   :  { %1228 = vadd.xlane.f32.xlu0 %v1227_v62 }
 0x5ca   :  { %v961_v63 = vmul.f32 %v960_v61, %v960_v61 }
 0x5cc   :  { %v962_v0 = vsel %vm396_vm3, %v961_v63, 0.0 }
 0x5cd   :  { %963 = vadd.xlane.f32.xlu1 %v962_v0 }
 0x652   :  { %v811_v6 = vpop.xlane.xlu0 %810 }
 0x653   :  { %v812_v9 = vmul.f32 0.03125, %v811_v6 }
 0x655   :  { %v813_v11 = vadd.f32 1e-05, %v812_v9 }
 0x656   :  { %v1229_v12 = vpop.xlane.xlu0 %1228 }
 0x657   :  { %4507 = vrsqrt.f32 %v813_v11  ;;  %v1230_v14 = vmul.f32 0.03125, %v1229_v12 }
 0x659   :  { %v1231_v15 = vsub.f32 %v1146_v56, %v1230_v14 }
 0x65a   :  { %v964_v16 = vpop.xlane.xlu1 %963 }
 0x65b   :  { %v965_v17 = vmul.f32 0.03125, %v964_v16  ;;  %v1232_v18 = vmul.f32 %v1231_v15, %v1231_v15 }
 0x65d   :  { %v966_v19 = vadd.f32 1e-05, %v965_v17  ;;  %v1233_v20 = vsel %vm396_vm3, %v1232_v18, 0.0 }
 0x65e   :  { %1234 = vadd.xlane.f32.xlu0 %v1233_v20 }
 0x65f   :  { %4509 = vrsqrt.f32 %v966_v19 }
 0x661   :  { %v4508_v21 = vpop.eup %4507 }
 0x662   :  { %v815_v28 = vmul.f32 %v4508_v21, %v807_v52  ;;  %v4442_v52 = vld [vmem:[%s5642_s5 + $0x8] sm:$0xff]  }
 0x663   :  { %4180 = vmatpush3.bf16.msra.mxu1 %v4442_v52 }
 0x664   :  { %v821_v31 = vmul.f32 %v4959_v26, %v815_v28  ;;  %4193 = vmatprep.subr.bf16.mxu1 %v4587_v1 }
 0x666   :  { %v827_v33 = vadd.f32 %v4964_v29, %v821_v31 }
 0x668   :  { %v828_v34 = vmax.f32 %v827_v33, 0.0 }
 0x669   :  { %v4510_v35 = vpop.eup %4509 }
 0x66a   :  { %v968_v39 = vmul.f32 %v4510_v35, %v960_v61  ;;  %v833_v40 = vpack.c.bf16 %v828_v34, %v828_v34 }
 0x66c   :  { %v974_v42 = vmul.f32 %v4971_v36, %v968_v39  ;;  %4134 = vmatmul.mubr.msk.bf16.vlgmr.msra.gmra.mrb[16].mxu0 %vm396_vm3, %v833_v40 }
 0x66d   :  { %4146 = vmatpush3.bf16.msra.mxu0 %v4435_v37  ;;  %4149 = vmatprep.mubr.msk.bf16.mxu0 %vm4588_vm0, %v4587_v1 }
 0x66e   :  { %4147 = vmatprep.subr.bf16.mxu0 %v4587_v1  ;;  %v980_v44 = vadd.f32 %v4979_v41, %v974_v42 }
 0x670   :  { %v981_v45 = vmax.f32 %v980_v44, 0.0  ;;  %v4443_v44 = vld [vmem:[%s5642_s5 + $0x20] sm:$0xff]  }
 0x671   :  { %4148 = vmatpush3.bf16.msra.mxu0 %v4436_v43 }
 0x672   :  { %4165 = vmatprep.subr.bf16.mxu0 %v4587_v1  ;;  %v987_v47 = vpack.c.bf16 %v981_v45, %v981_v45 }
 0x674   :  { %4150 = vmatmul.mubr.msk.bf16.vlgmr.msra.gmra.mrb[20].mxu0 %vm396_vm3, %v987_v47 }
 0x675   :  { %4166 = vmatpush3.bf16.msra.mxu0 %v4437_v46  ;;  %4173 = vmatprep.mubr.msk.bf16.mxu0 %vm4588_vm0, %v4587_v1 }
 0x676   :  { %4167 = vmatprep.subr.bf16.mxu0 %v4587_v1 }
 0x679   :  { %4168 = vmatpush3.bf16.msra.mxu0 %v4438_v48 }
 0x67a   :  { %4169 = vmatprep.subr.bf16.mxu0 %v4587_v1 }
 0x67d   :  { %4170 = vmatpush3.bf16.msra.mxu0 %v4439_v49 }
 0x67e   :  { %4171 = vmatprep.subr.bf16.mxu0 %v4587_v1 }
 0x681   :  { %4172 = vmatpush3.bf16.msra.mxu0 %v4440_v50 }
 0x682   :  { %4185 = vmatprep.subr.bf16.mxu0 %v4587_v1 }
 0x684   :  { %4174 = vmatmul.mubr.msk.bf16.vlgmr.msra.gmra.mrb[24].mxu0 %vm266_vm2, %v4757_v24 }
 0x685   :  { %4189 = vmatprep.mubr.msk.bf16.mxu0 %vm4588_vm0, %v4587_v1 }
 0x6eb   :  { %v1235_v53 = vpop.xlane.xlu0 %1234 }
 0x6ec   :  { %v1236_v54 = vmul.f32 0.03125, %v1235_v53 }
 0x6ee   :  { %v1237_v55 = vadd.f32 1e-05, %v1236_v54 }
 0x6f0   :  { %4511 = vrsqrt.f32 %v1237_v55  ;;  %v4445_v55 = vld [vmem:[%s5642_s5 + $0x10] sm:$0xff]  }
 0x6f1   :  { %4186 = vmatpush3.bf16.msra.mxu0 %v4445_v55 }
 0x6f2   :  { %4187 = vmatprep.subr.bf16.mxu0 %v4587_v1 }
 0x6fa   :  { %v4512_v56 = vpop.eup %4511 }
 0x6fb   :  { %v1239_v57 = vmul.f32 %v4512_v56, %v1231_v15 }
 0x6fd   :  { %v1245_v59 = vmul.f32 %v4796_v5, %v1239_v57  ;;  %v4446_v57 = vld [vmem:[%s5642_s5 + $0x18] sm:$0xff]  }
 0x6fe   :  { %4188 = vmatpush3.bf16.msra.mxu0 %v4446_v57 }
 0x6ff   :  { %v1251_v61 = vadd.f32 %v4801_v7, %v1245_v59  ;;  %v3657_v7 = vld [vmem:[%s5645_s8 + $0x1] ss:$0 sm:$0xff]  ;;  %4201 = vmatprep.subr.bf16.mxu0 %v4587_v1 }
 0x701   :  { %v1252_v62 = vmax.f32 %v1251_v61, 0.0 }
 0x703   :  { %v1257_v63 = vpack.c.bf16 %v1252_v62, %v1252_v62 }
 0x705   :  { %4182 = vmatmul.mubr.msk.bf16.vlgmr.msra.gmra.mrb[24].mxu1 %vm396_vm3, %v1257_v63 }
 0x706   :  { %4197 = vmatprep.mubr.msk.bf16.mxu1 %vm4588_vm0, %v4587_v1  ;;  %4194 = vmatpush3.bf16.msra.mxu1 %v4443_v44 }
 0x707   :  { %4195 = vmatprep.subr.bf16.mxu1 %v4587_v1 }
 0x73f   :  { %v5027_v0 = vpop.f32.mrb[16].mxu0 }
 0x740   :  { %v4135_v3 = vpop.f32.mrb[17].mxu0 }
 0x741   :  { %v891_v4 = vpop.f32.mrb[18].mxu0 }
 0x742   :  { %v4136_v6 = vpop.f32.mrb[19].mxu0 }
 0x747   :  { %v5029_v9 = vpop.f32.mrb[20].mxu0 }
 0x748   :  { %v4151_v11 = vpop.f32.mrb[21].mxu0 }
 0x749   :  { %v1045_v12 = vpop.f32.mrb[22].mxu0 }
 0x74a   :  { %v4152_v14 = vpop.f32.mrb[23].mxu0 }
 0x757   :  { %v1214_v5 = vpop.f32.mrb[24].mxu0 }
 0x758   :  { %v1220_v15 = vadd.f32 %v1214_v5, %v4771_v27  ;;  %v4175_v16 = vpop.f32.mrb[25].mxu0 }
 0x759   :  { %v1217_v17 = vpop.f32.mrb[26].mxu0 }
 0x75a   :  { %v4176_v18 = vpop.f32.mrb[27].mxu0  ;;  %v1226_v19 = vadd.f32 %v3657_v7, %v1220_v15 }
 0x75c   :  { %v1440_v20 = vsel %vm396_vm3, %v1226_v19, 0.0 }
 0x75d   :  { %1441 = vadd.xlane.f32.xlu1 %v1440_v20 }
 0x7d8   :  { %v1312_v21 = vpop.f32.mrb[24].mxu1 }
 0x7d9   :  { %v1313_v28 = vadd.f32 %v4834_v22, %v1312_v21  ;;  %v4183_v31 = vpop.f32.mrb[25].mxu1  ;;  %v4444_v22 = vld [vmem:[%s5642_s5 + $0x28] sm:$0xff]  }
 0x7da   :  { %v1315_v33 = vpop.f32.mrb[26].mxu1  ;;  %4196 = vmatpush3.bf16.msra.mxu1 %v4444_v22 }
 0x7db   :  { %v4184_v34 = vpop.f32.mrb[27].mxu1  ;;  %v1318_v35 = vsel %vm396_vm3, %v1313_v28, 0.0  ;;  %4209 = vmatprep.subr.bf16.mxu1 %v4587_v1 }
 0x7dc   :  { %1319 = vadd.xlane.f32.xlu0 %v1318_v35  ;;  %v4448_v35 = vld [vmem:[%s5642_s5 + $0x38] sm:$0xff]  }
 0x7ea   :  { %v1442_v37 = vpop.xlane.xlu1 %1441 }
 0x7eb   :  { %v1443_v39 = vmul.f32 0.03125, %v1442_v37 }
 0x7ed   :  { %v1444_v40 = vsub.f32 %v1226_v19, %v1443_v39 }
 0x7ef   :  { %v1445_v42 = vmul.f32 %v1444_v40, %v1444_v40 }
 0x7f1   :  { %v1446_v43 = vsel %vm396_vm3, %v1445_v42, 0.0 }
 0x7f2   :  { %1447 = vadd.xlane.f32.xlu1 %v1446_v43 }
 0x869   :  { %v1320_v45 = vpop.xlane.xlu0 %1319 }
 0x86a   :  { %v1321_v46 = vmul.f32 0.03125, %v1320_v45 }
 0x86c   :  { %v1322_v47 = vsub.f32 %v1313_v28, %v1321_v46  ;;  %v4449_v46 = vld [vmem:[%s5642_s5 + $0x40] sm:$0xff]  }
 0x86e   :  { %v1323_v48 = vmul.f32 %v1322_v47, %v1322_v47 }
 0x870   :  { %v1324_v49 = vsel %vm396_vm3, %v1323_v48, 0.0  ;;  %v4450_v48 = vld [vmem:[%s5642_s5 + $0x48] sm:$0xff]  }
 0x871   :  { %1325 = vadd.xlane.f32.xlu0 %v1324_v49  ;;  %v4453_v49 = vld [vmem:[%s5640_s3 + $0x50] sm:$0xff]  }
 0x87f   :  { %v1448_v50 = vpop.xlane.xlu1 %1447 }
 0x880   :  { %v1449_v51 = vmul.f32 0.03125, %v1448_v50  ;;  %v4454_v50 = vld [vmem:[%s5640_s3 + $0x58] sm:$0xff]  }
 0x882   :  { %v1450_v52 = vadd.f32 1e-05, %v1449_v51 }
 0x884   :  { %4513 = vrsqrt.f32 %v1450_v52 }
 0x88e   :  { %v4514_v53 = vpop.eup %4513 }
 0x88f   :  { %v1452_v54 = vmul.f32 %v4514_v53, %v1444_v40 }
 0x891   :  { %v1458_v56 = vmul.f32 %v4807_v10, %v1452_v54 }
 0x893   :  { %v1464_v59 = vadd.f32 %v4813_v13, %v1458_v56 }
 0x895   :  { %v1465_v61 = vmax.f32 %v1464_v59, 0.0 }
 0x897   :  { %v1470_v62 = vpack.c.bf16 %v1465_v61, %v1465_v61 }
 0x899   :  { %4198 = vmatmul.mubr.msk.bf16.vlgmr.msra.gmra.mrb[28].mxu1 %vm396_vm3, %v1470_v62 }
 0x89a   :  { %4213 = vmatprep.mubr.msk.bf16.mxu1 %vm4588_vm0, %v4587_v1 }
 0x8fe   :  { %v1326_v10 = vpop.xlane.xlu0 %1325 }
 0x8ff   :  { %v1327_v63 = vmul.f32 0.03125, %v1326_v10 }
 0x901   :  { %v1328_v3 = vadd.f32 1e-05, %v1327_v63 }
 0x903   :  { %4515 = vrsqrt.f32 %v1328_v3 }
 0x90d   :  { %v4516_v4 = vpop.eup %4515 }
 0x90e   :  { %v1330_v6 = vmul.f32 %v4516_v4, %v1322_v47 }
 0x910   :  { %v1336_v13 = vmul.f32 %v4858_v58, %v1330_v6 }
 0x912   :  { %v1342_v11 = vadd.f32 %v4863_v60, %v1336_v13 }
 0x914   :  { %v1343_v12 = vmax.f32 %v1342_v11, 0.0 }
 0x916   :  { %v1348_v14 = vpack.c.bf16 %v1343_v12, %v1343_v12 }
 0x918   :  { %4190 = vmatmul.mubr.msk.bf16.vlgmr.msra.gmra.mrb[28].mxu0 %vm396_vm3, %v1348_v14 }
 0x919   :  { %4205 = vmatprep.mubr.msk.bf16.mxu0 %vm4588_vm0, %v4587_v1 }
 0x96c   :  { %v1525_v5 = vpop.f32.mrb[28].mxu1 }
 0x96d   :  { %v1526_v7 = vadd.f32 %v4841_v32, %v1525_v5  ;;  %v4199_v15 = vpop.f32.mrb[29].mxu1  ;;  %v4447_v32 = vld [vmem:[%s5642_s5 + $0x30] sm:$0xff]   ;;  %v3734_v5 = vld [vmem:[%s5644_s7 + $0x2] ss:$0 sm:$0xff] }
 0x96e   :  { %v1528_v16 = vpop.f32.mrb[30].mxu1  ;;  %4202 = vmatpush3.bf16.msra.mxu0 %v4447_v32 }
 0x96f   :  { %v4200_v17 = vpop.f32.mrb[31].mxu1  ;;  %v1531_v18 = vsel %vm396_vm3, %v1526_v7, 0.0  ;;  %4203 = vmatprep.subr.bf16.mxu0 %v4587_v1 }
 0x970   :  { %1532 = vadd.xlane.f32.xlu1 %v1531_v18 }
 0x972   :  { %4204 = vmatpush3.bf16.msra.mxu0 %v4448_v35 }
 0x973   :  { %4217 = vmatprep.subr.bf16.mxu0 %v4587_v1 }
 0x9eb   :  { %v5068_v19 = vpop.f32.mrb[28].mxu0 }
 0x9ec   :  { %v4191_v58 = vpop.f32.mrb[29].mxu0 }
 0x9ed   :  { %v1406_v60 = vpop.f32.mrb[30].mxu0 }
 0x9ee   :  { %v4192_v20 = vpop.f32.mrb[31].mxu0 }
 0x9fd   :  { %v1533_v21 = vpop.xlane.xlu1 %1532 }
 0x9fe   :  { %v1534_v28 = vmul.f32 0.03125, %v1533_v21  ;;  %v4455_v21 = vld [vmem:[%s5643_s6] sm:$0xff]  }
 0x9ff   :  { %4210 = vmatpush3.bf16.msra.mxu1 %v4455_v21 }
 0xa00   :  { %v1535_v31 = vsub.f32 %v1526_v7, %v1534_v28  ;;  %4211 = vmatprep.subr.bf16.mxu1 %v4587_v1  ;;  %v4456_v28 = vld [vmem:[%s5643_s6 + $0x8] sm:$0xff]  }
 0xa02   :  { %v1536_v33 = vmul.f32 %v1535_v31, %v1535_v31 }
 0xa03   :  { %4212 = vmatpush3.bf16.msra.mxu1 %v4456_v28 }
 0xa04   :  { %v1537_v34 = vsel %vm396_vm3, %v1536_v33, 0.0  ;;  %4225 = vmatprep.subr.bf16.mxu1 %v4587_v1 }
 0xa05   :  { %1538 = vadd.xlane.f32.xlu1 %v1537_v34 }
 0xa92   :  { %v1539_v37 = vpop.xlane.xlu1 %1538 }
 0xa93   :  { %v1540_v39 = vmul.f32 0.03125, %v1539_v37 }
 0xa95   :  { %v1541_v40 = vadd.f32 1e-05, %v1540_v39 }
 0xa97   :  { %4517 = vrsqrt.f32 %v1541_v40 }
 0xaa1   :  { %v4518_v42 = vpop.eup %4517 }
 0xaa2   :  { %v1543_v43 = vmul.f32 %v4518_v42, %v1535_v31 }
 0xaa4   :  { %v1549_v44 = vmul.f32 %v4870_v2, %v1543_v43  ;;  %v4451_v2 = vld [vmem:[%s5640_s3 + $0x40] sm:$0xff]  }
 0xaa6   :  { %v1555_v22 = vadd.f32 %v4878_v8, %v1549_v44  ;;  %v4452_v8 = vld [vmem:[%s5640_s3 + $0x48] sm:$0xff]  }
 0xaa8   :  { %v1556_v45 = vmax.f32 %v1555_v22, 0.0 }
 0xaaa   :  { %v1561_v47 = vpack.c.bf16 %v1556_v45, %v1556_v45 }
 0xaac   :  { %4206 = vmatmul.mubr.msk.bf16.vlgmr.msra.gmra.mrb[32].mxu0 %vm396_vm3, %v1561_v47 }
 0xaad   :  { %4218 = vmatpush3.bf16.msra.mxu0 %v4449_v46  ;;  %4221 = vmatprep.mubr.msk.bf16.mxu0 %vm4588_vm0, %v4587_v1 }
 0xaae   :  { %4219 = vmatprep.subr.bf16.mxu0 %v4587_v1 }
 0xab1   :  { %4220 = vmatpush3.bf16.msra.mxu0 %v4450_v48 }
 0xab2   :  { %4233 = vmatprep.subr.bf16.mxu0 %v4587_v1 }
 0xab4   :  { %4222 = vmatmul.mubr.msk.bf16.vlgmr.msra.gmra.mrb[36].mxu0 %vm396_vm3, %v1561_v47 }
 0xab5   :  { %4234 = vmatpush3.bf16.msra.mxu0 %v4451_v2  ;;  %4241 = vmatprep.mubr.msk.bf16.mxu0 %vm4588_vm0, %v4587_v1 }
 0xab6   :  { %4235 = vmatprep.subr.bf16.mxu0 %v4587_v1 }
 0xab9   :  { %4236 = vmatpush3.bf16.msra.mxu0 %v4452_v8  ;;  %v4457_v8 = vld [vmem:[%s5643_s6 + $0x10] sm:$0xff]  }
 0xaba   :  { %4237 = vmatprep.subr.bf16.mxu0 %v4587_v1 }
 0xabd   :  { %4238 = vmatpush3.bf16.msra.mxu0 %v4453_v49 }
 0xabe   :  { %4239 = vmatprep.subr.bf16.mxu0 %v4587_v1 }
 0xac1   :  { %4240 = vmatpush3.bf16.msra.mxu0 %v4454_v50 }
 0xac2   :  { %4257 = vmatprep.subr.bf16.mxu0 %v4587_v1 }
 0xac4   :  { %4242 = vmatmul.mubr.msk.bf16.vlgmr.msra.gmra.mrb[40].mxu0 %vm266_vm2, %v4757_v24 }
 0xac5   :  { %4261 = vmatprep.mubr.msk.bf16.mxu0 %vm4588_vm0, %v4587_v1 }
 0xb7f   :  { %v1616_v51 = vpop.f32.mrb[32].mxu0 }
 0xb80   :  { %v1617_v52 = vadd.f32 %v4929_v30, %v1616_v51  ;;  %v4207_v53 = vpop.f32.mrb[33].mxu0 }
 0xb81   :  { %v1619_v54 = vpop.f32.mrb[34].mxu0 }
 0xb82   :  { %v4208_v55 = vpop.f32.mrb[35].mxu0  ;;  %v1622_v56 = vsel %vm396_vm3, %v1617_v52, 0.0  ;;  %v4460_v54 = vld [vmem:[%s5641_s4 + $0x48] sm:$0xff]  }
 0xb83   :  { %1623 = vadd.xlane.f32.xlu0 %v1622_v56  ;;  %v4462_v55 = vld [vmem:[%s5641_s4 + $0x58] sm:$0xff]   ;;  %v4463_v56 = vld [vmem:[%s5642_s5] sm:$0xff]  }
 0xb84   :  { %4258 = vmatpush3.bf16.msra.mxu0 %v4463_v56 }
 0xb85   :  { %4259 = vmatprep.subr.bf16.mxu0 %v4587_v1 }
 0xb87   :  { %v1768_v57 = vpop.f32.mrb[36].mxu0 }
 0xb88   :  { %v1769_v59 = vadd.f32 %v4936_v38, %v1768_v57  ;;  %v4223_v61 = vpop.f32.mrb[37].mxu0  ;;  %v4464_v57 = vld [vmem:[%s5642_s5 + $0x8] sm:$0xff]  }
 0xb89   :  { %v1771_v62 = vpop.f32.mrb[38].mxu0  ;;  %4260 = vmatpush3.bf16.msra.mxu0 %v4464_v57  ;;  %v4468_v57 = vld [vmem:[%s5642_s5 + $0x18] sm:$0xff]  }
 0xb8a   :  { %v4224_v10 = vpop.f32.mrb[39].mxu0  ;;  %v1774_v63 = vsel %vm396_vm3, %v1769_v59, 0.0  ;;  %4273 = vmatprep.subr.bf16.mxu0 %v4587_v1 }
 0xb8b   :  { %1775 = vadd.xlane.f32.xlu1 %v1774_v63  ;;  %v5184_v63 = vld [vmem:[%s5646_s9] ss:$0 sm:$0xff] }
 0xb97   :  { %v1949_v3 = vpop.f32.mrb[40].mxu0 }
 0xb98   :  { %v1955_v4 = vadd.f32 %v1949_v3, %v4769_v25  ;;  %v4243_v6 = vpop.f32.mrb[41].mxu0 }
 0xb99   :  { %v1952_v30 = vpop.f32.mrb[42].mxu0 }
 0xb9a   :  { %v4244_v13 = vpop.f32.mrb[43].mxu0  ;;  %v1961_v15 = vadd.f32 %v3734_v5, %v1955_v4  ;;  %v5189_v4 = vld [vmem:[%s5646_s9 + $0x1] ss:$0 sm:$0xff] }
 0xb9c   :  { %v2042_v58 = vsel %vm396_vm3, %v1961_v15, 0.0 }
 0xc10   :  { %v1624_v11 = vpop.xlane.xlu0 %1623 }
 0xc11   :  { %v1625_v12 = vmul.f32 0.03125, %v1624_v11 }
 0xc13   :  { %v1626_v14 = vsub.f32 %v1617_v52, %v1625_v12  ;;  %v4458_v52 = vld [vmem:[%s5643_s6 + $0x18] sm:$0xff]  }
 0xc15   :  { %v1627_v38 = vmul.f32 %v1626_v14, %v1626_v14 }
 0xc17   :  { %v1628_v7 = vsel %vm396_vm3, %v1627_v38, 0.0 }
 0xc18   :  { %1629 = vadd.xlane.f32.xlu0 %v1628_v7  ;;  %v1776_v16 = vpop.xlane.xlu1 %1775 }
 0xc19   :  { %v1777_v17 = vmul.f32 0.03125, %v1776_v16 }
 0xc1b   :  { %v1778_v18 = vsub.f32 %v1769_v59, %v1777_v17 }
 0xc1c   :  { %2043 = vadd.xlane.f32.xlu0 %v2042_v58  ;;  %v3748_v58 = vld [vmem:[%s5645_s8 + $0x2] ss:$0 sm:$0xff] }
 0xc1d   :  { %v1779_v60 = vmul.f32 %v1778_v18, %v1778_v18 }
 0xc1f   :  { %v1780_v20 = vsel %vm396_vm3, %v1779_v60, 0.0 }
 0xc20   :  { %1781 = vadd.xlane.f32.xlu1 %v1780_v20 }
 0xca5   :  { %v1630_v31 = vpop.xlane.xlu0 %1629 }
 0xca6   :  { %v1631_v33 = vmul.f32 0.03125, %v1630_v31 }
 0xca8   :  { %v1632_v34 = vadd.f32 1e-05, %v1631_v33 }
 0xca9   :  { %v2044_v32 = vpop.xlane.xlu0 %2043 }
 0xcaa   :  { %4519 = vrsqrt.f32 %v1632_v34  ;;  %v2045_v35 = vmul.f32 0.03125, %v2044_v32  ;;  %v5208_v34 = vld [vmem:[%s5646_s9 + $0x2] ss:$0 sm:$0xff] }
 0xcac   :  { %v2046_v37 = vsub.f32 %v1961_v15, %v2045_v35 }
 0xcad   :  { %v1782_v39 = vpop.xlane.xlu1 %1781 }
 0xcae   :  { %v1783_v40 = vmul.f32 0.03125, %v1782_v39  ;;  %v2047_v42 = vmul.f32 %v2046_v37, %v2046_v37 }
 0xcb0   :  { %v1784_v43 = vadd.f32 1e-05, %v1783_v40  ;;  %v2048_v44 = vsel %vm396_vm3, %v2047_v42, 0.0 }
 0xcb1   :  { %2049 = vadd.xlane.f32.xlu0 %v2048_v44 }
 0xcb2   :  { %4521 = vrsqrt.f32 %v1784_v43 }
 0xcb4   :  { %v4520_v22 = vpop.eup %4519 }
 0xcb5   :  { %v1634_v45 = vmul.f32 %v4520_v22, %v1626_v14 }
 0xcb7   :  { %v1640_v46 = vmul.f32 %v4959_v26, %v1634_v45 }
 0xcb9   :  { %v1646_v47 = vadd.f32 %v4964_v29, %v1640_v46 }
 0xcbb   :  { %v1647_v48 = vmax.f32 %v1646_v47, 0.0  ;;  %v4465_v47 = vld [vmem:[%s5642_s5 + $0x20] sm:$0xff]  }
 0xcbc   :  { %v4522_v2 = vpop.eup %4521 }
 0xcbd   :  { %v1786_v49 = vmul.f32 %v4522_v2, %v1778_v18  ;;  %v1652_v50 = vpack.c.bf16 %v1647_v48, %v1647_v48  ;;  %v4466_v48 = vld [vmem:[%s5642_s5 + $0x28] sm:$0xff]  }
 0xcbf   :  { %v1792_v51 = vmul.f32 %v4971_v36, %v1786_v49  ;;  %4214 = vmatmul.mubr.msk.bf16.vlgmr.msra.gmra.mrb[32].mxu1 %vm396_vm3, %v1652_v50  ;;  %v4459_v36 = vld [vmem:[%s5641_s4 + $0x40] sm:$0xff]  }
 0xcc0   :  { %4226 = vmatpush3.bf16.msra.mxu1 %v4457_v8  ;;  %4229 = vmatprep.mubr.msk.bf16.mxu1 %vm4588_vm0, %v4587_v1 }
 0xcc1   :  { %4227 = vmatprep.subr.bf16.mxu1 %v4587_v1  ;;  %v1798_v26 = vadd.f32 %v4979_v41, %v1792_v51  ;;  %v4461_v41 = vld [vmem:[%s5641_s4 + $0x50] sm:$0xff]  }
 0xcc3   :  { %v1799_v29 = vmax.f32 %v1798_v26, 0.0 }
 0xcc4   :  { %4228 = vmatpush3.bf16.msra.mxu1 %v4458_v52 }
 0xcc5   :  { %4245 = vmatprep.subr.bf16.mxu1 %v4587_v1  ;;  %v1804_v53 = vpack.c.bf16 %v1799_v29, %v1799_v29 }
 0xcc7   :  { %4230 = vmatmul.mubr.msk.bf16.vlgmr.msra.gmra.mrb[36].mxu1 %vm396_vm3, %v1804_v53  ;;  %v5225_v53 = vld [vmem:[%s5646_s9 + $0x8] ss:$0 sm:$0xff] }
 0xcc8   :  { %4246 = vmatpush3.bf16.msra.mxu1 %v4459_v36  ;;  %4253 = vmatprep.mubr.msk.bf16.mxu1 %vm4588_vm0, %v4587_v1 }
 0xcc9   :  { %4247 = vmatprep.subr.bf16.mxu1 %v4587_v1 }
 0xccc   :  { %4248 = vmatpush3.bf16.msra.mxu1 %v4460_v54 }
 0xccd   :  { %4249 = vmatprep.subr.bf16.mxu1 %v4587_v1 }
 0xcd0   :  { %4250 = vmatpush3.bf16.msra.mxu1 %v4461_v41  ;;  %v5230_v41 = vld [vmem:[%s5646_s9 + $0x9] ss:$0 sm:$0xff] }
 0xcd1   :  { %4251 = vmatprep.subr.bf16.mxu1 %v4587_v1 }
 0xcd4   :  { %4252 = vmatpush3.bf16.msra.mxu1 %v4462_v55  ;;  %v4467_v55 = vld [vmem:[%s5642_s5 + $0x10] sm:$0xff]  }
 0xcd5   :  { %4265 = vmatprep.subr.bf16.mxu1 %v4587_v1 }
 0xcd7   :  { %4254 = vmatmul.mubr.msk.bf16.vlgmr.msra.gmra.mrb[40].mxu1 %vm266_vm2, %v4757_v24 }
 0xcd8   :  { %4269 = vmatprep.mubr.msk.bf16.mxu1 %vm4588_vm0, %v4587_v1  ;;  %4266 = vmatpush3.bf16.msra.mxu1 %v4467_v55  ;;  %v4474_v55 = vld [vmem:[%s5640_s3 + $0x68] sm:$0xff]  }
 0xcd9   :  { %4267 = vmatprep.subr.bf16.mxu1 %v4587_v1 }
 0xcdc   :  { %4268 = vmatpush3.bf16.msra.mxu1 %v4468_v57  ;;  %v4476_v57 = vld [vmem:[%s5640_s3 + $0x78] sm:$0xff]  }
 0xcdd   :  { %4281 = vmatprep.subr.bf16.mxu1 %v4587_v1 }
 0xd3e   :  { %v2050_v59 = vpop.xlane.xlu0 %2049 }
 0xd3f   :  { %v2051_v61 = vmul.f32 0.03125, %v2050_v59 }
 0xd41   :  { %v2052_v62 = vadd.f32 1e-05, %v2051_v61 }
 0xd43   :  { %4523 = vrsqrt.f32 %v2052_v62 }
 0xd4d   :  { %v4524_v10 = vpop.eup %4523 }
 0xd4e   :  { %v2054_v3 = vmul.f32 %v4524_v10, %v2046_v37 }
 0xd50   :  { %v2060_v6 = vmul.f32 %v5184_v63, %v2054_v3 }
 0xd52   :  { %v2066_v30 = vadd.f32 %v5189_v4, %v2060_v6 }
 0xd54   :  { %v2067_v13 = vmax.f32 %v2066_v30, 0.0 }
 0xd56   :  { %v2072_v11 = vpack.c.bf16 %v2067_v13, %v2067_v13  ;;  %v5248_v13 = vld [vmem:[%s5646_s9 + $0x3] ss:$0 sm:$0xff] }
 0xd58   :  { %4262 = vmatmul.mubr.msk.bf16.vlgmr.msra.gmra.mrb[44].mxu0 %vm396_vm3, %v2072_v11 }
 0xd59   :  { %4277 = vmatprep.mubr.msk.bf16.mxu0 %vm4588_vm0, %v4587_v1  ;;  %4274 = vmatpush3.bf16.msra.mxu0 %v4465_v47 }
 0xd5a   :  { %4275 = vmatprep.subr.bf16.mxu0 %v4587_v1 }
 0xd5d   :  { %4276 = vmatpush3.bf16.msra.mxu0 %v4466_v48 }
 0xd5e   :  { %4289 = vmatprep.subr.bf16.mxu0 %v4587_v1 }
 0xd92   :  { %v5196_v12 = vpop.f32.mrb[32].mxu1 }
 0xd93   :  { %v4215_v14 = vpop.f32.mrb[33].mxu1 }
 0xd94   :  { %v1710_v5 = vpop.f32.mrb[34].mxu1  ;;  %v5253_v14 = vld [vmem:[%s5646_s9 + $0x4] ss:$0 sm:$0xff] }
 0xd95   :  { %v4216_v38 = vpop.f32.mrb[35].mxu1 }
 0xd9a   :  { %v5198_v7 = vpop.f32.mrb[36].mxu1 }
 0xd9b   :  { %v4231_v15 = vpop.f32.mrb[37].mxu1 }
 0xd9c   :  { %v1862_v16 = vpop.f32.mrb[38].mxu1 }
 0xd9d   :  { %v4232_v17 = vpop.f32.mrb[39].mxu1 }
 0xd9e   :  { %v5263_v17 = vld [vmem:[%s5646_s9 + $0xa] ss:$0 sm:$0xff] }
 0xdaa   :  { %v2029_v18 = vpop.f32.mrb[40].mxu1 }
 0xdab   :  { %v2035_v60 = vadd.f32 %v2029_v18, %v4771_v27  ;;  %v4255_v20 = vpop.f32.mrb[41].mxu1 }
 0xdac   :  { %v2032_v21 = vpop.f32.mrb[42].mxu1 }
 0xdad   :  { %v4256_v28 = vpop.f32.mrb[43].mxu1  ;;  %v2041_v31 = vadd.f32 %v3748_v58, %v2035_v60 }
 0xdaf   :  { %v2255_v33 = vsel %vm396_vm3, %v2041_v31, 0.0 }
 0xdb0   :  { %2256 = vadd.xlane.f32.xlu1 %v2255_v33 }
 0xe2b   :  { %v2127_v32 = vpop.f32.mrb[44].mxu0 }
 0xe2c   :  { %v2128_v35 = vadd.f32 %v5208_v34, %v2127_v32  ;;  %v4263_v37 = vpop.f32.mrb[45].mxu0 }
 0xe2d   :  { %v2130_v39 = vpop.f32.mrb[46].mxu0 }
 0xe2e   :  { %v4264_v40 = vpop.f32.mrb[47].mxu0  ;;  %v2133_v42 = vsel %vm396_vm3, %v2128_v35, 0.0 }
 0xe2f   :  { %2134 = vadd.xlane.f32.xlu0 %v2133_v42 }
 0xe3d   :  { %v2257_v43 = vpop.xlane.xlu1 %2256 }
 0xe3e   :  { %v2258_v44 = vmul.f32 0.03125, %v2257_v43 }
 0xe40   :  { %v2259_v22 = vsub.f32 %v2041_v31, %v2258_v44  ;;  %v4469_v44 = vld [vmem:[%s5642_s5 + $0x30] sm:$0xff]  }
 0xe42   :  { %v2260_v45 = vmul.f32 %v2259_v22, %v2259_v22 }
 0xe44   :  { %v2261_v46 = vsel %vm396_vm3, %v2260_v45, 0.0 }
 0xe45   :  { %2262 = vadd.xlane.f32.xlu1 %v2261_v46 }
 0xebc   :  { %v2135_v2 = vpop.xlane.xlu0 %2134 }
 0xebd   :  { %v2136_v8 = vmul.f32 0.03125, %v2135_v2  ;;  %v5281_v2 = vld [vmem:[%s5646_s9 + $0xb] ss:$0 sm:$0xff] }
 0xebf   :  { %v2137_v49 = vsub.f32 %v2128_v35, %v2136_v8 }
 0xec1   :  { %v2138_v50 = vmul.f32 %v2137_v49, %v2137_v49 }
 0xec3   :  { %v2139_v51 = vsel %vm396_vm3, %v2138_v50, 0.0 }
 0xec4   :  { %2140 = vadd.xlane.f32.xlu0 %v2139_v51 }
 0xed2   :  { %v2263_v52 = vpop.xlane.xlu1 %2262 }
 0xed3   :  { %v2264_v26 = vmul.f32 0.03125, %v2263_v52 }
 0xed5   :  { %v2265_v29 = vadd.f32 1e-05, %v2264_v26  ;;  %v4471_v26 = vld [vmem:[%s5642_s5 + $0x40] sm:$0xff]  }
 0xed7   :  { %4525 = vrsqrt.f32 %v2265_v29 }
 0xee1   :  { %v4526_v36 = vpop.eup %4525 }
 0xee2   :  { %v2267_v54 = vmul.f32 %v4526_v36, %v2259_v22  ;;  %v4470_v22 = vld [vmem:[%s5642_s5 + $0x38] sm:$0xff]   ;;  %v4472_v36 = vld [vmem:[%s5642_s5 + $0x48] sm:$0xff]  }
 0xee4   :  { %v2273_v56 = vmul.f32 %v5225_v53, %v2267_v54  ;;  %v4473_v54 = vld [vmem:[%s5640_s3 + $0x60] sm:$0xff]  }
 0xee6   :  { %v2279_v59 = vadd.f32 %v5230_v41, %v2273_v56  ;;  %v4475_v56 = vld [vmem:[%s5640_s3 + $0x70] sm:$0xff]  }
 0xee8   :  { %v2280_v61 = vmax.f32 %v2279_v59, 0.0  ;;  %v5327_v59 = vld [vmem:[%s5646_s9 + $0xd] ss:$0 sm:$0xff] }
 0xeea   :  { %v2285_v62 = vpack.c.bf16 %v2280_v61, %v2280_v61 }
 0xeec   :  { %4278 = vmatmul.mubr.msk.bf16.vlgmr.msra.gmra.mrb[48].mxu0 %vm396_vm3, %v2285_v62 }
 0xeed   :  { %4293 = vmatprep.mubr.msk.bf16.mxu0 %vm4588_vm0, %v4587_v1 }
 0xf51   :  { %v2141_v10 = vpop.xlane.xlu0 %2140 }
 0xf52   :  { %v2142_v3 = vmul.f32 0.03125, %v2141_v10 }
 0xf54   :  { %v2143_v6 = vadd.f32 1e-05, %v2142_v3 }
 0xf56   :  { %4527 = vrsqrt.f32 %v2143_v6 }
 0xf60   :  { %v4528_v30 = vpop.eup %4527 }
 0xf61   :  { %v2145_v11 = vmul.f32 %v4528_v30, %v2137_v49  ;;  %v5286_v49 = vld [vmem:[%s5646_s9 + $0xc] ss:$0 sm:$0xff] }
 0xf63   :  { %v2151_v5 = vmul.f32 %v5248_v13, %v2145_v11  ;;  %v5334_v11 = vld [vmem:[%s5646_s9 + $0x10] ss:$0 sm:$0xff] }
 0xf65   :  { %v2157_v38 = vadd.f32 %v5253_v14, %v2151_v5 }
 0xf67   :  { %v2158_v15 = vmax.f32 %v2157_v38, 0.0 }
 0xf69   :  { %v2163_v16 = vpack.c.bf16 %v2158_v15, %v2158_v15 }
 0xf6b   :  { %4270 = vmatmul.mubr.msk.bf16.vlgmr.msra.gmra.mrb[44].mxu1 %vm396_vm3, %v2163_v16 }
 0xf6c   :  { %4285 = vmatprep.mubr.msk.bf16.mxu1 %vm4588_vm0, %v4587_v1  ;;  %4282 = vmatpush3.bf16.msra.mxu1 %v4469_v44 }
 0xf6d   :  { %4283 = vmatprep.subr.bf16.mxu1 %v4587_v1 }
 0xf70   :  { %4284 = vmatpush3.bf16.msra.mxu1 %v4470_v22 }
 0xf71   :  { %4297 = vmatprep.subr.bf16.mxu1 %v4587_v1 }
 0xfbf   :  { %v2340_v18 = vpop.f32.mrb[48].mxu0 }
 0xfc0   :  { %v2341_v58 = vadd.f32 %v5263_v17, %v2340_v18  ;;  %v4279_v60 = vpop.f32.mrb[49].mxu0 }
 0xfc1   :  { %v2343_v20 = vpop.f32.mrb[50].mxu0 }
 0xfc2   :  { %v4280_v21 = vpop.f32.mrb[51].mxu0  ;;  %v2346_v28 = vsel %vm396_vm3, %v2341_v58, 0.0 }
 0xfc3   :  { %2347 = vadd.xlane.f32.xlu1 %v2346_v28 }
0x103e   :  { %v5267_v31 = vpop.f32.mrb[44].mxu1 }
0x103f   :  { %v4271_v33 = vpop.f32.mrb[45].mxu1 }
0x1040   :  { %v2221_v32 = vpop.f32.mrb[46].mxu1 }
0x1041   :  { %v4272_v35 = vpop.f32.mrb[47].mxu1 }
0x1050   :  { %v2348_v37 = vpop.xlane.xlu1 %2347 }
0x1051   :  { %v2349_v39 = vmul.f32 0.03125, %v2348_v37 }
0x1053   :  { %v2350_v40 = vsub.f32 %v2341_v58, %v2349_v39  ;;  %v3825_v39 = vld [vmem:[%s5644_s7 + $0x3] ss:$0 sm:$0xff] }
0x1055   :  { %v2351_v42 = vmul.f32 %v2350_v40, %v2350_v40 }
0x1057   :  { %v2352_v43 = vsel %vm396_vm3, %v2351_v42, 0.0 }
0x1058   :  { %2353 = vadd.xlane.f32.xlu1 %v2352_v43 }
0x10e5   :  { %v2354_v45 = vpop.xlane.xlu1 %2353 }
0x10e6   :  { %v2355_v46 = vmul.f32 0.03125, %v2354_v45 }
0x10e8   :  { %v2356_v47 = vadd.f32 1e-05, %v2355_v46 }
0x10ea   :  { %4529 = vrsqrt.f32 %v2356_v47 }
0x10f4   :  { %v4530_v48 = vpop.eup %4529 }
0x10f5   :  { %v2358_v8 = vmul.f32 %v4530_v48, %v2350_v40  ;;  %v4477_v48 = vld [vmem:[%s5643_s6] sm:$0xff]  }
0x10f6   :  { %4290 = vmatpush3.bf16.msra.mxu0 %v4477_v48 }
0x10f7   :  { %v2364_v50 = vmul.f32 %v5281_v2, %v2358_v8  ;;  %4291 = vmatprep.subr.bf16.mxu0 %v4587_v1  ;;  %v4478_v8 = vld [vmem:[%s5643_s6 + $0x8] sm:$0xff]  }
0x10f9   :  { %v2370_v51 = vadd.f32 %v5286_v49, %v2364_v50 }
0x10fa   :  { %4292 = vmatpush3.bf16.msra.mxu0 %v4478_v8 }
0x10fb   :  { %v2371_v52 = vmax.f32 %v2370_v51, 0.0  ;;  %4305 = vmatprep.subr.bf16.mxu0 %v4587_v1 }
0x10fd   :  { %v2376_v29 = vpack.c.bf16 %v2371_v52, %v2371_v52 }
0x10ff   :  { %4286 = vmatmul.mubr.msk.bf16.vlgmr.msra.gmra.mrb[48].mxu1 %vm396_vm3, %v2376_v29 }
0x1100   :  { %4298 = vmatpush3.bf16.msra.mxu1 %v4471_v26  ;;  %4301 = vmatprep.mubr.msk.bf16.mxu1 %vm4588_vm0, %v4587_v1 }
0x1101   :  { %4299 = vmatprep.subr.bf16.mxu1 %v4587_v1 }
0x1104   :  { %4300 = vmatpush3.bf16.msra.mxu1 %v4472_v36 }
0x1105   :  { %4313 = vmatprep.subr.bf16.mxu1 %v4587_v1 }
0x1107   :  { %4302 = vmatmul.mubr.msk.bf16.vlgmr.msra.gmra.mrb[52].mxu1 %vm396_vm3, %v2376_v29 }
0x1108   :  { %4314 = vmatpush3.bf16.msra.mxu1 %v4473_v54  ;;  %4321 = vmatprep.mubr.msk.bf16.mxu1 %vm4588_vm0, %v4587_v1 }
0x1109   :  { %4315 = vmatprep.subr.bf16.mxu1 %v4587_v1 }
0x110c   :  { %4316 = vmatpush3.bf16.msra.mxu1 %v4474_v55 }
0x110d   :  { %4317 = vmatprep.subr.bf16.mxu1 %v4587_v1 }
0x1110   :  { %4318 = vmatpush3.bf16.msra.mxu1 %v4475_v56 }
0x1111   :  { %4319 = vmatprep.subr.bf16.mxu1 %v4587_v1 }
0x1114   :  { %4320 = vmatpush3.bf16.msra.mxu1 %v4476_v57 }
0x1115   :  { %4337 = vmatprep.subr.bf16.mxu1 %v4587_v1 }
0x1117   :  { %4322 = vmatmul.mubr.msk.bf16.vlgmr.msra.gmra.mrb[56].mxu1 %vm266_vm2, %v4757_v24 }
0x1118   :  { %4341 = vmatprep.mubr.msk.bf16.mxu1 %vm4588_vm0, %v4587_v1 }
0x11d2   :  { %v2431_v61 = vpop.f32.mrb[48].mxu1 }
0x11d3   :  { %v2432_v62 = vadd.f32 %v5327_v59, %v2431_v61  ;;  %v4287_v10 = vpop.f32.mrb[49].mxu1 }
0x11d4   :  { %v2434_v3 = vpop.f32.mrb[50].mxu1  ;;  %v5357_v10 = vld [vmem:[%s5646_s9 + $0xe] ss:$0 sm:$0xff] }
0x11d5   :  { %v4288_v6 = vpop.f32.mrb[51].mxu1  ;;  %v2437_v30 = vsel %vm396_vm3, %v2432_v62, 0.0 }
0x11d6   :  { %2438 = vadd.xlane.f32.xlu0 %v2437_v30  ;;  %v5362_v6 = vld [vmem:[%s5646_s9 + $0xf] ss:$0 sm:$0xff] }
0x11da   :  { %v2583_v5 = vpop.f32.mrb[52].mxu1 }
0x11db   :  { %v2584_v38 = vadd.f32 %v5334_v11, %v2583_v5  ;;  %v4303_v15 = vpop.f32.mrb[53].mxu1 }
0x11dc   :  { %v2586_v16 = vpop.f32.mrb[54].mxu1 }
0x11dd   :  { %v4304_v18 = vpop.f32.mrb[55].mxu1  ;;  %v2589_v58 = vsel %vm396_vm3, %v2584_v38, 0.0  ;;  %v5369_v16 = vld [vmem:[%s5646_s9 + $0x11] ss:$0 sm:$0xff] }
0x11de   :  { %2590 = vadd.xlane.f32.xlu1 %v2589_v58  ;;  %v4479_v18 = vld [vmem:[%s5643_s6 + $0x10] sm:$0xff]  }
0x11ea   :  { %v2764_v60 = vpop.f32.mrb[56].mxu1 }
0x11eb   :  { %v2770_v20 = vadd.f32 %v2764_v60, %v4769_v25  ;;  %v4323_v21 = vpop.f32.mrb[57].mxu1 }
0x11ec   :  { %v2767_v28 = vpop.f32.mrb[58].mxu1 }
0x11ed   :  { %v4324_v33 = vpop.f32.mrb[59].mxu1  ;;  %v2776_v43 = vadd.f32 %v3825_v39, %v2770_v20  ;;  %v5377_v20 = vld [vmem:[%s5646_s9 + $0x12] ss:$0 sm:$0xff]  ;;  %v4480_v28 = vld [vmem:[%s5643_s6 + $0x18] sm:$0xff]   ;;  %v4482_v39 = vld [vmem:[%s5641_s4 + $0x68] sm:$0xff]  }
0x11ef   :  { %v2857_v25 = vsel %vm396_vm3, %v2776_v43, 0.0 }
0x1263   :  { %v2439_v32 = vpop.xlane.xlu0 %2438 }
0x1264   :  { %v2440_v35 = vmul.f32 0.03125, %v2439_v32 }
0x1266   :  { %v2441_v37 = vsub.f32 %v2432_v62, %v2440_v35  ;;  %v4481_v35 = vld [vmem:[%s5641_s4 + $0x60] sm:$0xff]  }
0x1268   :  { %v2442_v40 = vmul.f32 %v2441_v37, %v2441_v37 }
0x126a   :  { %v2443_v42 = vsel %vm396_vm3, %v2442_v40, 0.0  ;;  %v4483_v40 = vld [vmem:[%s5641_s4 + $0x70] sm:$0xff]  }
0x126b   :  { %2444 = vadd.xlane.f32.xlu0 %v2443_v42  ;;  %v2591_v44 = vpop.xlane.xlu1 %2590  ;;  %v4484_v42 = vld [vmem:[%s5641_s4 + $0x78] sm:$0xff]  }
0x126c   :  { %v2592_v22 = vmul.f32 0.03125, %v2591_v44  ;;  %v4486_v44 = vld [vmem:[%s5642_s5 + $0x8] sm:$0xff]  }
0x126e   :  { %v2593_v45 = vsub.f32 %v2584_v38, %v2592_v22 }
0x126f   :  { %2858 = vadd.xlane.f32.xlu0 %v2857_v25 }
0x1270   :  { %v2594_v46 = vmul.f32 %v2593_v45, %v2593_v45 }
0x1272   :  { %v2595_v47 = vsel %vm396_vm3, %v2594_v46, 0.0 }
0x1273   :  { %2596 = vadd.xlane.f32.xlu1 %v2595_v47 }
0x12f8   :  { %v2445_v50 = vpop.xlane.xlu0 %2444 }
0x12f9   :  { %v2446_v51 = vmul.f32 0.03125, %v2445_v50 }
0x12fb   :  { %v2447_v52 = vadd.f32 1e-05, %v2446_v51 }
0x12fc   :  { %v2859_v26 = vpop.xlane.xlu0 %2858 }
0x12fd   :  { %4531 = vrsqrt.f32 %v2447_v52  ;;  %v2860_v29 = vmul.f32 0.03125, %v2859_v26 }
0x12ff   :  { %v2861_v36 = vsub.f32 %v2776_v43, %v2860_v29  ;;  %v4485_v43 = vld [vmem:[%s5642_s5] sm:$0xff]  }
0x1300   :  { %v2597_v54 = vpop.xlane.xlu1 %2596  ;;  %4338 = vmatpush3.bf16.msra.mxu1 %v4485_v43 }
0x1301   :  { %v2598_v55 = vmul.f32 0.03125, %v2597_v54  ;;  %v2862_v56 = vmul.f32 %v2861_v36, %v2861_v36  ;;  %4339 = vmatprep.subr.bf16.mxu1 %v4587_v1 }
0x1303   :  { %v2599_v57 = vadd.f32 1e-05, %v2598_v55  ;;  %v2863_v61 = vsel %vm396_vm3, %v2862_v56, 0.0 }
0x1304   :  { %2864 = vadd.xlane.f32.xlu0 %v2863_v61  ;;  %4340 = vmatpush3.bf16.msra.mxu1 %v4486_v44 }
0x1305   :  { %4533 = vrsqrt.f32 %v2599_v57  ;;  %4353 = vmatprep.subr.bf16.mxu1 %v4587_v1 }
0x1307   :  { %v4532_v62 = vpop.eup %4531 }
0x1308   :  { %v2449_v3 = vmul.f32 %v4532_v62, %v2441_v37 }
0x130a   :  { %v2455_v30 = vmul.f32 %v5357_v10, %v2449_v3 }
0x130c   :  { %v2461_v5 = vadd.f32 %v5362_v6, %v2455_v30 }
0x130e   :  { %v2462_v38 = vmax.f32 %v2461_v5, 0.0 }
0x130f   :  { %v4534_v15 = vpop.eup %4533 }
0x1310   :  { %v2601_v58 = vmul.f32 %v4534_v15, %v2593_v45  ;;  %v2467_v60 = vpack.c.bf16 %v2462_v38, %v2462_v38 }
0x1312   :  { %v2607_v21 = vmul.f32 %v5369_v16, %v2601_v58  ;;  %4294 = vmatmul.mubr.msk.bf16.vlgmr.msra.gmra.mrb[52].mxu0 %vm396_vm3, %v2467_v60 }
0x1313   :  { %4306 = vmatpush3.bf16.msra.mxu0 %v4479_v18  ;;  %4309 = vmatprep.mubr.msk.bf16.mxu0 %vm4588_vm0, %v4587_v1 }
0x1314   :  { %4307 = vmatprep.subr.bf16.mxu0 %v4587_v1  ;;  %v2613_v33 = vadd.f32 %v5377_v20, %v2607_v21 }
0x1316   :  { %v2614_v32 = vmax.f32 %v2613_v33, 0.0 }
0x1317   :  { %4308 = vmatpush3.bf16.msra.mxu0 %v4480_v28 }
0x1318   :  { %4325 = vmatprep.subr.bf16.mxu0 %v4587_v1  ;;  %v2619_v37 = vpack.c.bf16 %v2614_v32, %v2614_v32 }
0x131a   :  { %4310 = vmatmul.mubr.msk.bf16.vlgmr.msra.gmra.mrb[56].mxu0 %vm396_vm3, %v2619_v37  ;;  %v4487_v37 = vld [vmem:[%s5642_s5 + $0x20] sm:$0xff]  }
0x131b   :  { %4326 = vmatpush3.bf16.msra.mxu0 %v4481_v35  ;;  %4333 = vmatprep.mubr.msk.bf16.mxu0 %vm4588_vm0, %v4587_v1 }
0x131c   :  { %4327 = vmatprep.subr.bf16.mxu0 %v4587_v1 }
0x131f   :  { %4328 = vmatpush3.bf16.msra.mxu0 %v4482_v39 }
0x1320   :  { %4329 = vmatprep.subr.bf16.mxu0 %v4587_v1 }
0x1323   :  { %4330 = vmatpush3.bf16.msra.mxu0 %v4483_v40 }
0x1324   :  { %4331 = vmatprep.subr.bf16.mxu0 %v4587_v1 }
0x1327   :  { %4332 = vmatpush3.bf16.msra.mxu0 %v4484_v42 }
0x1328   :  { %4345 = vmatprep.subr.bf16.mxu0 %v4587_v1 }
0x132a   :  { %4334 = vmatmul.mubr.msk.bf16.vlgmr.msra.gmra.mrb[60].mxu0 %vm266_vm2, %v4757_v24 }
0x132b   :  { %4349 = vmatprep.mubr.msk.bf16.mxu0 %vm4588_vm0, %v4587_v1 }
0x1391   :  { %v2865_v22 = vpop.xlane.xlu0 %2864 }
0x1392   :  { %v2866_v45 = vmul.f32 0.03125, %v2865_v22 }
0x1394   :  { %v2867_v25 = vadd.f32 1e-05, %v2866_v45 }
0x1396   :  { %4535 = vrsqrt.f32 %v2867_v25 }
0x13a0   :  { %v4536_v46 = vpop.eup %4535 }
0x13a1   :  { %v2869_v47 = vmul.f32 %v4536_v46, %v2861_v36 }
0x13a3   :  { %v2875_v48 = vmul.f32 %v5184_v63, %v2869_v47 }
0x13a5   :  { %v2881_v8 = vadd.f32 %v5189_v4, %v2875_v48  ;;  %v3839_v4 = vld [vmem:[%s5645_s8 + $0x3] ss:$0 sm:$0xff]  ;;  %v4489_v48 = vld [vmem:[%s5642_s5 + $0x10] sm:$0xff]  }
0x13a6   :  { %4346 = vmatpush3.bf16.msra.mxu0 %v4489_v48 }
0x13a7   :  { %v2882_v50 = vmax.f32 %v2881_v8, 0.0  ;;  %4347 = vmatprep.subr.bf16.mxu0 %v4587_v1 }
0x13a9   :  { %v2887_v51 = vpack.c.bf16 %v2882_v50, %v2882_v50  ;;  %v4490_v50 = vld [vmem:[%s5642_s5 + $0x18] sm:$0xff]  }
0x13aa   :  { %4348 = vmatpush3.bf16.msra.mxu0 %v4490_v50 }
0x13ab   :  { %4342 = vmatmul.mubr.msk.bf16.vlgmr.msra.gmra.mrb[60].mxu1 %vm396_vm3, %v2887_v51  ;;  %4361 = vmatprep.subr.bf16.mxu0 %v4587_v1 }
0x13ac   :  { %4357 = vmatprep.mubr.msk.bf16.mxu1 %vm4588_vm0, %v4587_v1  ;;  %4354 = vmatpush3.bf16.msra.mxu1 %v4487_v37 }
0x13ad   :  { %4355 = vmatprep.subr.bf16.mxu1 %v4587_v1 }
0x13e5   :  { %v5425_v24 = vpop.f32.mrb[52].mxu0 }
0x13e6   :  { %v4295_v52 = vpop.f32.mrb[53].mxu0 }
0x13e7   :  { %v2525_v26 = vpop.f32.mrb[54].mxu0 }
0x13e8   :  { %v4296_v29 = vpop.f32.mrb[55].mxu0 }
0x13ed   :  { %v5427_v54 = vpop.f32.mrb[56].mxu0 }
0x13ee   :  { %v4311_v55 = vpop.f32.mrb[57].mxu0 }
0x13ef   :  { %v2677_v36 = vpop.f32.mrb[58].mxu0 }
0x13f0   :  { %v4312_v56 = vpop.f32.mrb[59].mxu0 }
0x13fd   :  { %v2844_v63 = vpop.f32.mrb[60].mxu0 }
0x13fe   :  { %v2850_v57 = vadd.f32 %v2844_v63, %v4771_v27  ;;  %v4335_v61 = vpop.f32.mrb[61].mxu0 }
0x13ff   :  { %v2847_v62 = vpop.f32.mrb[62].mxu0 }
0x1400   :  { %v4336_v3 = vpop.f32.mrb[63].mxu0  ;;  %v2856_v30 = vadd.f32 %v3839_v4, %v2850_v57 }
0x1402   :  { %v3070_v5 = vsel %vm396_vm3, %v2856_v30, 0.0 }
0x1403   :  { %3071 = vadd.xlane.f32.xlu1 %v3070_v5 }
0x147e   :  { %v2942_v38 = vpop.f32.mrb[60].mxu1 }
0x147f   :  { %v2943_v15 = vadd.f32 %v5208_v34, %v2942_v38  ;;  %v4343_v18 = vpop.f32.mrb[61].mxu1  ;;  %v4488_v34 = vld [vmem:[%s5642_s5 + $0x28] sm:$0xff]  }
0x1480   :  { %v2945_v58 = vpop.f32.mrb[62].mxu1  ;;  %4356 = vmatpush3.bf16.msra.mxu1 %v4488_v34 }
0x1481   :  { %v4344_v60 = vpop.f32.mrb[63].mxu1  ;;  %v2948_v21 = vsel %vm396_vm3, %v2943_v15, 0.0  ;;  %4369 = vmatprep.subr.bf16.mxu1 %v4587_v1 }
0x1482   :  { %2949 = vadd.xlane.f32.xlu0 %v2948_v21 }
0x1490   :  { %v3072_v28 = vpop.xlane.xlu1 %3071 }
0x1491   :  { %v3073_v33 = vmul.f32 0.03125, %v3072_v28 }
0x1493   :  { %v3074_v32 = vsub.f32 %v2856_v30, %v3073_v33 }
0x1495   :  { %v3075_v27 = vmul.f32 %v3074_v32, %v3074_v32 }
0x1497   :  { %v3076_v35 = vsel %vm396_vm3, %v3075_v27, 0.0 }
0x1498   :  { %3077 = vadd.xlane.f32.xlu1 %v3076_v35 }
0x150f   :  { %v2950_v39 = vpop.xlane.xlu0 %2949 }
0x1510   :  { %v2951_v40 = vmul.f32 0.03125, %v2950_v39 }
0x1512   :  { %v2952_v42 = vsub.f32 %v2943_v15, %v2951_v40 }
0x1514   :  { %v2953_v43 = vmul.f32 %v2952_v42, %v2952_v42 }
0x1516   :  { %v2954_v44 = vsel %vm396_vm3, %v2953_v43, 0.0 }
0x1517   :  { %2955 = vadd.xlane.f32.xlu0 %v2954_v44  ;;  %v4493_v44 = vld [vmem:[%s5642_s5 + $0x40] sm:$0xff]  }
0x1525   :  { %v3078_v22 = vpop.xlane.xlu1 %3077 }
0x1526   :  { %v3079_v45 = vmul.f32 0.03125, %v3078_v22 }
0x1528   :  { %v3080_v25 = vadd.f32 1e-05, %v3079_v45  ;;  %v4494_v45 = vld [vmem:[%s5642_s5 + $0x48] sm:$0xff]  }
0x152a   :  { %4537 = vrsqrt.f32 %v3080_v25 }
0x1534   :  { %v4538_v46 = vpop.eup %4537 }
0x1535   :  { %v3082_v47 = vmul.f32 %v4538_v46, %v3074_v32  ;;  %v4492_v32 = vld [vmem:[%s5642_s5 + $0x38] sm:$0xff]  }
0x1537   :  { %v3088_v8 = vmul.f32 %v5225_v53, %v3082_v47 }
0x1539   :  { %v3094_v51 = vadd.f32 %v5230_v41, %v3088_v8 }
0x153b   :  { %v3095_v52 = vmax.f32 %v3094_v51, 0.0 }
0x153d   :  { %v3100_v26 = vpack.c.bf16 %v3095_v52, %v3095_v52 }
0x153f   :  { %4358 = vmatmul.mubr.msk.bf16.vlgmr.msra.gmra.mrb[64].mxu1 %vm396_vm3, %v3100_v26 }
0x1540   :  { %4373 = vmatprep.mubr.msk.bf16.mxu1 %vm4588_vm0, %v4587_v1 }
0x15a4   :  { %v2956_v53 = vpop.xlane.xlu0 %2955 }
0x15a5   :  { %v2957_v29 = vmul.f32 0.03125, %v2956_v53 }
0x15a7   :  { %v2958_v55 = vadd.f32 1e-05, %v2957_v29 }
0x15a9   :  { %4539 = vrsqrt.f32 %v2958_v55 }
0x15b3   :  { %v4540_v36 = vpop.eup %4539 }
0x15b4   :  { %v2960_v56 = vmul.f32 %v4540_v36, %v2952_v42 }
0x15b6   :  { %v2966_v41 = vmul.f32 %v5248_v13, %v2960_v56 }
0x15b8   :  { %v2972_v63 = vadd.f32 %v5253_v14, %v2966_v41 }
0x15ba   :  { %v2973_v4 = vmax.f32 %v2972_v63, 0.0 }
0x15bc   :  { %v2978_v57 = vpack.c.bf16 %v2973_v4, %v2973_v4 }
0x15be   :  { %4350 = vmatmul.mubr.msk.bf16.vlgmr.msra.gmra.mrb[64].mxu0 %vm396_vm3, %v2978_v57 }
0x15bf   :  { %4365 = vmatprep.mubr.msk.bf16.mxu0 %vm4588_vm0, %v4587_v1 }
0x1612   :  { %v3155_v61 = vpop.f32.mrb[64].mxu1 }
0x1613   :  { %v3156_v62 = vadd.f32 %v5263_v17, %v3155_v61  ;;  %v4359_v3 = vpop.f32.mrb[65].mxu1  ;;  %v4491_v17 = vld [vmem:[%s5642_s5 + $0x30] sm:$0xff]  }
0x1614   :  { %v3158_v30 = vpop.f32.mrb[66].mxu1  ;;  %4362 = vmatpush3.bf16.msra.mxu0 %v4491_v17 }
0x1615   :  { %v4360_v5 = vpop.f32.mrb[67].mxu1  ;;  %v3161_v38 = vsel %vm396_vm3, %v3156_v62, 0.0  ;;  %4363 = vmatprep.subr.bf16.mxu0 %v4587_v1 }
0x1616   :  { %3162 = vadd.xlane.f32.xlu1 %v3161_v38 }
0x1618   :  { %4364 = vmatpush3.bf16.msra.mxu0 %v4492_v32 }
0x1619   :  { %4377 = vmatprep.subr.bf16.mxu0 %v4587_v1 }
0x1691   :  { %v5466_v15 = vpop.f32.mrb[64].mxu0 }
0x1692   :  { %v4351_v13 = vpop.f32.mrb[65].mxu0 }
0x1693   :  { %v3036_v14 = vpop.f32.mrb[66].mxu0 }
0x1694   :  { %v4352_v18 = vpop.f32.mrb[67].mxu0 }
0x1695   :  { %v4495_v18 = vld [vmem:[%s5643_s6] sm:$0xff]  }
0x1696   :  { %4370 = vmatpush3.bf16.msra.mxu1 %v4495_v18 }
0x1697   :  { %4371 = vmatprep.subr.bf16.mxu1 %v4587_v1 }
0x16a3   :  { %v3163_v58 = vpop.xlane.xlu1 %3162 }
0x16a4   :  { %v3164_v60 = vmul.f32 0.03125, %v3163_v58 }
0x16a6   :  { %v3165_v21 = vsub.f32 %v3156_v62, %v3164_v60 }
0x16a8   :  { %v3166_v28 = vmul.f32 %v3165_v21, %v3165_v21 }
0x16aa   :  { %v3167_v33 = vsel %vm396_vm3, %v3166_v28, 0.0 }
0x16ab   :  { %3168 = vadd.xlane.f32.xlu1 %v3167_v33  ;;  %v5534_v33 = vld [vmem:[%s5647_s10 + $0x1] ss:$0 sm:$0xff] }
0x1738   :  { %v3169_v27 = vpop.xlane.xlu1 %3168 }
0x1739   :  { %v3170_v35 = vmul.f32 0.03125, %v3169_v27 }
0x173b   :  { %v3171_v37 = vadd.f32 1e-05, %v3170_v35  ;;  %v2675_v35 = vadd.f32 %v5534_v33, %v5427_v54 }
0x173d   :  { %4541 = vrsqrt.f32 %v3171_v37  ;;  %vm2680_vm5 = vcmp.gt.f32.partialorder %v2675_v35, 0.0 }
0x1747   :  { %v4542_v34 = vpop.eup %4541 }
0x1748   :  { %v3173_v39 = vmul.f32 %v4542_v34, %v3165_v21 }
0x174a   :  { %v3179_v40 = vmul.f32 %v5281_v2, %v3173_v39 }
0x174c   :  { %v3185_v42 = vadd.f32 %v5286_v49, %v3179_v40 }
0x174e   :  { %v3186_v43 = vmax.f32 %v3185_v42, 0.0 }
0x1750   :  { %v3191_v22 = vpack.c.bf16 %v3186_v43, %v3186_v43 }
0x1752   :  { %4366 = vmatmul.mubr.msk.bf16.vlgmr.msra.gmra.mrb[68].mxu0 %vm396_vm3, %v3191_v22 }
0x1753   :  { %4378 = vmatpush3.bf16.msra.mxu0 %v4493_v44  ;;  %4381 = vmatprep.mubr.msk.bf16.mxu0 %vm4588_vm0, %v4587_v1  ;;  %v2681_v44 = vmin.f32 %v2675_v35, 0.0 }
0x1754   :  { %4379 = vmatprep.subr.bf16.mxu0 %v4587_v1 }
0x1757   :  { %4380 = vmatpush3.bf16.msra.mxu0 %v4494_v45 }
0x175a   :  { %4382 = vmatmul.mubr.msk.bf16.vlgmr.msra.gmra.mrb[72].mxu0 %vm396_vm3, %v3191_v22 }
0x1825   :  { %v3246_v2 = vpop.f32.mrb[68].mxu0 }
0x1826   :  { %v3247_v49 = vadd.f32 %v5327_v59, %v3246_v2  ;;  %v4367_v25 = vpop.f32.mrb[69].mxu0  ;;  %v3578_v59 = vld [vmem:[%s5646_s9 + $0x5] ss:$0 sm:$0xff] }
0x1827   :  { %v3249_v46 = vpop.f32.mrb[70].mxu0  ;;  %v576_v41 = vadd.f32 %v3578_v59, %v4924_v23  ;;  %v1404_v23 = vadd.f32 %v3578_v59, %v5068_v19  ;;  %v4496_v19 = vld [vmem:[%s5643_s6 + $0x8] sm:$0xff]  }
0x1828   :  { %v4368_v47 = vpop.f32.mrb[71].mxu0  ;;  %v3252_v48 = vsel %vm396_vm3, %v3247_v49, 0.0  ;;  %4372 = vmatpush3.bf16.msra.mxu1 %v4496_v19 }
0x1829   :  { %3253 = vadd.xlane.f32.xlu0 %v3252_v48  ;;  %v581_v3 = vsel %vm396_vm3, %v576_v41, 0.0  ;;  %4385 = vmatprep.subr.bf16.mxu1 %v4587_v1  ;;  %v2682_v47 = vmul.f32 1.442695, %v2681_v44 }
0x182d   :  { %v3398_v8 = vpop.f32.mrb[72].mxu0 }
0x182e   :  { %v3399_v50 = vadd.f32 %v5334_v11, %v3398_v8  ;;  %v4383_v51 = vpop.f32.mrb[73].mxu0  ;;  %v3761_v11 = vld [vmem:[%s5646_s9 + $0x5] ss:$0 sm:$0xff] }
0x182f   :  { %v3401_v52 = vpop.f32.mrb[74].mxu0  ;;  %v2219_v61 = vadd.f32 %v3761_v11, %v5267_v31  ;;  %v3034_v13 = vadd.f32 %v3761_v11, %v5466_v15  ;;  %v1409_v31 = vsel %vm396_vm3, %v1404_v23, 0.0  ;;  %v5525_v15 = vld [vmem:[%s5647_s10 + $0x1] ss:$0 sm:$0xff]  ;;  %v4497_v11 = vld [vmem:[%s5643_s6 + $0x10] sm:$0xff]  }
0x1830   :  { %v4384_v26 = vpop.f32.mrb[75].mxu0  ;;  %v3404_v53 = vsel %vm396_vm3, %v3399_v50, 0.0  ;;  %v5529_v21 = vadd.f32 %v5525_v15, %v5029_v9 }
0x1831   :  { %3405 = vadd.xlane.f32.xlu1 %v3404_v53  ;;  %v2224_v5 = vsel %vm396_vm3, %v2219_v61, 0.0  ;;  %v3039_v14 = vsel %vm396_vm3, %v3034_v13, 0.0 }
0x1832   :  { %v1049_v27 = vmin.f32 %v5529_v21, 0.0  ;;  %vm1048_vm4 = vcmp.gt.f32.partialorder %v5529_v21, 0.0 }
0x1834   :  { %v1050_v43 = vmul.f32 1.442695, %v1049_v27 }
0x18b6   :  { %v3254_v29 = vpop.xlane.xlu0 %3253 }
0x18b7   :  { %v3255_v55 = vmul.f32 0.03125, %v3254_v29 }
0x18b9   :  { %v3256_v36 = vsub.f32 %v3247_v49, %v3255_v55 }
0x18bb   :  { %v3257_v56 = vmul.f32 %v3256_v36, %v3256_v36 }
0x18bd   :  { %v3258_v63 = vsel %vm396_vm3, %v3257_v56, 0.0 }
0x18be   :  { %3259 = vadd.xlane.f32.xlu0 %v3258_v63  ;;  %v3406_v4 = vpop.xlane.xlu1 %3405 }
0x18bf   :  { %v3407_v57 = vmul.f32 0.03125, %v3406_v4 }
0x18c1   :  { %v5503_v62 = vsub.f32 %v3399_v50, %v3407_v57 }
0x18c2   :  { %582 = vadd.xlane.f32.xlu0 %v581_v3 }
0x18c3   :  { %v3409_v30 = vmul.f32 %v5503_v62, %v5503_v62 }
0x18c5   :  { %v3410_v38 = vsel %vm396_vm3, %v3409_v30, 0.0 }
0x18c6   :  { %2225 = vadd.xlane.f32.xlu0 %v2224_v5  ;;  %3411 = vadd.xlane.f32.xlu1 %v3410_v38 }
0x18ca   :  { %1410 = vadd.xlane.f32.xlu1 %v1409_v31 }
0x18ce   :  { %3040 = vadd.xlane.f32.xlu1 %v3039_v14 }
0x194b   :  { %v3260_v58 = vpop.xlane.xlu0 %3259 }
0x194c   :  { %v3261_v60 = vmul.f32 0.03125, %v3260_v58 }
0x194e   :  { %v3262_v28 = vadd.f32 1e-05, %v3261_v60 }
0x194f   :  { %v583_v17 = vpop.xlane.xlu0 %582 }
0x1950   :  { %4543 = vrsqrt.f32 %v3262_v28  ;;  %v584_v32 = vmul.f32 0.03125, %v583_v17 }
0x1952   :  { %v5539_v37 = vsub.f32 %v576_v41, %v584_v32 }
0x1953   :  { %v2226_v34 = vpop.xlane.xlu0 %2225  ;;  %v3412_v39 = vpop.xlane.xlu1 %3411 }
0x1954   :  { %v2227_v9 = vmul.f32 0.03125, %v2226_v34  ;;  %v3413_v40 = vmul.f32 0.03125, %v3412_v39  ;;  %v586_v42 = vmul.f32 %v5539_v37, %v5539_v37 }
0x1956   :  { %v5543_v22 = vsub.f32 %v2219_v61, %v2227_v9  ;;  %v3414_v45 = vadd.f32 1e-05, %v3413_v40  ;;  %v587_v2 = vsel %vm396_vm3, %v586_v42, 0.0  ;;  %v3582_v40 = vld [vmem:[%s5646_s9 + $0x6] ss:$0 sm:$0xff] }
0x1957   :  { %588 = vadd.xlane.f32.xlu0 %v587_v2  ;;  %v1411_v49 = vpop.xlane.xlu1 %1410 }
0x1958   :  { %4545 = vrsqrt.f32 %v3414_v45  ;;  %v1412_v54 = vmul.f32 0.03125, %v1411_v49  ;;  %v2229_v25 = vmul.f32 %v5543_v22, %v5543_v22 }
0x1959   :  { %4547 = vpow2.f32 %v1050_v43  ;;  %v3583_v43 = vld [vmem:[%s5646_s9 + $0x7] ss:$0 sm:$0xff] }
0x195a   :  { %v4544_v46 = vpop.eup %4543  ;;  %v5548_v48 = vsub.f32 %v1404_v23, %v1412_v54  ;;  %v2230_v8 = vsel %vm396_vm3, %v2229_v25, 0.0  ;;  %4549 = vpow2.f32 %v2682_v47  ;;  %v3584_v54 = vld [vmem:[%s5648_s11] ss:$0 sm:$0xff] }
0x195b   :  { %v3264_v50 = vmul.f32 %v4544_v46, %v3256_v36  ;;  %2231 = vadd.xlane.f32.xlu0 %v2230_v8  ;;  %v3041_v51 = vpop.xlane.xlu1 %3040 }
0x195c   :  { %v3042_v52 = vmul.f32 0.03125, %v3041_v51  ;;  %v1414_v26 = vmul.f32 %v5548_v48, %v5548_v48 }
0x195d   :  { %v3270_v53 = vmul.f32 %v5357_v10, %v3264_v50 }
0x195e   :  { %v5554_v29 = vsub.f32 %v3034_v13, %v3042_v52  ;;  %v1415_v55 = vsel %vm396_vm3, %v1414_v26, 0.0 }
0x195f   :  { %1416 = vadd.xlane.f32.xlu1 %v1415_v55  ;;  %v3276_v59 = vadd.f32 %v5362_v6, %v3270_v53  ;;  %v4498_v6 = vld [vmem:[%s5643_s6 + $0x18] sm:$0xff]   ;;  %s4589_s6 = smov 12   ;;  %v1860_v53 = vadd.f32 %v5525_v15, %v5198_v7 }
0x1960   :  { %v3044_v56 = vmul.f32 %v5554_v29, %v5554_v29 }
0x1961   :  { %v3277_v36 = vmax.f32 %v3276_v59, 0.0  ;;  %vm1865_vm6 = vcmp.gt.f32.partialorder %v1860_v53, 0.0 }
0x1962   :  { %v4546_v41 = vpop.eup %4545  ;;  %v3045_v63 = vsel %vm396_vm3, %v3044_v56, 0.0 }
0x1963   :  { %v3416_v10 = vmul.f32 %v4546_v41, %v5503_v62  ;;  %3046 = vadd.xlane.f32.xlu1 %v3045_v63  ;;  %v3282_v4 = vpack.c.bf16 %v3277_v36, %v3277_v36  ;;  %v4548_v57 = vpop.eup %4547  ;;  %v1866_v41 = vmin.f32 %v1860_v53, 0.0 }
0x1964   :  { %v3629_v3 = vadd.f32 -1.0, %v4548_v57  ;;  %v4550_v30 = vpop.eup %4549 }
0x1965   :  { %v3422_v61 = vmul.f32 %v5369_v16, %v3416_v10  ;;  %4374 = vmatmul.mubr.msk.bf16.vlgmr.msra.gmra.mrb[68].mxu1 %vm396_vm3, %v3282_v4  ;;  %v3811_v16 = vadd.f32 -1.0, %v4550_v30  ;;  %v1867_v57 = vmul.f32 1.442695, %v1866_v41 }
0x1966   :  { %4386 = vmatpush3.bf16.msra.mxu1 %v4497_v11  ;;  %4389 = vmatprep.mubr.msk.bf16.mxu1 %vm4588_vm0, %v4587_v1  ;;  %v1053_v38 = vsel %vm1048_vm4, %v5529_v21, %v3629_v3 }
0x1967   :  { %4387 = vmatprep.subr.bf16.mxu1 %v4587_v1  ;;  %v3428_v62 = vadd.f32 %v5377_v20, %v3422_v61  ;;  %v1054_v13 = vadd.f32 1.0, %v1053_v38  ;;  %v2685_v31 = vsel %vm2680_vm5, %v2675_v35, %v3811_v16 }
0x1968   :  { %v2686_v18 = vadd.f32 1.0, %v2685_v31 }
0x1969   :  { %v3429_v23 = vmax.f32 %v3428_v62, 0.0  ;;  %v1055_v14 = vadd.f32 0.001, %v1054_v13 }
0x196a   :  { %4388 = vmatpush3.bf16.msra.mxu1 %v4498_v6  ;;  %v2687_v1 = vadd.f32 0.001, %v2686_v18 }
0x196b   :  { %v3434_v5 = vpack.c.bf16 %v3429_v23, %v3429_v23 }
0x196d   :  { %4390 = vmatmul.mubr.msk.bf16.vlgmr.msra.gmra.mrb[72].mxu1 %vm396_vm3, %v3434_v5 }
0x1974   :  { %1057 = vrot.lane.b32.xlu1 %v1055_v14, %s4589_s6 }
0x1978   :  { %2689 = vrot.lane.b32.xlu1 %v2687_v1, %s4589_s6 }
0x19e4   :  { %v589_v20 = vpop.xlane.xlu0 %588 }
0x19e5   :  { %v590_v19 = vmul.f32 0.03125, %v589_v20 }
0x19e7   :  { %v591_v58 = vadd.f32 1e-05, %v590_v19 }
0x19e8   :  { %v2232_v60 = vpop.xlane.xlu0 %2231 }
0x19e9   :  { %4551 = vrsqrt.f32 %v591_v58  ;;  %v2233_v28 = vmul.f32 0.03125, %v2232_v60 }
0x19eb   :  { %v2234_v21 = vadd.f32 1e-05, %v2233_v28 }
0x19ec   :  { %v1417_v17 = vpop.xlane.xlu1 %1416 }
0x19ed   :  { %4553 = vrsqrt.f32 %v2234_v21  ;;  %v1418_v32 = vmul.f32 0.03125, %v1417_v17 }
0x19ef   :  { %v1419_v27 = vadd.f32 1e-05, %v1418_v32  ;;  %v3607_v32 = vld [vmem:[%s5647_s10] ss:$0 sm:$0xff] }
0x19f0   :  { %v3047_v35 = vpop.xlane.xlu1 %3046 }
0x19f1   :  { %4555 = vrsqrt.f32 %v1419_v27  ;;  %v3048_v34 = vmul.f32 0.03125, %v3047_v35  ;;  %v889_v35 = vadd.f32 %v3607_v32, %v5027_v0 }
0x19f3   :  { %v4552_v39 = vpop.eup %4551  ;;  %v3049_v9 = vadd.f32 1e-05, %v3048_v34 }
0x19f4   :  { %v593_v42 = vmul.f32 %v4552_v39, %v5539_v37  ;;  %v1058_v27 = vpop.permute.xlu1 %1057 }
0x19f5   :  { %4557 = vrsqrt.f32 %v3049_v9  ;;  %v1061_v9 = vsel %vm1060_vm8, %v889_v35, %v1058_v27 }
0x19f6   :  { %v599_v44 = vmul.f32 %v3582_v40, %v593_v42  ;;  %4559 = vpow2.f32 %v1867_v57 }
0x19f7   :  { %v4554_v45 = vpop.eup %4553 }
0x19f8   :  { %v605_v2 = vadd.f32 %v3583_v43, %v599_v44  ;;  %v2236_v49 = vmul.f32 %v4554_v45, %v5543_v22  ;;  %v3789_v44 = vld [vmem:[%s5647_s10] ss:$0 sm:$0xff]  ;;  %v2690_v45 = vpop.permute.xlu1 %2689  ;;  %s4590_s10 = smov [#allocation3]  }
0x19fa   :  { %v606_v25 = vmax.f32 %v605_v2, 0.0  ;;  %v2242_v46 = vmul.f32 %v3582_v40, %v2236_v49  ;;  %v2523_v2 = vadd.f32 %v3789_v44, %v5425_v24 }
0x19fb   :  { %v4556_v47 = vpop.eup %4555 }
0x19fc   :  { %v613_v8 = vmul.f32 %v3584_v54, %v606_v25  ;;  %v1421_v37 = vmul.f32 %v4556_v47, %v5548_v48  ;;  %v2248_v52 = vadd.f32 %v3583_v43, %v2242_v46 }
0x19fe   :  { %v614_v50 = vsel %vm396_vm3, %v613_v8, 0.0  ;;  %v1427_v51 = vmul.f32 %v3582_v40, %v1421_v37  ;;  %v2249_v56 = vmax.f32 %v2248_v52, 0.0  ;;  %v1708_v8 = vadd.f32 %v3607_v32, %v5196_v12 }
0x19ff   :  { %v4558_v26 = vpop.eup %4557  ;;  %615 = vadd.xlane.f32.xlu0 %v614_v50 }
0x1a00   :  { %v1433_v22 = vadd.f32 %v3583_v43, %v1427_v51  ;;  %v3051_v55 = vmul.f32 %v4558_v26, %v5554_v29  ;;  %v2250_v10 = vmul.f32 %v3584_v54, %v2249_v56  ;;  %v4560_v15 = vpop.eup %4559 }
0x1a01   :  { %v3720_v29 = vadd.f32 -1.0, %v4560_v15 }
0x1a02   :  { %v1434_v59 = vmax.f32 %v1433_v22, 0.0  ;;  %v3057_v36 = vmul.f32 %v3582_v40, %v3051_v55  ;;  %v2251_v61 = vsel %vm396_vm3, %v2250_v10, 0.0 }
0x1a03   :  { %v1870_v3 = vsel %vm1865_vm6, %v1860_v53, %v3720_v29 }
0x1a04   :  { %v1435_v63 = vmul.f32 %v3584_v54, %v1434_v59  ;;  %v3063_v11 = vadd.f32 %v3583_v43, %v3057_v36  ;;  %v1871_v62 = vadd.f32 1.0, %v1870_v3 }
0x1a06   :  { %v1436_v48 = vsel %vm396_vm3, %v1435_v63, 0.0  ;;  %v3064_v4 = vmax.f32 %v3063_v11, 0.0  ;;  %v1872_v30 = vadd.f32 0.001, %v1871_v62 }
0x1a07   :  { %1437 = vadd.xlane.f32.xlu0 %v1436_v48 }
0x1a08   :  { %v3065_v6 = vmul.f32 %v3584_v54, %v3064_v4  ;;  %v2692_v54 = vsel %vm1060_vm8, %v2523_v2, %v2690_v45 }
0x1a0a   :  { %v3066_v7 = vsel %vm396_vm3, %v3065_v6, 0.0 }
0x1a0b   :  { %2252 = vadd.xlane.f32.xlu0 %v2251_v61 }
0x1a0f   :  { %3067 = vadd.xlane.f32.xlu0 %v3066_v7 }
0x1a25   :  { %1874 = vrot.lane.b32.xlu0 %v1872_v30, %s4589_s6 }
0x1a38   :  { %v3337_v23 = vpop.f32.mrb[68].mxu1 }
0x1a39   :  { %v4375_v16 = vpop.f32.mrb[69].mxu1  ;;  %v3338_v26 = vadd.f32 %v3789_v44, %v3337_v23 }
0x1a3a   :  { %v3340_v5 = vpop.f32.mrb[70].mxu1 }
0x1a3b   :  { %v4376_v38 = vpop.f32.mrb[71].mxu1 }
0x1a40   :  { %v3489_v13 = vpop.f32.mrb[72].mxu1 }
0x1a41   :  { %v3490_v31 = vadd.f32 %v5534_v33, %v3489_v13  ;;  %v4391_v14 = vpop.f32.mrb[73].mxu1  ;;  %v617_v33 = vstv %s5649_s12  ;;  %s3517_s12 = sshll.u32 %s4590_s10, 4  ;;  %s3518_s12 = int_to_ptr.vmem [resolvable:$true] %s3517_s12 }
0x1a42   :  { %v3492_v18 = vpop.f32.mrb[74].mxu1  ;;  %s4563_s20 = scalar_lea.vmem %s3518_s12, 512  ;;  %p4568_p1 = scmp.lt.s32.totalorder %s3518_s12, %s3518_s12 }
0x1a43   :  { %v3496_v1 = vmin.f32 %v3490_v31, 0.0  ;;  %v4392_v20 = vpop.f32.mrb[75].mxu1  ;;  %vm3495_vm7 = vcmp.gt.f32.partialorder %v3490_v31, 0.0  ;;  %p4564_p0 = scmp.ne.s32.totalorder %s3518_s12, %s4563_s20  ;;  %p4569_p2 = scmp.lt.s32.totalorder %s4563_s20, %s4563_s20 }
0x1a45   :  { %v3497_v19 = vmul.f32 1.442695, %v3496_v1  ;;  %p4570_p3 = por %p4569_p2, %p4568_p1 }
0x1a47   :  { %4561 = vpow2.f32 %v3497_v19  ;;  %p4571_p4 = pnand %p4570_p3, %p4564_p0 }
0x1a51   :  { %v4562_v58 = vpop.eup %4561 }
0x1a52   :  { %v3902_v60 = vadd.f32 -1.0, %v4562_v58 }
0x1a54   :  { %v3500_v28 = vsel %vm3495_vm7, %v3490_v31, %v3902_v60 }
0x1a55   :  { %v3501_v21 = vadd.f32 1.0, %v3500_v28 }
0x1a57   :  { %v3502_v17 = vadd.f32 0.001, %v3501_v21 }
0x1a59   :  { %3504 = vrot.lane.b32.xlu1 %v3502_v17, %s4589_s6 }
0x1a8c   :  { %v616_v34 = vpop.xlane.xlu0 %615 }
0x1a8d   :  { %v618_v39 = vadd.f32 %v617_v33, %v616_v34 }
0x1a8f   :  { %v1063_v40 = vsel %vm1062_vm9, %v1061_v9, %v618_v39 }
0x1a90   :  { %v1065_v42 = vsel %vm1064_vm10, %v1063_v40, 0.0 }
0x1a91   :  { %1066 = vst [vmem:[#allocation3] sm:$0xff] %v1065_v42 }
0x1a94   :  { %v1438_v43 = vpop.xlane.xlu0 %1437 }
0x1a95   :  { %v1439_v37 = vadd.f32 %v1438_v43, %v617_v33 }
0x1a98   :  { %v2253_v0 = vpop.xlane.xlu0 %2252 }
0x1a99   :  { %v2254_v49 = vadd.f32 %v2253_v0, %v617_v33 }
0x1a9b   :  { %v2693_v25 = vsel %vm1062_vm9, %v2692_v54, %v2254_v49 }
0x1a9c   :  { %v2694_v46 = vsel %vm1064_vm10, %v2693_v25, 0.0  ;;  %v3068_v47 = vpop.xlane.xlu0 %3067 }
0x1a9d   :  { %2696 = vst [vmem:[#allocation3 + $0x10] sm:$0xff] %v2694_v46  ;;  %v3069_v53 = vadd.f32 %v3068_v47, %v617_v33 }
0x1aa0   :  { %v1875_v50 = vpop.permute.xlu0 %1874 }
0x1aa1   :  { %v1877_v51 = vsel %vm1060_vm8, %v1708_v8, %v1875_v50 }
0x1aa2   :  { %v1878_v52 = vsel %vm1062_vm9, %v1877_v51, %v1439_v37 }
0x1aa3   :  { %v1879_v24 = vsel %vm1064_vm10, %v1878_v52, 0.0 }
0x1aa4   :  { %1881 = vst [vmem:[#allocation3 + $0x8] sm:$0xff] %v1879_v24 }
0x1acb   :  { %v3505_v22 = vpop.permute.xlu1 %3504 }
0x1acc   :  { %v3507_v55 = vsel %vm1060_vm8, %v3338_v26, %v3505_v22 }
0x1acd   :  { %v3508_v59 = vsel %vm1062_vm9, %v3507_v55, %v3069_v53 }
0x1ace   :  { %v3509_v12 = vsel %vm1064_vm10, %v3508_v59, 0.0 }
0x1acf   :  { %3511 = vst [vmem:[#allocation3 + $0x18] sm:$0xff] %v3509_v12 }
0x1ad0   :  { %4574 = shalt.err (!%p4571_p4)
}
0x1ad1   :  { %s4575_s2 = scalar_lea.hbm %s5650_s13, 512 }
0x1ad2   :  { %p4576_p5 = scmp.ne.s32.totalorder %s5650_s13, %s4575_s2  ;;  %p4579_p6 = scmp.lt.u32.totalorder %s4575_s2, %s5650_s13 }
0x1ad4   :  { %p4581_p7 = pnand %p4579_p6, %p4576_p5 }
0x1ad6   :  { %4584 = shalt.err (!%p4581_p7)
}
0x1ad7   :  { %s4591_s8 = smov 128   ;;  %s4592_s24 = smov 8  }
0x1ad8   :  { %3523 = dma.vmem_to_hbm [thread:$0]  %s3518_s12, 512, %s5650_s13, [#allocation4], %s4591_s8, %s4591_s8, %s4592_s24  }
0x1ad9   :  { %4585 = dma.done.wait [#allocation4], 512  }
0x1ada   :  { %4586 = vsyncadd [#allocation4], 4294966784 }
0x1adb   :  { %3527 = vsyncpa [#allocation4], 1 }

</bundles_post_ra>
